<compile_context>
chip_gen: v5e
topology: v5e:2x2
jax: 0.10.0
libtpu: 0.0.40
codegen_flags: <defaults>
</compile_context>

<pallas_src>
import functools
import math

import jax
import jax.numpy as jnp
from jax import lax
from jax.experimental import pallas as pl
from jax.experimental.pallas import tpu as pltpu


def _round_up(x, m):
    return ((x + m - 1) // m) * m


def _cdiv(a, b):
    return -(-a // b)


# ----------------------- fused linear (+bias, +ReLU) kernel -----------------------

def _linear_kernel(x_ref, w_ref, b_ref, o_ref, *, relu):
    y = jnp.dot(x_ref[...], w_ref[...], preferred_element_type=jnp.float32)
    y = y + b_ref[...]
    if relu:
        y = jnp.maximum(y, 0.0)
    o_ref[...] = y


def linear(x, w, b=None, relu=False):
    """y = x @ w (+ b) (+ ReLU).  x: [..., Cin], w: [Cin, Cout] (torch W^T)."""
    orig = x.shape
    cin, cout = w.shape
    x2 = x.reshape(-1, cin).astype(jnp.float32)
    m = x2.shape[0]
    # Row tile up to 512 (mem-bound sweet spot); keep >=2 grid steps when there
    # is enough work so v7x's second TensorCore is used.
    nsteps = max(1, _cdiv(m, 512))
    if m >= 16:
        nsteps = max(nsteps, 2)
    tm = _round_up(_cdiv(m, nsteps), 8)
    mp = tm * nsteps
    if mp != m:
        x2 = jnp.pad(x2, ((0, mp - m), (0, 0)))
    bias = b if b is not None else jnp.zeros((cout,), jnp.float32)
    bias = bias.reshape(1, cout).astype(jnp.float32)
    out = pl.pallas_call(
        functools.partial(_linear_kernel, relu=relu),
        out_shape=jax.ShapeDtypeStruct((mp, cout), jnp.float32),
        grid=(nsteps,),
        in_specs=[
            pl.BlockSpec((tm, cin), lambda i: (i, 0)),
            pl.BlockSpec((cin, cout), lambda i: (0, 0)),
            pl.BlockSpec((1, cout), lambda i: (0, 0)),
        ],
        out_specs=pl.BlockSpec((tm, cout), lambda i: (i, 0)),
        compiler_params=pltpu.CompilerParams(dimension_semantics=("parallel",)),
    )(x2, w.astype(jnp.float32), bias)
    return out[:m].reshape(orig[:-1] + (cout,))


# ----------------------- fused TransformerBlock kernel -----------------------

_GB_MAX = 8  # attention groups per grid step (static unroll bound)


def _transformer_kernel(x_ref, wq_ref, wk_ref, wv_ref, bq_ref, bk_ref, bv_ref,
                        w2_ref, b2_ref, o_ref):
    wq = wq_ref[...]
    wk = wk_ref[...]
    wv = wv_ref[...]
    w2 = w2_ref[...]
    bq = bq_ref[...]
    bk = bk_ref[...]
    bv = bv_ref[...]
    b2 = b2_ref[...]
    gb = x_ref.shape[0]
    for g in range(gb):                                            # static unroll over groups
        xg = x_ref[g]                                              # [L, Dp]
        # fc1 and 1/sqrt(d_model) already folded into wq/bq (wk, wv likewise).
        q = jnp.dot(xg, wq, preferred_element_type=jnp.float32) + bq
        k = jnp.dot(xg, wk, preferred_element_type=jnp.float32) + bk
        v = jnp.dot(xg, wv, preferred_element_type=jnp.float32) + bv
        s = lax.dot_general(q, k, (((1,), (1,)), ((), ())),
                            preferred_element_type=jnp.float32)    # [L, L]
        s = s - jnp.max(s, axis=-1, keepdims=True)                 # stable softmax
        e = jnp.exp(s)
        attn = e * pl.reciprocal(jnp.sum(e, axis=-1, keepdims=True), approx=True)
        o = jnp.dot(attn, v, preferred_element_type=jnp.float32)   # [L, Dm]
        res = jnp.dot(o, w2, preferred_element_type=jnp.float32) + b2
        o_ref[g] = jnp.maximum(res, 0.0)                           # fc2 + ReLU


def transformer_block(p, features):
    """Fused TransformerBlock: folded q/k/v projections + attention + fc2+ReLU
    in a single pallas_call; several attention groups per grid step."""
    dp, dm = p["fc1_w"].shape
    scale = 1.0 / math.sqrt(dm)
    # Fold fc1 into the projections: (x @ W1 + b1) @ Wq == x @ (W1 @ Wq) + b1 @ Wq.
    wq = (p["fc1_w"] @ p["wq"]) * scale            # 1/sqrt(d_model) folded into q
    bq = (p["fc1_b"] @ p["wq"]) * scale
    wk = p["fc1_w"] @ p["wk"]
    bk = p["fc1_b"] @ p["wk"]
    wv = p["fc1_w"] @ p["wv"]
    bv = p["fc1_b"] @ p["wv"]

    lead = features.shape[:-2]
    L = features.shape[-2]
    G = math.prod(lead) if lead else 1
    xf = features.reshape(G, L, dp).astype(jnp.float32)

    nblk = max(1, _cdiv(G, _GB_MAX))
    if G >= 2:
        nblk = max(nblk, 2)            # >=2 parallel steps -> both v7x TensorCores
    gb = _cdiv(G, nblk)
    gp = gb * nblk
    if gp != G:
        xf = jnp.pad(xf, ((0, gp - G), (0, 0), (0, 0)))

    wspec = pl.BlockSpec((dp, dm), lambda g: (0, 0))
    bspec = pl.BlockSpec((1, dm), lambda g: (0, 0))
    out = pl.pallas_call(
        _transformer_kernel,
        out_shape=jax.ShapeDtypeStruct((gp, L, dp), jnp.float32),
        grid=(nblk,),
        in_specs=[
            pl.BlockSpec((gb, L, dp), lambda g: (g, 0, 0)),
            wspec, wspec, wspec, bspec, bspec, bspec,
            pl.BlockSpec((dm, dp), lambda g: (0, 0)),
            pl.BlockSpec((1, dp), lambda g: (0, 0)),
        ],
        out_specs=pl.BlockSpec((gb, L, dp), lambda g: (g, 0, 0)),
        compiler_params=pltpu.CompilerParams(dimension_semantics=("parallel",)),
    )(xf,
      wq.astype(jnp.float32), wk.astype(jnp.float32), wv.astype(jnp.float32),
      bq.reshape(1, dm).astype(jnp.float32),
      bk.reshape(1, dm).astype(jnp.float32),
      bv.reshape(1, dm).astype(jnp.float32),
      p["fc2_w"].astype(jnp.float32),
      p["fc2_b"].reshape(1, dp).astype(jnp.float32))
    return out[:G].reshape(features.shape)


# ----------------------------- square distance kernel -----------------------------

def _sqdist_kernel(src_ref, dst_ref, o_ref):
    s = src_ref[...]                                               # [tn, C]
    d = dst_ref[...]                                               # [tm, C]
    cross = lax.dot_general(s, d, (((1,), (1,)), ((), ())),
                            preferred_element_type=jnp.float32)    # [tn, tm]
    ss = jnp.sum(s * s, axis=-1, keepdims=True)                    # [tn, 1]
    ones_c = jnp.ones((1, d.shape[1]), jnp.float32)
    dd = lax.dot_general(ones_c, d * d, (((1,), (1,)), ((), ())),
                         preferred_element_type=jnp.float32)       # [1, tm] (row norms, lane-oriented)
    o_ref[...] = ss + dd - 2.0 * cross


def square_distance(src, dst):
    """Pairwise squared distances: [B,N,C] x [B,M,C] -> [B,N,M]."""
    B, N, C = src.shape
    M = dst.shape[1]
    src = src.astype(jnp.float32)
    dst = dst.astype(jnp.float32)
    tn = min(512, _round_up(N, 8))
    tm = min(512, _round_up(M, 8))
    np_, mp = _round_up(N, tn), _round_up(M, tm)
    if np_ != N:
        src = jnp.pad(src, ((0, 0), (0, np_ - N), (0, 0)))
    if mp != M:
        dst = jnp.pad(dst, ((0, 0), (0, mp - M), (0, 0)))
    out = pl.pallas_call(
        _sqdist_kernel,
        out_shape=jax.ShapeDtypeStruct((B, np_, mp), jnp.float32),
        grid=(B, np_ // tn, mp // tm),
        in_specs=[
            pl.BlockSpec((None, tn, C), lambda b, i, j: (b, i, 0)),
            pl.BlockSpec((None, tm, C), lambda b, i, j: (b, j, 0)),
        ],
        out_specs=pl.BlockSpec((None, tn, tm), lambda b, i, j: (b, i, j)),
        compiler_params=pltpu.CompilerParams(
            dimension_semantics=("parallel", "parallel", "parallel")),
    )(src, dst)
    return out[:, :N, :M]


# ----------------------------- fused classification head -----------------------------

def _cls_head_kernel(x_ref, w1_ref, b1_ref, w2_ref, b2_ref, w3_ref, b3_ref, o_ref):
    h = jnp.dot(x_ref[...], w1_ref[...], preferred_element_type=jnp.float32) + b1_ref[...]
    h = jnp.maximum(h, 0.0)
    h = jnp.dot(h, w2_ref[...], preferred_element_type=jnp.float32) + b2_ref[...]
    h = jnp.maximum(h, 0.0)
    o_ref[...] = jnp.dot(h, w3_ref[...], preferred_element_type=jnp.float32) + b3_ref[...]


def cls_head(params, feat):
    B = feat.shape[0]
    nc = params["cls_fc3_w"].shape[1]
    return pl.pallas_call(
        _cls_head_kernel,
        out_shape=jax.ShapeDtypeStruct((B, nc), jnp.float32),
    )(feat.astype(jnp.float32),
      params["cls_fc1_w"], params["cls_fc1_b"].reshape(1, -1),
      params["cls_fc2_w"], params["cls_fc2_b"].reshape(1, -1),
      params["cls_fc3_w"], params["cls_fc3_b"].reshape(1, -1))


# ------------------------------- JAX glue -----------------------------------

def index_points(points, idx):
    """points: [B, N, C], idx: [B, ...] -> [B, ..., C]"""
    B = points.shape[0]
    batch_idx = jnp.arange(B).reshape((B,) + (1,) * (idx.ndim - 1))
    return points[batch_idx, idx]


def knn_indices(dists, k):
    """Indices of the k smallest distances per row (replaces full argsort)."""
    return lax.top_k(-dists, k)[1]


def farthest_point_sample(xyz, npoint):
    """Deterministic FPS (reference uses a random initial index; we start at 0)."""
    B, N, _ = xyz.shape

    def body(i, state):
        centroids, distance, farthest = state
        centroids = centroids.at[:, i].set(farthest)
        centroid = index_points(xyz, farthest[:, None])            # [B,1,3]
        dist = jnp.sum((xyz - centroid) ** 2, axis=-1)             # [B,N]
        distance = jnp.minimum(distance, dist)
        farthest = jnp.argmax(distance, axis=-1).astype(jnp.int32)
        return centroids, distance, farthest

    centroids = jnp.zeros((B, npoint), jnp.int32)
    distance = jnp.full((B, N), 1e10, jnp.float32)
    farthest = jnp.zeros((B,), jnp.int32)
    centroids, _, _ = lax.fori_loop(0, npoint, body, (centroids, distance, farthest))
    return centroids


def sample_and_group_knn(npoint, nsample, xyz, points):
    fps_idx = farthest_point_sample(xyz, npoint)                   # [B,S]
    new_xyz = index_points(xyz, fps_idx)                           # [B,S,3]
    dists = square_distance(new_xyz, xyz)                          # [B,S,N]
    idx = knn_indices(dists, nsample)                              # [B,S,K]
    grouped_xyz = index_points(xyz, idx)                           # [B,S,K,3]
    grouped_xyz_norm = grouped_xyz - new_xyz[:, :, None, :]
    grouped_points = index_points(points, idx)                     # [B,S,K,D]
    new_points = jnp.concatenate([grouped_xyz_norm, grouped_points], axis=-1)
    return new_xyz, new_points


def batchnorm_relu(x, gamma, beta, eps=1e-5):
    """Training-mode BatchNorm (batch statistics, biased var) + ReLU, channels-last:
    statistics over every axis except the trailing channel axis (== NCHW (0,2,3))."""
    axes = tuple(range(x.ndim - 1))
    mean = jnp.mean(x, axis=axes, keepdims=True)
    var = jnp.mean(jnp.square(x - mean), axis=axes, keepdims=True)
    y = (x - mean) / jnp.sqrt(var + eps)
    y = y * gamma + beta
    return jnp.maximum(y, 0.0)


# ----------------------------- module forwards ------------------------------

def set_abstraction(p, xyz, points, *, npoint, nsample):
    new_xyz, new_points = sample_and_group_knn(npoint, nsample, xyz, points)
    h = transformer_block(p["transformer"], new_points)            # [B,S,K,Cin]
    # Channels-last 1x1 convs (matmul) + BN + ReLU; no NCHW<->NHWC transposes.
    for conv, bn in zip(p["convs"], p["bns"]):
        h = linear(h, conv["w"], conv["b"])                        # [B,S,K,Cout]
        h = batchnorm_relu(h, bn["gamma"], bn["beta"])
    new_points = jnp.max(h, axis=2)                                # max over K -> [B,S,Cout]
    return new_xyz, new_points


def backbone_forward(p, x, cfg):
    nneighbor = cfg["nneighbor"]
    xyz = x[..., :3]
    dists = square_distance(xyz, xyz)
    knn_idx = knn_indices(dists, nneighbor)                        # [B,N,k]
    knn_xyz_n = index_points(x, knn_idx)                           # [B,N,k,6]
    xyz_pos = xyz[:, :, None, :] - knn_xyz_n[..., :3]
    t = jnp.concatenate([xyz_pos, knn_xyz_n], axis=3)              # [B,N,k,9]
    # NOTE: reference calls self.res_(t, self.transformer0) but discards the result
    # (no in-place effect on `t`), so it is skipped — output is unchanged.
    t = linear(t, p["fc_delta_w"], p["fc_delta_b"], relu=True)     # fc_delta
    x_feat = jnp.max(t, axis=2)                                    # max over k
    x_feat = linear(x_feat, p["linear1_w"], p["linear1_b"], relu=True)
    # res3_: points = relu(transformer1(x) + x)
    tr = transformer_block(p["transformer1"], x_feat)
    points = jnp.maximum(tr + x_feat, 0.0)
    for i in range(cfg["nblocks"]):
        npoint = cfg["num_point"] // 4 ** (i + 1)
        xyz, points = set_abstraction(p["transition_downs"][i], xyz, points,
                                      npoint=npoint, nsample=nneighbor)
        # NOTE: reference calls self.res2_(points, ...) and discards the result; skipped.
    return points


def point_transformer_cls(params, x, *, cfg):
    points = backbone_forward(params["backbone"], x, cfg)          # [B,S,32*2**nblocks]
    feat = jnp.mean(points, axis=1)
    logits = cls_head(params, feat)
    return jax.nn.log_softmax(logits, axis=-1)


# ------------------------------ parameter init -------------------------------

def dense_init(key, cin, cout, bias=True):
    kw, kb = jax.random.split(key)
    bound = 1.0 / math.sqrt(cin)
    w = jax.random.uniform(kw, (cin, cout), jnp.float32, -bound, bound)
    b = jax.random.uniform(kb, (cout,), jnp.float32, -bound, bound) if bias else None
    return w, b


def init_transformer_block(key, d_points, d_model):
    ks = jax.random.split(key, 5)
    fc1_w, fc1_b = dense_init(ks[0], d_points, d_model)
    fc2_w, fc2_b = dense_init(ks[1], d_model, d_points)
    wq, _ = dense_init(ks[2], d_model, d_model, bias=False)
    wk, _ = dense_init(ks[3], d_model, d_model, bias=False)
    wv, _ = dense_init(ks[4], d_model, d_model, bias=False)
    return dict(fc1_w=fc1_w, fc1_b=fc1_b, fc2_w=fc2_w, fc2_b=fc2_b,
                wq=wq, wk=wk, wv=wv)


def init_params(key, cfg):
    keys = iter(jax.random.split(key, 64))
    bb = {}
    bb["fc_delta_w"], bb["fc_delta_b"] = dense_init(next(keys), 9, 32)
    bb["linear1_w"], bb["linear1_b"] = dense_init(next(keys), 32, 32)
    bb["transformer1"] = init_transformer_block(next(keys), 32, cfg["transformer_dim"])
    # (transformer0 / backbone.fc2 / bn1 / bn2 / bnn / transformers never affect the
    #  output in the reference forward, so their params are not materialized.)
    tds = []
    for i in range(cfg["nblocks"]):
        channel = 32 * 2 ** (i + 1)
        in_ch = channel // 2 + 3
        td = {"transformer": init_transformer_block(next(keys), in_ch, 512)}
        convs, bns = [], []
        last = in_ch
        for out_ch in (channel, channel):
            w, b = dense_init(next(keys), last, out_ch)
            convs.append({"w": w, "b": b})
            bns.append({"gamma": jnp.ones((out_ch,), jnp.float32),
                        "beta": jnp.zeros((out_ch,), jnp.float32)})
            last = out_ch
        td["convs"] = convs
        td["bns"] = bns
        tds.append(td)
    bb["transition_downs"] = tds

    params = {"backbone": bb}
    d_final = 32 * 2 ** cfg["nblocks"]
    params["cls_fc1_w"], params["cls_fc1_b"] = dense_init(next(keys), d_final, 256)
    params["cls_fc2_w"], params["cls_fc2_b"] = dense_init(next(keys), 256, 64)
    params["cls_fc3_w"], params["cls_fc3_b"] = dense_init(next(keys), 64, cfg["num_class"])
    return params


# ---------------------------------- main -------------------------------------

if __name__ == "__main__":
    cfg = dict(
        num_point=16,       # cfg.num_point
        nblocks=1,          # cfg.model.nblocks
        nneighbor=4,        # cfg.model.nneighbor
        num_class=4,        # cfg.num_class
        input_dim=6,        # cfg.input_dim (3 xyz + 3 feats -> cat gives 9 for fc_delta)
        transformer_dim=64, # cfg.model.transformer_dim
    )
    key = jax.random.PRNGKey(0)
    pkey, xkey = jax.random.split(key)
    params = init_params(pkey, cfg)

    B = 2
    x = jax.random.normal(xkey, (B, cfg["num_point"], cfg["input_dim"]), jnp.float32)

    forward = jax.jit(functools.partial(point_transformer_cls, cfg=cfg))
    out = forward(params, x)
    jax.block_until_ready(out)
    assert out.shape == (B, cfg["num_class"]), out.shape
    print("KERNEL_OK")
</pallas_src>

<mosaic_0001>
module attributes {stable_mosaic.version = 11 : i64} {
  func.func @_sqdist_kernel(%arg0: i32, %arg1: i32, %arg2: i32, %arg3: memref<1x16x3xf32, #tpu.memory_space<vmem>>, %arg4: memref<1x16x3xf32, #tpu.memory_space<vmem>>, %arg5: memref<1x16x16xf32, #tpu.memory_space<vmem>>) attributes {dimension_semantics = [#tpu.dimension_semantics<parallel>, #tpu.dimension_semantics<parallel>, #tpu.dimension_semantics<parallel>], iteration_bounds = array<i64: 2, 1, 1>, scalar_prefetch = 0 : i64, scratch_operands = 0 : i64, tpu.core_type = #tpu.core_type<tc>, window_params = [{transform_indices = @transform_0, window_bounds = array<i64: 1, 16, 3>}, {transform_indices = @transform_1, window_bounds = array<i64: 1, 16, 3>}, {transform_indices = @transform_2, window_bounds = array<i64: 1, 16, 16>}]} {
    %c0 = arith.constant 0 : index
    %c0_0 = arith.constant 0 : index
    %c0_1 = arith.constant 0 : index
    %0 = vector.load %arg3[%c0, %c0_0, %c0_1] : memref<1x16x3xf32, #tpu.memory_space<vmem>>, vector<1x16x3xf32>
    %1 = vector.shape_cast %0 : vector<1x16x3xf32> to vector<16x3xf32>
    %c0_2 = arith.constant 0 : index
    %c0_3 = arith.constant 0 : index
    %c0_4 = arith.constant 0 : index
    %2 = vector.load %arg4[%c0_2, %c0_3, %c0_4] : memref<1x16x3xf32, #tpu.memory_space<vmem>>, vector<1x16x3xf32>
    %3 = vector.shape_cast %2 : vector<1x16x3xf32> to vector<16x3xf32>
    %cst = arith.constant dense<0.000000e+00> : vector<16x16xf32>
    %4 = tpu.matmul %1, %3, %cst {dimension_numbers = #tpu.dot_dimension_numbers<[1], [1], [0], [0], [0, 0, 1, 0], [], []>} : vector<16x3xf32>, vector<16x3xf32>, vector<16x16xf32> -> vector<16x16xf32>
    %5 = arith.mulf %1, %1 : vector<16x3xf32>
    %cst_5 = arith.constant dense<0.000000e+00> : vector<16xf32>
    %6 = vector.multi_reduction <add>, %5, %cst_5 [1] : vector<16x3xf32> to vector<16xf32>
    %7 = vector.shape_cast %6 : vector<16xf32> to vector<16x1xf32>
    %cst_6 = arith.constant 1.000000e+00 : f32
    %8 = vector.broadcast %cst_6 : f32 to vector<1x3xf32>
    %9 = arith.mulf %3, %3 : vector<16x3xf32>
    %cst_7 = arith.constant dense<0.000000e+00> : vector<1x16xf32>
    %10 = tpu.matmul %8, %9, %cst_7 {dimension_numbers = #tpu.dot_dimension_numbers<[1], [1], [0], [0], [0, 0, 1, 0], [], []>} : vector<1x3xf32>, vector<16x3xf32>, vector<1x16xf32> -> vector<1x16xf32>
    %11 = vector.broadcast %7 : vector<16x1xf32> to vector<16x16xf32>
    %12 = vector.broadcast %10 : vector<1x16xf32> to vector<16x16xf32>
    %13 = arith.addf %11, %12 : vector<16x16xf32>
    %cst_8 = arith.constant 2.000000e+00 : f32
    %14 = vector.broadcast %cst_8 : f32 to vector<16x16xf32>
    %15 = arith.mulf %14, %4 : vector<16x16xf32>
    %16 = arith.subf %13, %15 : vector<16x16xf32>
    %c0_9 = arith.constant 0 : index
    %c0_10 = arith.constant 0 : index
    %c0_11 = arith.constant 0 : index
    %17 = vector.load %arg5[%c0_9, %c0_10, %c0_11] : memref<1x16x16xf32, #tpu.memory_space<vmem>>, vector<1x16x16xf32>
    %18 = vector.shape_cast %17 : vector<1x16x16xf32> to vector<16x16xf32>
    %19 = vector.shape_cast %16 : vector<16x16xf32> to vector<1x16x16xf32>
    tpu.vector_store %arg5[%c0_9, %c0_10, %c0_11], %19 {strides = array<i32>} : memref<1x16x16xf32, #tpu.memory_space<vmem>>, vector<1x16x16xf32>,
    return
  }
  func.func @transform_0(%arg0: i32, %arg1: i32, %arg2: i32) -> (i32, i32, i32) {
    %c0_i32 = arith.constant 0 : i32
    %c0_i32_0 = arith.constant 0 : i32
    return %arg0, %arg1, %c0_i32 : i32, i32, i32
  }
  func.func @transform_1(%arg0: i32, %arg1: i32, %arg2: i32) -> (i32, i32, i32) {
    %c0_i32 = arith.constant 0 : i32
    %c0_i32_0 = arith.constant 0 : i32
    return %arg0, %arg2, %c0_i32 : i32, i32, i32
  }
  func.func @transform_2(%arg0: i32, %arg1: i32, %arg2: i32) -> (i32, i32, i32) {
    %c0_i32 = arith.constant 0 : i32
    return %arg0, %arg1, %arg2 : i32, i32, i32
  }
}

module attributes {stable_mosaic.version = 11 : i64} {
  func.func @_linear_kernel(%arg0: i32, %arg1: memref<16x32xf32, #tpu.memory_space<vmem>>, %arg2: memref<32x32xf32, #tpu.memory_space<vmem>>, %arg3: memref<1x32xf32, #tpu.memory_space<vmem>>, %arg4: memref<16x32xf32, #tpu.memory_space<vmem>>) attributes {dimension_semantics = [#tpu.dimension_semantics<parallel>], iteration_bounds = array<i64: 2>, scalar_prefetch = 0 : i64, scratch_operands = 0 : i64, tpu.core_type = #tpu.core_type<tc>, window_params = [{transform_indices = @transform_0, window_bounds = array<i64: 16, 32>}, {pipeline_mode = #tpu.pipeline_mode<synchronous>, transform_indices = @transform_1, window_bounds = array<i64: 32, 32>}, {pipeline_mode = #tpu.pipeline_mode<synchronous>, transform_indices = @transform_2, window_bounds = array<i64: 1, 32>}, {transform_indices = @transform_3, window_bounds = array<i64: 16, 32>}]} {
    %c0 = arith.constant 0 : index
    %c0_0 = arith.constant 0 : index
    %0 = vector.load %arg1[%c0, %c0_0] : memref<16x32xf32, #tpu.memory_space<vmem>>, vector<16x32xf32>
    %c0_1 = arith.constant 0 : index
    %c0_2 = arith.constant 0 : index
    %1 = vector.load %arg2[%c0_1, %c0_2] : memref<32x32xf32, #tpu.memory_space<vmem>>, vector<32x32xf32>
    %cst = arith.constant dense<0.000000e+00> : vector<16x32xf32>
    %2 = tpu.matmul %0, %1, %cst {dimension_numbers = #tpu.dot_dimension_numbers<[1], [0], [0], [1], [0, 0, 1, 1], [], []>} : vector<16x32xf32>, vector<32x32xf32>, vector<16x32xf32> -> vector<16x32xf32>
    %c0_3 = arith.constant 0 : index
    %c0_4 = arith.constant 0 : index
    %3 = vector.load %arg3[%c0_3, %c0_4] : memref<1x32xf32, #tpu.memory_space<vmem>>, vector<1x32xf32>
    %4 = vector.broadcast %3 : vector<1x32xf32> to vector<16x32xf32>
    %5 = arith.addf %2, %4 : vector<16x32xf32>
    %cst_5 = arith.constant 0.000000e+00 : f32
    %6 = vector.broadcast %cst_5 : f32 to vector<16x32xf32>
    %7 = arith.maximumf %5, %6 : vector<16x32xf32>
    %c0_6 = arith.constant 0 : index
    %c0_7 = arith.constant 0 : index
    %8 = vector.load %arg4[%c0_6, %c0_7] : memref<16x32xf32, #tpu.memory_space<vmem>>, vector<16x32xf32>
    tpu.vector_store %arg4[%c0_6, %c0_7], %7 {strides = array<i32>} : memref<16x32xf32, #tpu.memory_space<vmem>>, vector<16x32xf32>,
    return
  }
  func.func @transform_0(%arg0: i32) -> (i32, i32) {
    %c0_i32 = arith.constant 0 : i32
    %c0_i32_0 = arith.constant 0 : i32
    return %arg0, %c0_i32 : i32, i32
  }
  func.func @transform_1(%arg0: i32) -> (i32, i32) {
    %c0_i32 = arith.constant 0 : i32
    %c0_i32_0 = arith.constant 0 : i32
    %c0_i32_1 = arith.constant 0 : i32
    return %c0_i32, %c0_i32_0 : i32, i32
  }
  func.func @transform_2(%arg0: i32) -> (i32, i32) {
    %c0_i32 = arith.constant 0 : i32
    %c0_i32_0 = arith.constant 0 : i32
    %c0_i32_1 = arith.constant 0 : i32
    return %c0_i32, %c0_i32_0 : i32, i32
  }
  func.func @transform_3(%arg0: i32) -> (i32, i32) {
    %c0_i32 = arith.constant 0 : i32
    %c0_i32_0 = arith.constant 0 : i32
    return %arg0, %c0_i32 : i32, i32
  }
}

module attributes {stable_mosaic.version = 11 : i64} {
  func.func @_linear_kernel(%arg0: i32, %arg1: memref<64x9xf32, #tpu.memory_space<vmem>>, %arg2: memref<9x32xf32, #tpu.memory_space<vmem>>, %arg3: memref<1x32xf32, #tpu.memory_space<vmem>>, %arg4: memref<64x32xf32, #tpu.memory_space<vmem>>) attributes {dimension_semantics = [#tpu.dimension_semantics<parallel>], iteration_bounds = array<i64: 2>, scalar_prefetch = 0 : i64, scratch_operands = 0 : i64, tpu.core_type = #tpu.core_type<tc>, window_params = [{transform_indices = @transform_0, window_bounds = array<i64: 64, 9>}, {pipeline_mode = #tpu.pipeline_mode<synchronous>, transform_indices = @transform_1, window_bounds = array<i64: 9, 32>}, {pipeline_mode = #tpu.pipeline_mode<synchronous>, transform_indices = @transform_2, window_bounds = array<i64: 1, 32>}, {transform_indices = @transform_3, window_bounds = array<i64: 64, 32>}]} {
    %c0 = arith.constant 0 : index
    %c0_0 = arith.constant 0 : index
    %0 = vector.load %arg1[%c0, %c0_0] : memref<64x9xf32, #tpu.memory_space<vmem>>, vector<64x9xf32>
    %c0_1 = arith.constant 0 : index
    %c0_2 = arith.constant 0 : index
    %1 = vector.load %arg2[%c0_1, %c0_2] : memref<9x32xf32, #tpu.memory_space<vmem>>, vector<9x32xf32>
    %cst = arith.constant dense<0.000000e+00> : vector<64x32xf32>
    %2 = tpu.matmul %0, %1, %cst {dimension_numbers = #tpu.dot_dimension_numbers<[1], [0], [0], [1], [0, 0, 1, 1], [], []>} : vector<64x9xf32>, vector<9x32xf32>, vector<64x32xf32> -> vector<64x32xf32>
    %c0_3 = arith.constant 0 : index
    %c0_4 = arith.constant 0 : index
    %3 = vector.load %arg3[%c0_3, %c0_4] : memref<1x32xf32, #tpu.memory_space<vmem>>, vector<1x32xf32>
    %4 = vector.broadcast %3 : vector<1x32xf32> to vector<64x32xf32>
    %5 = arith.addf %2, %4 : vector<64x32xf32>
    %cst_5 = arith.constant 0.000000e+00 : f32
    %6 = vector.broadcast %cst_5 : f32 to vector<64x32xf32>
    %7 = arith.maximumf %5, %6 : vector<64x32xf32>
    %c0_6 = arith.constant 0 : index
    %c0_7 = arith.constant 0 : index
    %8 = vector.load %arg4[%c0_6, %c0_7] : memref<64x32xf32, #tpu.memory_space<vmem>>, vector<64x32xf32>
    tpu.vector_store %arg4[%c0_6, %c0_7], %7 {strides = array<i32>} : memref<64x32xf32, #tpu.memory_space<vmem>>, vector<64x32xf32>,
    return
  }
  func.func @transform_0(%arg0: i32) -> (i32, i32) {
    %c0_i32 = arith.constant 0 : i32
    %c0_i32_0 = arith.constant 0 : i32
    return %arg0, %c0_i32 : i32, i32
  }
  func.func @transform_1(%arg0: i32) -> (i32, i32) {
    %c0_i32 = arith.constant 0 : i32
    %c0_i32_0 = arith.constant 0 : i32
    %c0_i32_1 = arith.constant 0 : i32
    return %c0_i32, %c0_i32_0 : i32, i32
  }
  func.func @transform_2(%arg0: i32) -> (i32, i32) {
    %c0_i32 = arith.constant 0 : i32
    %c0_i32_0 = arith.constant 0 : i32
    %c0_i32_1 = arith.constant 0 : i32
    return %c0_i32, %c0_i32_0 : i32, i32
  }
  func.func @transform_3(%arg0: i32) -> (i32, i32) {
    %c0_i32 = arith.constant 0 : i32
    %c0_i32_0 = arith.constant 0 : i32
    return %arg0, %c0_i32 : i32, i32
  }
}

module attributes {stable_mosaic.version = 11 : i64} {
  func.func @_transformer_kernel(%arg0: i32, %arg1: memref<1x16x32xf32, #tpu.memory_space<vmem>>, %arg2: memref<32x64xf32, #tpu.memory_space<vmem>>, %arg3: memref<32x64xf32, #tpu.memory_space<vmem>>, %arg4: memref<32x64xf32, #tpu.memory_space<vmem>>, %arg5: memref<1x64xf32, #tpu.memory_space<vmem>>, %arg6: memref<1x64xf32, #tpu.memory_space<vmem>>, %arg7: memref<1x64xf32, #tpu.memory_space<vmem>>, %arg8: memref<64x32xf32, #tpu.memory_space<vmem>>, %arg9: memref<1x32xf32, #tpu.memory_space<vmem>>, %arg10: memref<1x16x32xf32, #tpu.memory_space<vmem>>) attributes {dimension_semantics = [#tpu.dimension_semantics<parallel>], iteration_bounds = array<i64: 2>, scalar_prefetch = 0 : i64, scratch_operands = 0 : i64, tpu.core_type = #tpu.core_type<tc>, window_params = [{transform_indices = @transform_0, window_bounds = array<i64: 1, 16, 32>}, {pipeline_mode = #tpu.pipeline_mode<synchronous>, transform_indices = @transform_1, window_bounds = array<i64: 32, 64>}, {pipeline_mode = #tpu.pipeline_mode<synchronous>, transform_indices = @transform_2, window_bounds = array<i64: 32, 64>}, {pipeline_mode = #tpu.pipeline_mode<synchronous>, transform_indices = @transform_3, window_bounds = array<i64: 32, 64>}, {pipeline_mode = #tpu.pipeline_mode<synchronous>, transform_indices = @transform_4, window_bounds = array<i64: 1, 64>}, {pipeline_mode = #tpu.pipeline_mode<synchronous>, transform_indices = @transform_5, window_bounds = array<i64: 1, 64>}, {pipeline_mode = #tpu.pipeline_mode<synchronous>, transform_indices = @transform_6, window_bounds = array<i64: 1, 64>}, {pipeline_mode = #tpu.pipeline_mode<synchronous>, transform_indices = @transform_7, window_bounds = array<i64: 64, 32>}, {pipeline_mode = #tpu.pipeline_mode<synchronous>, transform_indices = @transform_8, window_bounds = array<i64: 1, 32>}, {transform_indices = @transform_9, window_bounds = array<i64: 1, 16, 32>}]} {
    %c0 = arith.constant 0 : index
    %c0_0 = arith.constant 0 : index
    %0 = vector.load %arg2[%c0, %c0_0] : memref<32x64xf32, #tpu.memory_space<vmem>>, vector<32x64xf32>
    %c0_1 = arith.constant 0 : index
    %c0_2 = arith.constant 0 : index
    %1 = vector.load %arg3[%c0_1, %c0_2] : memref<32x64xf32, #tpu.memory_space<vmem>>, vector<32x64xf32>
    %c0_3 = arith.constant 0 : index
    %c0_4 = arith.constant 0 : index
    %2 = vector.load %arg4[%c0_3, %c0_4] : memref<32x64xf32, #tpu.memory_space<vmem>>, vector<32x64xf32>
    %c0_5 = arith.constant 0 : index
    %c0_6 = arith.constant 0 : index
    %3 = vector.load %arg8[%c0_5, %c0_6] : memref<64x32xf32, #tpu.memory_space<vmem>>, vector<64x32xf32>
    %c0_7 = arith.constant 0 : index
    %c0_8 = arith.constant 0 : index
    %4 = vector.load %arg5[%c0_7, %c0_8] : memref<1x64xf32, #tpu.memory_space<vmem>>, vector<1x64xf32>
    %c0_9 = arith.constant 0 : index
    %c0_10 = arith.constant 0 : index
    %5 = vector.load %arg6[%c0_9, %c0_10] : memref<1x64xf32, #tpu.memory_space<vmem>>, vector<1x64xf32>
    %c0_11 = arith.constant 0 : index
    %c0_12 = arith.constant 0 : index
    %6 = vector.load %arg7[%c0_11, %c0_12] : memref<1x64xf32, #tpu.memory_space<vmem>>, vector<1x64xf32>
    %c0_13 = arith.constant 0 : index
    %c0_14 = arith.constant 0 : index
    %7 = vector.load %arg9[%c0_13, %c0_14] : memref<1x32xf32, #tpu.memory_space<vmem>>, vector<1x32xf32>
    %c0_15 = arith.constant 0 : index
    %c0_16 = arith.constant 0 : index
    %c0_17 = arith.constant 0 : index
    %8 = vector.load %arg1[%c0_15, %c0_16, %c0_17] : memref<1x16x32xf32, #tpu.memory_space<vmem>>, vector<1x16x32xf32>
    %9 = vector.shape_cast %8 : vector<1x16x32xf32> to vector<16x32xf32>
    %cst = arith.constant dense<0.000000e+00> : vector<16x64xf32>
    %10 = tpu.matmul %9, %0, %cst {dimension_numbers = #tpu.dot_dimension_numbers<[1], [0], [0], [1], [0, 0, 1, 1], [], []>} : vector<16x32xf32>, vector<32x64xf32>, vector<16x64xf32> -> vector<16x64xf32>
    %11 = vector.broadcast %4 : vector<1x64xf32> to vector<16x64xf32>
    %12 = arith.addf %10, %11 : vector<16x64xf32>
    %cst_18 = arith.constant dense<0.000000e+00> : vector<16x64xf32>
    %13 = tpu.matmul %9, %1, %cst_18 {dimension_numbers = #tpu.dot_dimension_numbers<[1], [0], [0], [1], [0, 0, 1, 1], [], []>} : vector<16x32xf32>, vector<32x64xf32>, vector<16x64xf32> -> vector<16x64xf32>
    %14 = vector.broadcast %5 : vector<1x64xf32> to vector<16x64xf32>
    %15 = arith.addf %13, %14 : vector<16x64xf32>
    %cst_19 = arith.constant dense<0.000000e+00> : vector<16x64xf32>
    %16 = tpu.matmul %9, %2, %cst_19 {dimension_numbers = #tpu.dot_dimension_numbers<[1], [0], [0], [1], [0, 0, 1, 1], [], []>} : vector<16x32xf32>, vector<32x64xf32>, vector<16x64xf32> -> vector<16x64xf32>
    %17 = vector.broadcast %6 : vector<1x64xf32> to vector<16x64xf32>
    %18 = arith.addf %16, %17 : vector<16x64xf32>
    %cst_20 = arith.constant dense<0.000000e+00> : vector<16x16xf32>
    %19 = tpu.matmul %12, %15, %cst_20 {dimension_numbers = #tpu.dot_dimension_numbers<[1], [1], [0], [0], [0, 0, 1, 0], [], []>} : vector<16x64xf32>, vector<16x64xf32>, vector<16x16xf32> -> vector<16x16xf32>
    %cst_21 = arith.constant dense<0xFF800000> : vector<16xf32>
    %20 = vector.multi_reduction <maximumf>, %19, %cst_21 [1] : vector<16x16xf32> to vector<16xf32>
    %21 = vector.shape_cast %20 : vector<16xf32> to vector<16x1xf32>
    %22 = vector.broadcast %21 : vector<16x1xf32> to vector<16x16xf32>
    %23 = arith.subf %19, %22 : vector<16x16xf32>
    %24 = math.exp %23 : vector<16x16xf32>
    %cst_22 = arith.constant dense<0.000000e+00> : vector<16xf32>
    %25 = vector.multi_reduction <add>, %24, %cst_22 [1] : vector<16x16xf32> to vector<16xf32>
    %26 = vector.shape_cast %25 : vector<16xf32> to vector<16x1xf32>
    %27 = tpu.reciprocal %26 {approx = true} : vector<16x1xf32> -> vector<16x1xf32>
    %28 = vector.broadcast %27 : vector<16x1xf32> to vector<16x16xf32>
    %29 = arith.mulf %24, %28 : vector<16x16xf32>
    %cst_23 = arith.constant dense<0.000000e+00> : vector<16x64xf32>
    %30 = tpu.matmul %29, %18, %cst_23 {dimension_numbers = #tpu.dot_dimension_numbers<[1], [0], [0], [1], [0, 0, 1, 1], [], []>} : vector<16x16xf32>, vector<16x64xf32>, vector<16x64xf32> -> vector<16x64xf32>
    %cst_24 = arith.constant dense<0.000000e+00> : vector<16x32xf32>
    %31 = tpu.matmul %30, %3, %cst_24 {dimension_numbers = #tpu.dot_dimension_numbers<[1], [0], [0], [1], [0, 0, 1, 1], [], []>} : vector<16x64xf32>, vector<64x32xf32>, vector<16x32xf32> -> vector<16x32xf32>
    %32 = vector.broadcast %7 : vector<1x32xf32> to vector<16x32xf32>
    %33 = arith.addf %31, %32 : vector<16x32xf32>
    %cst_25 = arith.constant 0.000000e+00 : f32
    %34 = vector.broadcast %cst_25 : f32 to vector<16x32xf32>
    %35 = arith.maximumf %33, %34 : vector<16x32xf32>
    %c0_26 = arith.constant 0 : index
    %c0_27 = arith.constant 0 : index
    %c0_28 = arith.constant 0 : index
    %36 = vector.load %arg10[%c0_26, %c0_27, %c0_28] : memref<1x16x32xf32, #tpu.memory_space<vmem>>, vector<1x16x32xf32>
    %37 = vector.shape_cast %36 : vector<1x16x32xf32> to vector<16x32xf32>
    %38 = vector.shape_cast %35 : vector<16x32xf32> to vector<1x16x32xf32>
    tpu.vector_store %arg10[%c0_26, %c0_27, %c0_28], %38 {strides = array<i32>} : memref<1x16x32xf32, #tpu.memory_space<vmem>>, vector<1x16x32xf32>,
    return
  }
  func.func @transform_0(%arg0: i32) -> (i32, i32, i32) {
    %c0_i32 = arith.constant 0 : i32
    %c0_i32_0 = arith.constant 0 : i32
    %c0_i32_1 = arith.constant 0 : i32
    return %arg0, %c0_i32, %c0_i32_0 : i32, i32, i32
  }
  func.func @transform_1(%arg0: i32) -> (i32, i32) {
    %c0_i32 = arith.constant 0 : i32
    %c0_i32_0 = arith.constant 0 : i32
    %c0_i32_1 = arith.constant 0 : i32
    return %c0_i32, %c0_i32_0 : i32, i32
  }
  func.func @transform_2(%arg0: i32) -> (i32, i32) {
    %c0_i32 = arith.constant 0 : i32
    %c0_i32_0 = arith.constant 0 : i32
    %c0_i32_1 = arith.constant 0 : i32
    return %c0_i32, %c0_i32_0 : i32, i32
  }
  func.func @transform_3(%arg0: i32) -> (i32, i32) {
    %c0_i32 = arith.constant 0 : i32
    %c0_i32_0 = arith.constant 0 : i32
    %c0_i32_1 = arith.constant 0 : i32
    return %c0_i32, %c0_i32_0 : i32, i32
  }
  func.func @transform_4(%arg0: i32) -> (i32, i32) {
    %c0_i32 = arith.constant 0 : i32
    %c0_i32_0 = arith.constant 0 : i32
    %c0_i32_1 = arith.constant 0 : i32
    return %c0_i32, %c0_i32_0 : i32, i32
  }
  func.func @transform_5(%arg0: i32) -> (i32, i32) {
    %c0_i32 = arith.constant 0 : i32
    %c0_i32_0 = arith.constant 0 : i32
    %c0_i32_1 = arith.constant 0 : i32
    return %c0_i32, %c0_i32_0 : i32, i32
  }
  func.func @transform_6(%arg0: i32) -> (i32, i32) {
    %c0_i32 = arith.constant 0 : i32
    %c0_i32_0 = arith.constant 0 : i32
    %c0_i32_1 = arith.constant 0 : i32
    return %c0_i32, %c0_i32_0 : i32, i32
  }
  func.func @transform_7(%arg0: i32) -> (i32, i32) {
    %c0_i32 = arith.constant 0 : i32
    %c0_i32_0 = arith.constant 0 : i32
    %c0_i32_1 = arith.constant 0 : i32
    return %c0_i32, %c0_i32_0 : i32, i32
  }
  func.func @transform_8(%arg0: i32) -> (i32, i32) {
    %c0_i32 = arith.constant 0 : i32
    %c0_i32_0 = arith.constant 0 : i32
    %c0_i32_1 = arith.constant 0 : i32
    return %c0_i32, %c0_i32_0 : i32, i32
  }
  func.func @transform_9(%arg0: i32) -> (i32, i32, i32) {
    %c0_i32 = arith.constant 0 : i32
    %c0_i32_0 = arith.constant 0 : i32
    %c0_i32_1 = arith.constant 0 : i32
    return %arg0, %c0_i32, %c0_i32_0 : i32, i32, i32
  }
}

module attributes {stable_mosaic.version = 11 : i64} {
  func.func @_sqdist_kernel(%arg0: i32, %arg1: i32, %arg2: i32, %arg3: memref<1x8x3xf32, #tpu.memory_space<vmem>>, %arg4: memref<1x16x3xf32, #tpu.memory_space<vmem>>, %arg5: memref<1x8x16xf32, #tpu.memory_space<vmem>>) attributes {dimension_semantics = [#tpu.dimension_semantics<parallel>, #tpu.dimension_semantics<parallel>, #tpu.dimension_semantics<parallel>], iteration_bounds = array<i64: 2, 1, 1>, scalar_prefetch = 0 : i64, scratch_operands = 0 : i64, tpu.core_type = #tpu.core_type<tc>, window_params = [{transform_indices = @transform_0, window_bounds = array<i64: 1, 8, 3>}, {transform_indices = @transform_1, window_bounds = array<i64: 1, 16, 3>}, {transform_indices = @transform_2, window_bounds = array<i64: 1, 8, 16>}]} {
    %c0 = arith.constant 0 : index
    %c0_0 = arith.constant 0 : index
    %c0_1 = arith.constant 0 : index
    %0 = vector.load %arg3[%c0, %c0_0, %c0_1] : memref<1x8x3xf32, #tpu.memory_space<vmem>>, vector<1x8x3xf32>
    %1 = vector.shape_cast %0 : vector<1x8x3xf32> to vector<8x3xf32>
    %c0_2 = arith.constant 0 : index
    %c0_3 = arith.constant 0 : index
    %c0_4 = arith.constant 0 : index
    %2 = vector.load %arg4[%c0_2, %c0_3, %c0_4] : memref<1x16x3xf32, #tpu.memory_space<vmem>>, vector<1x16x3xf32>
    %3 = vector.shape_cast %2 : vector<1x16x3xf32> to vector<16x3xf32>
    %cst = arith.constant dense<0.000000e+00> : vector<8x16xf32>
    %4 = tpu.matmul %1, %3, %cst {dimension_numbers = #tpu.dot_dimension_numbers<[1], [1], [0], [0], [0, 0, 1, 0], [], []>} : vector<8x3xf32>, vector<16x3xf32>, vector<8x16xf32> -> vector<8x16xf32>
    %5 = arith.mulf %1, %1 : vector<8x3xf32>
    %cst_5 = arith.constant dense<0.000000e+00> : vector<8xf32>
    %6 = vector.multi_reduction <add>, %5, %cst_5 [1] : vector<8x3xf32> to vector<8xf32>
    %7 = vector.shape_cast %6 : vector<8xf32> to vector<8x1xf32>
    %cst_6 = arith.constant 1.000000e+00 : f32
    %8 = vector.broadcast %cst_6 : f32 to vector<1x3xf32>
    %9 = arith.mulf %3, %3 : vector<16x3xf32>
    %cst_7 = arith.constant dense<0.000000e+00> : vector<1x16xf32>
    %10 = tpu.matmul %8, %9, %cst_7 {dimension_numbers = #tpu.dot_dimension_numbers<[1], [1], [0], [0], [0, 0, 1, 0], [], []>} : vector<1x3xf32>, vector<16x3xf32>, vector<1x16xf32> -> vector<1x16xf32>
    %11 = vector.broadcast %7 : vector<8x1xf32> to vector<8x16xf32>
    %12 = vector.broadcast %10 : vector<1x16xf32> to vector<8x16xf32>
    %13 = arith.addf %11, %12 : vector<8x16xf32>
    %cst_8 = arith.constant 2.000000e+00 : f32
    %14 = vector.broadcast %cst_8 : f32 to vector<8x16xf32>
    %15 = arith.mulf %14, %4 : vector<8x16xf32>
    %16 = arith.subf %13, %15 : vector<8x16xf32>
    %c0_9 = arith.constant 0 : index
    %c0_10 = arith.constant 0 : index
    %c0_11 = arith.constant 0 : index
    %17 = vector.load %arg5[%c0_9, %c0_10, %c0_11] : memref<1x8x16xf32, #tpu.memory_space<vmem>>, vector<1x8x16xf32>
    %18 = vector.shape_cast %17 : vector<1x8x16xf32> to vector<8x16xf32>
    %19 = vector.shape_cast %16 : vector<8x16xf32> to vector<1x8x16xf32>
    tpu.vector_store %arg5[%c0_9, %c0_10, %c0_11], %19 {strides = array<i32>} : memref<1x8x16xf32, #tpu.memory_space<vmem>>, vector<1x8x16xf32>,
    return
  }
  func.func @transform_0(%arg0: i32, %arg1: i32, %arg2: i32) -> (i32, i32, i32) {
    %c0_i32 = arith.constant 0 : i32
    %c0_i32_0 = arith.constant 0 : i32
    return %arg0, %arg1, %c0_i32 : i32, i32, i32
  }
  func.func @transform_1(%arg0: i32, %arg1: i32, %arg2: i32) -> (i32, i32, i32) {
    %c0_i32 = arith.constant 0 : i32
    %c0_i32_0 = arith.constant 0 : i32
    return %arg0, %arg2, %c0_i32 : i32, i32, i32
  }
  func.func @transform_2(%arg0: i32, %arg1: i32, %arg2: i32) -> (i32, i32, i32) {
    %c0_i32 = arith.constant 0 : i32
    return %arg0, %arg1, %arg2 : i32, i32, i32
  }
}

module attributes {stable_mosaic.version = 11 : i64} {
  func.func @_transformer_kernel(%arg0: i32, %arg1: memref<4x4x35xf32, #tpu.memory_space<vmem>>, %arg2: memref<35x512xf32, #tpu.memory_space<vmem>>, %arg3: memref<35x512xf32, #tpu.memory_space<vmem>>, %arg4: memref<35x512xf32, #tpu.memory_space<vmem>>, %arg5: memref<1x512xf32, #tpu.memory_space<vmem>>, %arg6: memref<1x512xf32, #tpu.memory_space<vmem>>, %arg7: memref<1x512xf32, #tpu.memory_space<vmem>>, %arg8: memref<512x35xf32, #tpu.memory_space<vmem>>, %arg9: memref<1x35xf32, #tpu.memory_space<vmem>>, %arg10: memref<4x4x35xf32, #tpu.memory_space<vmem>>) attributes {dimension_semantics = [#tpu.dimension_semantics<parallel>], iteration_bounds = array<i64: 2>, scalar_prefetch = 0 : i64, scratch_operands = 0 : i64, tpu.core_type = #tpu.core_type<tc>, window_params = [{transform_indices = @transform_0, window_bounds = array<i64: 4, 4, 35>}, {pipeline_mode = #tpu.pipeline_mode<synchronous>, transform_indices = @transform_1, window_bounds = array<i64: 35, 512>}, {pipeline_mode = #tpu.pipeline_mode<synchronous>, transform_indices = @transform_2, window_bounds = array<i64: 35, 512>}, {pipeline_mode = #tpu.pipeline_mode<synchronous>, transform_indices = @transform_3, window_bounds = array<i64: 35, 512>}, {pipeline_mode = #tpu.pipeline_mode<synchronous>, transform_indices = @transform_4, window_bounds = array<i64: 1, 512>}, {pipeline_mode = #tpu.pipeline_mode<synchronous>, transform_indices = @transform_5, window_bounds = array<i64: 1, 512>}, {pipeline_mode = #tpu.pipeline_mode<synchronous>, transform_indices = @transform_6, window_bounds = array<i64: 1, 512>}, {pipeline_mode = #tpu.pipeline_mode<synchronous>, transform_indices = @transform_7, window_bounds = array<i64: 512, 35>}, {pipeline_mode = #tpu.pipeline_mode<synchronous>, transform_indices = @transform_8, window_bounds = array<i64: 1, 35>}, {transform_indices = @transform_9, window_bounds = array<i64: 4, 4, 35>}]} {
    %c0 = arith.constant 0 : index
    %c0_0 = arith.constant 0 : index
    %0 = vector.load %arg2[%c0, %c0_0] : memref<35x512xf32, #tpu.memory_space<vmem>>, vector<35x512xf32>
    %c0_1 = arith.constant 0 : index
    %c0_2 = arith.constant 0 : index
    %1 = vector.load %arg3[%c0_1, %c0_2] : memref<35x512xf32, #tpu.memory_space<vmem>>, vector<35x512xf32>
    %c0_3 = arith.constant 0 : index
    %c0_4 = arith.constant 0 : index
    %2 = vector.load %arg4[%c0_3, %c0_4] : memref<35x512xf32, #tpu.memory_space<vmem>>, vector<35x512xf32>
    %c0_5 = arith.constant 0 : index
    %c0_6 = arith.constant 0 : index
    %3 = vector.load %arg8[%c0_5, %c0_6] : memref<512x35xf32, #tpu.memory_space<vmem>>, vector<512x35xf32>
    %c0_7 = arith.constant 0 : index
    %c0_8 = arith.constant 0 : index
    %4 = vector.load %arg5[%c0_7, %c0_8] : memref<1x512xf32, #tpu.memory_space<vmem>>, vector<1x512xf32>
    %c0_9 = arith.constant 0 : index
    %c0_10 = arith.constant 0 : index
    %5 = vector.load %arg6[%c0_9, %c0_10] : memref<1x512xf32, #tpu.memory_space<vmem>>, vector<1x512xf32>
    %c0_11 = arith.constant 0 : index
    %c0_12 = arith.constant 0 : index
    %6 = vector.load %arg7[%c0_11, %c0_12] : memref<1x512xf32, #tpu.memory_space<vmem>>, vector<1x512xf32>
    %c0_13 = arith.constant 0 : index
    %c0_14 = arith.constant 0 : index
    %7 = vector.load %arg9[%c0_13, %c0_14] : memref<1x35xf32, #tpu.memory_space<vmem>>, vector<1x35xf32>
    %c0_15 = arith.constant 0 : index
    %c0_16 = arith.constant 0 : index
    %c0_17 = arith.constant 0 : index
    %8 = vector.load %arg1[%c0_15, %c0_16, %c0_17] : memref<4x4x35xf32, #tpu.memory_space<vmem>>, vector<1x4x35xf32>
    %9 = vector.shape_cast %8 : vector<1x4x35xf32> to vector<4x35xf32>
    %cst = arith.constant dense<0.000000e+00> : vector<4x512xf32>
    %10 = tpu.matmul %9, %0, %cst {dimension_numbers = #tpu.dot_dimension_numbers<[1], [0], [0], [1], [0, 0, 1, 1], [], []>} : vector<4x35xf32>, vector<35x512xf32>, vector<4x512xf32> -> vector<4x512xf32>
    %11 = vector.broadcast %4 : vector<1x512xf32> to vector<4x512xf32>
    %12 = arith.addf %10, %11 : vector<4x512xf32>
    %cst_18 = arith.constant dense<0.000000e+00> : vector<4x512xf32>
    %13 = tpu.matmul %9, %1, %cst_18 {dimension_numbers = #tpu.dot_dimension_numbers<[1], [0], [0], [1], [0, 0, 1, 1], [], []>} : vector<4x35xf32>, vector<35x512xf32>, vector<4x512xf32> -> vector<4x512xf32>
    %14 = vector.broadcast %5 : vector<1x512xf32> to vector<4x512xf32>
    %15 = arith.addf %13, %14 : vector<4x512xf32>
    %cst_19 = arith.constant dense<0.000000e+00> : vector<4x512xf32>
    %16 = tpu.matmul %9, %2, %cst_19 {dimension_numbers = #tpu.dot_dimension_numbers<[1], [0], [0], [1], [0, 0, 1, 1], [], []>} : vector<4x35xf32>, vector<35x512xf32>, vector<4x512xf32> -> vector<4x512xf32>
    %17 = vector.broadcast %6 : vector<1x512xf32> to vector<4x512xf32>
    %18 = arith.addf %16, %17 : vector<4x512xf32>
    %cst_20 = arith.constant dense<0.000000e+00> : vector<4x4xf32>
    %19 = tpu.matmul %12, %15, %cst_20 {dimension_numbers = #tpu.dot_dimension_numbers<[1], [1], [0], [0], [0, 0, 1, 0], [], []>} : vector<4x512xf32>, vector<4x512xf32>, vector<4x4xf32> -> vector<4x4xf32>
    %cst_21 = arith.constant dense<0xFF800000> : vector<4xf32>
    %20 = vector.multi_reduction <maximumf>, %19, %cst_21 [1] : vector<4x4xf32> to vector<4xf32>
    %21 = vector.shape_cast %20 : vector<4xf32> to vector<4x1xf32>
    %22 = vector.broadcast %21 : vector<4x1xf32> to vector<4x4xf32>
    %23 = arith.subf %19, %22 : vector<4x4xf32>
    %24 = math.exp %23 : vector<4x4xf32>
    %cst_22 = arith.constant dense<0.000000e+00> : vector<4xf32>
    %25 = vector.multi_reduction <add>, %24, %cst_22 [1] : vector<4x4xf32> to vector<4xf32>
    %26 = vector.shape_cast %25 : vector<4xf32> to vector<4x1xf32>
    %27 = tpu.reciprocal %26 {approx = true} : vector<4x1xf32> -> vector<4x1xf32>
    %28 = vector.broadcast %27 : vector<4x1xf32> to vector<4x4xf32>
    %29 = arith.mulf %24, %28 : vector<4x4xf32>
    %cst_23 = arith.constant dense<0.000000e+00> : vector<4x512xf32>
    %30 = tpu.matmul %29, %18, %cst_23 {dimension_numbers = #tpu.dot_dimension_numbers<[1], [0], [0], [1], [0, 0, 1, 1], [], []>} : vector<4x4xf32>, vector<4x512xf32>, vector<4x512xf32> -> vector<4x512xf32>
    %cst_24 = arith.constant dense<0.000000e+00> : vector<4x35xf32>
    %31 = tpu.matmul %30, %3, %cst_24 {dimension_numbers = #tpu.dot_dimension_numbers<[1], [0], [0], [1], [0, 0, 1, 1], [], []>} : vector<4x512xf32>, vector<512x35xf32>, vector<4x35xf32> -> vector<4x35xf32>
    %32 = vector.broadcast %7 : vector<1x35xf32> to vector<4x35xf32>
    %33 = arith.addf %31, %32 : vector<4x35xf32>
    %cst_25 = arith.constant 0.000000e+00 : f32
    %34 = vector.broadcast %cst_25 : f32 to vector<4x35xf32>
    %35 = arith.maximumf %33, %34 : vector<4x35xf32>
    %c0_26 = arith.constant 0 : index
    %c0_27 = arith.constant 0 : index
    %c0_28 = arith.constant 0 : index
    %36 = vector.load %arg10[%c0_26, %c0_27, %c0_28] : memref<4x4x35xf32, #tpu.memory_space<vmem>>, vector<1x4x35xf32>
    %37 = vector.shape_cast %36 : vector<1x4x35xf32> to vector<4x35xf32>
    %38 = vector.shape_cast %35 : vector<4x35xf32> to vector<1x4x35xf32>
    tpu.vector_store %arg10[%c0_26, %c0_27, %c0_28], %38 {strides = array<i32>} : memref<4x4x35xf32, #tpu.memory_space<vmem>>, vector<1x4x35xf32>,
    %c1 = arith.constant 1 : index
    %c0_29 = arith.constant 0 : index
    %c0_30 = arith.constant 0 : index
    %39 = vector.load %arg1[%c1, %c0_29, %c0_30] : memref<4x4x35xf32, #tpu.memory_space<vmem>>, vector<1x4x35xf32>
    %40 = vector.shape_cast %39 : vector<1x4x35xf32> to vector<4x35xf32>
    %cst_31 = arith.constant dense<0.000000e+00> : vector<4x512xf32>
    %41 = tpu.matmul %40, %0, %cst_31 {dimension_numbers = #tpu.dot_dimension_numbers<[1], [0], [0], [1], [0, 0, 1, 1], [], []>} : vector<4x35xf32>, vector<35x512xf32>, vector<4x512xf32> -> vector<4x512xf32>
    %42 = vector.broadcast %4 : vector<1x512xf32> to vector<4x512xf32>
    %43 = arith.addf %41, %42 : vector<4x512xf32>
    %cst_32 = arith.constant dense<0.000000e+00> : vector<4x512xf32>
    %44 = tpu.matmul %40, %1, %cst_32 {dimension_numbers = #tpu.dot_dimension_numbers<[1], [0], [0], [1], [0, 0, 1, 1], [], []>} : vector<4x35xf32>, vector<35x512xf32>, vector<4x512xf32> -> vector<4x512xf32>
    %45 = vector.broadcast %5 : vector<1x512xf32> to vector<4x512xf32>
    %46 = arith.addf %44, %45 : vector<4x512xf32>
    %cst_33 = arith.constant dense<0.000000e+00> : vector<4x512xf32>
    %47 = tpu.matmul %40, %2, %cst_33 {dimension_numbers = #tpu.dot_dimension_numbers<[1], [0], [0], [1], [0, 0, 1, 1], [], []>} : vector<4x35xf32>, vector<35x512xf32>, vector<4x512xf32> -> vector<4x512xf32>
    %48 = vector.broadcast %6 : vector<1x512xf32> to vector<4x512xf32>
    %49 = arith.addf %47, %48 : vector<4x512xf32>
    %cst_34 = arith.constant dense<0.000000e+00> : vector<4x4xf32>
    %50 = tpu.matmul %43, %46, %cst_34 {dimension_numbers = #tpu.dot_dimension_numbers<[1], [1], [0], [0], [0, 0, 1, 0], [], []>} : vector<4x512xf32>, vector<4x512xf32>, vector<4x4xf32> -> vector<4x4xf32>
    %cst_35 = arith.constant dense<0xFF800000> : vector<4xf32>
    %51 = vector.multi_reduction <maximumf>, %50, %cst_35 [1] : vector<4x4xf32> to vector<4xf32>
    %52 = vector.shape_cast %51 : vector<4xf32> to vector<4x1xf32>
    %53 = vector.broadcast %52 : vector<4x1xf32> to vector<4x4xf32>
    %54 = arith.subf %50, %53 : vector<4x4xf32>
    %55 = math.exp %54 : vector<4x4xf32>
    %cst_36 = arith.constant dense<0.000000e+00> : vector<4xf32>
    %56 = vector.multi_reduction <add>, %55, %cst_36 [1] : vector<4x4xf32> to vector<4xf32>
    %57 = vector.shape_cast %56 : vector<4xf32> to vector<4x1xf32>
    %58 = tpu.reciprocal %57 {approx = true} : vector<4x1xf32> -> vector<4x1xf32>
    %59 = vector.broadcast %58 : vector<4x1xf32> to vector<4x4xf32>
    %60 = arith.mulf %55, %59 : vector<4x4xf32>
    %cst_37 = arith.constant dense<0.000000e+00> : vector<4x512xf32>
    %61 = tpu.matmul %60, %49, %cst_37 {dimension_numbers = #tpu.dot_dimension_numbers<[1], [0], [0], [1], [0, 0, 1, 1], [], []>} : vector<4x4xf32>, vector<4x512xf32>, vector<4x512xf32> -> vector<4x512xf32>
    %cst_38 = arith.constant dense<0.000000e+00> : vector<4x35xf32>
    %62 = tpu.matmul %61, %3, %cst_38 {dimension_numbers = #tpu.dot_dimension_numbers<[1], [0], [0], [1], [0, 0, 1, 1], [], []>} : vector<4x512xf32>, vector<512x35xf32>, vector<4x35xf32> -> vector<4x35xf32>
    %63 = vector.broadcast %7 : vector<1x35xf32> to vector<4x35xf32>
    %64 = arith.addf %62, %63 : vector<4x35xf32>
    %cst_39 = arith.constant 0.000000e+00 : f32
    %65 = vector.broadcast %cst_39 : f32 to vector<4x35xf32>
    %66 = arith.maximumf %64, %65 : vector<4x35xf32>
    %c1_40 = arith.constant 1 : index
    %c0_41 = arith.constant 0 : index
    %c0_42 = arith.constant 0 : index
    %67 = vector.load %arg10[%c1_40, %c0_41, %c0_42] : memref<4x4x35xf32, #tpu.memory_space<vmem>>, vector<1x4x35xf32>
    %68 = vector.shape_cast %67 : vector<1x4x35xf32> to vector<4x35xf32>
    %69 = vector.shape_cast %66 : vector<4x35xf32> to vector<1x4x35xf32>
    tpu.vector_store %arg10[%c1_40, %c0_41, %c0_42], %69 {strides = array<i32>} : memref<4x4x35xf32, #tpu.memory_space<vmem>>, vector<1x4x35xf32>,
    %c2 = arith.constant 2 : index
    %c0_43 = arith.constant 0 : index
    %c0_44 = arith.constant 0 : index
    %70 = vector.load %arg1[%c2, %c0_43, %c0_44] : memref<4x4x35xf32, #tpu.memory_space<vmem>>, vector<1x4x35xf32>
    %71 = vector.shape_cast %70 : vector<1x4x35xf32> to vector<4x35xf32>
    %cst_45 = arith.constant dense<0.000000e+00> : vector<4x512xf32>
    %72 = tpu.matmul %71, %0, %cst_45 {dimension_numbers = #tpu.dot_dimension_numbers<[1], [0], [0], [1], [0, 0, 1, 1], [], []>} : vector<4x35xf32>, vector<35x512xf32>, vector<4x512xf32> -> vector<4x512xf32>
    %73 = vector.broadcast %4 : vector<1x512xf32> to vector<4x512xf32>
    %74 = arith.addf %72, %73 : vector<4x512xf32>
    %cst_46 = arith.constant dense<0.000000e+00> : vector<4x512xf32>
    %75 = tpu.matmul %71, %1, %cst_46 {dimension_numbers = #tpu.dot_dimension_numbers<[1], [0], [0], [1], [0, 0, 1, 1], [], []>} : vector<4x35xf32>, vector<35x512xf32>, vector<4x512xf32> -> vector<4x512xf32>
    %76 = vector.broadcast %5 : vector<1x512xf32> to vector<4x512xf32>
    %77 = arith.addf %75, %76 : vector<4x512xf32>
    %cst_47 = arith.constant dense<0.000000e+00> : vector<4x512xf32>
    %78 = tpu.matmul %71, %2, %cst_47 {dimension_numbers = #tpu.dot_dimension_numbers<[1], [0], [0], [1], [0, 0, 1, 1], [], []>} : vector<4x35xf32>, vector<35x512xf32>, vector<4x512xf32> -> vector<4x512xf32>
    %79 = vector.broadcast %6 : vector<1x512xf32> to vector<4x512xf32>
    %80 = arith.addf %78, %79 : vector<4x512xf32>
    %cst_48 = arith.constant dense<0.000000e+00> : vector<4x4xf32>
    %81 = tpu.matmul %74, %77, %cst_48 {dimension_numbers = #tpu.dot_dimension_numbers<[1], [1], [0], [0], [0, 0, 1, 0], [], []>} : vector<4x512xf32>, vector<4x512xf32>, vector<4x4xf32> -> vector<4x4xf32>
    %cst_49 = arith.constant dense<0xFF800000> : vector<4xf32>
    %82 = vector.multi_reduction <maximumf>, %81, %cst_49 [1] : vector<4x4xf32> to vector<4xf32>
    %83 = vector.shape_cast %82 : vector<4xf32> to vector<4x1xf32>
    %84 = vector.broadcast %83 : vector<4x1xf32> to vector<4x4xf32>
    %85 = arith.subf %81, %84 : vector<4x4xf32>
    %86 = math.exp %85 : vector<4x4xf32>
    %cst_50 = arith.constant dense<0.000000e+00> : vector<4xf32>
    %87 = vector.multi_reduction <add>, %86, %cst_50 [1] : vector<4x4xf32> to vector<4xf32>
    %88 = vector.shape_cast %87 : vector<4xf32> to vector<4x1xf32>
    %89 = tpu.reciprocal %88 {approx = true} : vector<4x1xf32> -> vector<4x1xf32>
    %90 = vector.broadcast %89 : vector<4x1xf32> to vector<4x4xf32>
    %91 = arith.mulf %86, %90 : vector<4x4xf32>
    %cst_51 = arith.constant dense<0.000000e+00> : vector<4x512xf32>
    %92 = tpu.matmul %91, %80, %cst_51 {dimension_numbers = #tpu.dot_dimension_numbers<[1], [0], [0], [1], [0, 0, 1, 1], [], []>} : vector<4x4xf32>, vector<4x512xf32>, vector<4x512xf32> -> vector<4x512xf32>
    %cst_52 = arith.constant dense<0.000000e+00> : vector<4x35xf32>
    %93 = tpu.matmul %92, %3, %cst_52 {dimension_numbers = #tpu.dot_dimension_numbers<[1], [0], [0], [1], [0, 0, 1, 1], [], []>} : vector<4x512xf32>, vector<512x35xf32>, vector<4x35xf32> -> vector<4x35xf32>
    %94 = vector.broadcast %7 : vector<1x35xf32> to vector<4x35xf32>
    %95 = arith.addf %93, %94 : vector<4x35xf32>
    %cst_53 = arith.constant 0.000000e+00 : f32
    %96 = vector.broadcast %cst_53 : f32 to vector<4x35xf32>
    %97 = arith.maximumf %95, %96 : vector<4x35xf32>
    %c2_54 = arith.constant 2 : index
    %c0_55 = arith.constant 0 : index
    %c0_56 = arith.constant 0 : index
    %98 = vector.load %arg10[%c2_54, %c0_55, %c0_56] : memref<4x4x35xf32, #tpu.memory_space<vmem>>, vector<1x4x35xf32>
    %99 = vector.shape_cast %98 : vector<1x4x35xf32> to vector<4x35xf32>
    %100 = vector.shape_cast %97 : vector<4x35xf32> to vector<1x4x35xf32>
    tpu.vector_store %arg10[%c2_54, %c0_55, %c0_56], %100 {strides = array<i32>} : memref<4x4x35xf32, #tpu.memory_space<vmem>>, vector<1x4x35xf32>,
    %c3 = arith.constant 3 : index
    %c0_57 = arith.constant 0 : index
    %c0_58 = arith.constant 0 : index
    %101 = vector.load %arg1[%c3, %c0_57, %c0_58] : memref<4x4x35xf32, #tpu.memory_space<vmem>>, vector<1x4x35xf32>
    %102 = vector.shape_cast %101 : vector<1x4x35xf32> to vector<4x35xf32>
    %cst_59 = arith.constant dense<0.000000e+00> : vector<4x512xf32>
    %103 = tpu.matmul %102, %0, %cst_59 {dimension_numbers = #tpu.dot_dimension_numbers<[1], [0], [0], [1], [0, 0, 1, 1], [], []>} : vector<4x35xf32>, vector<35x512xf32>, vector<4x512xf32> -> vector<4x512xf32>
    %104 = vector.broadcast %4 : vector<1x512xf32> to vector<4x512xf32>
    %105 = arith.addf %103, %104 : vector<4x512xf32>
    %cst_60 = arith.constant dense<0.000000e+00> : vector<4x512xf32>
    %106 = tpu.matmul %102, %1, %cst_60 {dimension_numbers = #tpu.dot_dimension_numbers<[1], [0], [0], [1], [0, 0, 1, 1], [], []>} : vector<4x35xf32>, vector<35x512xf32>, vector<4x512xf32> -> vector<4x512xf32>
    %107 = vector.broadcast %5 : vector<1x512xf32> to vector<4x512xf32>
    %108 = arith.addf %106, %107 : vector<4x512xf32>
    %cst_61 = arith.constant dense<0.000000e+00> : vector<4x512xf32>
    %109 = tpu.matmul %102, %2, %cst_61 {dimension_numbers = #tpu.dot_dimension_numbers<[1], [0], [0], [1], [0, 0, 1, 1], [], []>} : vector<4x35xf32>, vector<35x512xf32>, vector<4x512xf32> -> vector<4x512xf32>
    %110 = vector.broadcast %6 : vector<1x512xf32> to vector<4x512xf32>
    %111 = arith.addf %109, %110 : vector<4x512xf32>
    %cst_62 = arith.constant dense<0.000000e+00> : vector<4x4xf32>
    %112 = tpu.matmul %105, %108, %cst_62 {dimension_numbers = #tpu.dot_dimension_numbers<[1], [1], [0], [0], [0, 0, 1, 0], [], []>} : vector<4x512xf32>, vector<4x512xf32>, vector<4x4xf32> -> vector<4x4xf32>
    %cst_63 = arith.constant dense<0xFF800000> : vector<4xf32>
    %113 = vector.multi_reduction <maximumf>, %112, %cst_63 [1] : vector<4x4xf32> to vector<4xf32>
    %114 = vector.shape_cast %113 : vector<4xf32> to vector<4x1xf32>
    %115 = vector.broadcast %114 : vector<4x1xf32> to vector<4x4xf32>
    %116 = arith.subf %112, %115 : vector<4x4xf32>
    %117 = math.exp %116 : vector<4x4xf32>
    %cst_64 = arith.constant dense<0.000000e+00> : vector<4xf32>
    %118 = vector.multi_reduction <add>, %117, %cst_64 [1] : vector<4x4xf32> to vector<4xf32>
    %119 = vector.shape_cast %118 : vector<4xf32> to vector<4x1xf32>
    %120 = tpu.reciprocal %119 {approx = true} : vector<4x1xf32> -> vector<4x1xf32>
    %121 = vector.broadcast %120 : vector<4x1xf32> to vector<4x4xf32>
    %122 = arith.mulf %117, %121 : vector<4x4xf32>
    %cst_65 = arith.constant dense<0.000000e+00> : vector<4x512xf32>
    %123 = tpu.matmul %122, %111, %cst_65 {dimension_numbers = #tpu.dot_dimension_numbers<[1], [0], [0], [1], [0, 0, 1, 1], [], []>} : vector<4x4xf32>, vector<4x512xf32>, vector<4x512xf32> -> vector<4x512xf32>
    %cst_66 = arith.constant dense<0.000000e+00> : vector<4x35xf32>
    %124 = tpu.matmul %123, %3, %cst_66 {dimension_numbers = #tpu.dot_dimension_numbers<[1], [0], [0], [1], [0, 0, 1, 1], [], []>} : vector<4x512xf32>, vector<512x35xf32>, vector<4x35xf32> -> vector<4x35xf32>
    %125 = vector.broadcast %7 : vector<1x35xf32> to vector<4x35xf32>
    %126 = arith.addf %124, %125 : vector<4x35xf32>
    %cst_67 = arith.constant 0.000000e+00 : f32
    %127 = vector.broadcast %cst_67 : f32 to vector<4x35xf32>
    %128 = arith.maximumf %126, %127 : vector<4x35xf32>
    %c3_68 = arith.constant 3 : index
    %c0_69 = arith.constant 0 : index
    %c0_70 = arith.constant 0 : index
    %129 = vector.load %arg10[%c3_68, %c0_69, %c0_70] : memref<4x4x35xf32, #tpu.memory_space<vmem>>, vector<1x4x35xf32>
    %130 = vector.shape_cast %129 : vector<1x4x35xf32> to vector<4x35xf32>
    %131 = vector.shape_cast %128 : vector<4x35xf32> to vector<1x4x35xf32>
    tpu.vector_store %arg10[%c3_68, %c0_69, %c0_70], %131 {strides = array<i32>} : memref<4x4x35xf32, #tpu.memory_space<vmem>>, vector<1x4x35xf32>,
    return
  }
  func.func @transform_0(%arg0: i32) -> (i32, i32, i32) {
    %c0_i32 = arith.constant 0 : i32
    %c0_i32_0 = arith.constant 0 : i32
    %c0_i32_1 = arith.constant 0 : i32
    return %arg0, %c0_i32, %c0_i32_0 : i32, i32, i32
  }
  func.func @transform_1(%arg0: i32) -> (i32, i32) {
    %c0_i32 = arith.constant 0 : i32
    %c0_i32_0 = arith.constant 0 : i32
    %c0_i32_1 = arith.constant 0 : i32
    return %c0_i32, %c0_i32_0 : i32, i32
  }
  func.func @transform_2(%arg0: i32) -> (i32, i32) {
    %c0_i32 = arith.constant 0 : i32
    %c0_i32_0 = arith.constant 0 : i32
    %c0_i32_1 = arith.constant 0 : i32
    return %c0_i32, %c0_i32_0 : i32, i32
  }
  func.func @transform_3(%arg0: i32) -> (i32, i32) {
    %c0_i32 = arith.constant 0 : i32
    %c0_i32_0 = arith.constant 0 : i32
    %c0_i32_1 = arith.constant 0 : i32
    return %c0_i32, %c0_i32_0 : i32, i32
  }
  func.func @transform_4(%arg0: i32) -> (i32, i32) {
    %c0_i32 = arith.constant 0 : i32
    %c0_i32_0 = arith.constant 0 : i32
    %c0_i32_1 = arith.constant 0 : i32
    return %c0_i32, %c0_i32_0 : i32, i32
  }
  func.func @transform_5(%arg0: i32) -> (i32, i32) {
    %c0_i32 = arith.constant 0 : i32
    %c0_i32_0 = arith.constant 0 : i32
    %c0_i32_1 = arith.constant 0 : i32
    return %c0_i32, %c0_i32_0 : i32, i32
  }
  func.func @transform_6(%arg0: i32) -> (i32, i32) {
    %c0_i32 = arith.constant 0 : i32
    %c0_i32_0 = arith.constant 0 : i32
    %c0_i32_1 = arith.constant 0 : i32
    return %c0_i32, %c0_i32_0 : i32, i32
  }
  func.func @transform_7(%arg0: i32) -> (i32, i32) {
    %c0_i32 = arith.constant 0 : i32
    %c0_i32_0 = arith.constant 0 : i32
    %c0_i32_1 = arith.constant 0 : i32
    return %c0_i32, %c0_i32_0 : i32, i32
  }
  func.func @transform_8(%arg0: i32) -> (i32, i32) {
    %c0_i32 = arith.constant 0 : i32
    %c0_i32_0 = arith.constant 0 : i32
    %c0_i32_1 = arith.constant 0 : i32
    return %c0_i32, %c0_i32_0 : i32, i32
  }
  func.func @transform_9(%arg0: i32) -> (i32, i32, i32) {
    %c0_i32 = arith.constant 0 : i32
    %c0_i32_0 = arith.constant 0 : i32
    %c0_i32_1 = arith.constant 0 : i32
    return %arg0, %c0_i32, %c0_i32_0 : i32, i32, i32
  }
}

module attributes {stable_mosaic.version = 11 : i64} {
  func.func @_linear_kernel(%arg0: i32, %arg1: memref<16x35xf32, #tpu.memory_space<vmem>>, %arg2: memref<35x64xf32, #tpu.memory_space<vmem>>, %arg3: memref<1x64xf32, #tpu.memory_space<vmem>>, %arg4: memref<16x64xf32, #tpu.memory_space<vmem>>) attributes {dimension_semantics = [#tpu.dimension_semantics<parallel>], iteration_bounds = array<i64: 2>, scalar_prefetch = 0 : i64, scratch_operands = 0 : i64, tpu.core_type = #tpu.core_type<tc>, window_params = [{transform_indices = @transform_0, window_bounds = array<i64: 16, 35>}, {pipeline_mode = #tpu.pipeline_mode<synchronous>, transform_indices = @transform_1, window_bounds = array<i64: 35, 64>}, {pipeline_mode = #tpu.pipeline_mode<synchronous>, transform_indices = @transform_2, window_bounds = array<i64: 1, 64>}, {transform_indices = @transform_3, window_bounds = array<i64: 16, 64>}]} {
    %c0 = arith.constant 0 : index
    %c0_0 = arith.constant 0 : index
    %0 = vector.load %arg1[%c0, %c0_0] : memref<16x35xf32, #tpu.memory_space<vmem>>, vector<16x35xf32>
    %c0_1 = arith.constant 0 : index
    %c0_2 = arith.constant 0 : index
    %1 = vector.load %arg2[%c0_1, %c0_2] : memref<35x64xf32, #tpu.memory_space<vmem>>, vector<35x64xf32>
    %cst = arith.constant dense<0.000000e+00> : vector<16x64xf32>
    %2 = tpu.matmul %0, %1, %cst {dimension_numbers = #tpu.dot_dimension_numbers<[1], [0], [0], [1], [0, 0, 1, 1], [], []>} : vector<16x35xf32>, vector<35x64xf32>, vector<16x64xf32> -> vector<16x64xf32>
    %c0_3 = arith.constant 0 : index
    %c0_4 = arith.constant 0 : index
    %3 = vector.load %arg3[%c0_3, %c0_4] : memref<1x64xf32, #tpu.memory_space<vmem>>, vector<1x64xf32>
    %4 = vector.broadcast %3 : vector<1x64xf32> to vector<16x64xf32>
    %5 = arith.addf %2, %4 : vector<16x64xf32>
    %c0_5 = arith.constant 0 : index
    %c0_6 = arith.constant 0 : index
    %6 = vector.load %arg4[%c0_5, %c0_6] : memref<16x64xf32, #tpu.memory_space<vmem>>, vector<16x64xf32>
    tpu.vector_store %arg4[%c0_5, %c0_6], %5 {strides = array<i32>} : memref<16x64xf32, #tpu.memory_space<vmem>>, vector<16x64xf32>,
    return
  }
  func.func @transform_0(%arg0: i32) -> (i32, i32) {
    %c0_i32 = arith.constant 0 : i32
    %c0_i32_0 = arith.constant 0 : i32
    return %arg0, %c0_i32 : i32, i32
  }
  func.func @transform_1(%arg0: i32) -> (i32, i32) {
    %c0_i32 = arith.constant 0 : i32
    %c0_i32_0 = arith.constant 0 : i32
    %c0_i32_1 = arith.constant 0 : i32
    return %c0_i32, %c0_i32_0 : i32, i32
  }
  func.func @transform_2(%arg0: i32) -> (i32, i32) {
    %c0_i32 = arith.constant 0 : i32
    %c0_i32_0 = arith.constant 0 : i32
    %c0_i32_1 = arith.constant 0 : i32
    return %c0_i32, %c0_i32_0 : i32, i32
  }
  func.func @transform_3(%arg0: i32) -> (i32, i32) {
    %c0_i32 = arith.constant 0 : i32
    %c0_i32_0 = arith.constant 0 : i32
    return %arg0, %c0_i32 : i32, i32
  }
}

module attributes {stable_mosaic.version = 11 : i64} {
  func.func @_linear_kernel(%arg0: i32, %arg1: memref<16x64xf32, #tpu.memory_space<vmem>>, %arg2: memref<64x64xf32, #tpu.memory_space<vmem>>, %arg3: memref<1x64xf32, #tpu.memory_space<vmem>>, %arg4: memref<16x64xf32, #tpu.memory_space<vmem>>) attributes {dimension_semantics = [#tpu.dimension_semantics<parallel>], iteration_bounds = array<i64: 2>, scalar_prefetch = 0 : i64, scratch_operands = 0 : i64, tpu.core_type = #tpu.core_type<tc>, window_params = [{transform_indices = @transform_0, window_bounds = array<i64: 16, 64>}, {pipeline_mode = #tpu.pipeline_mode<synchronous>, transform_indices = @transform_1, window_bounds = array<i64: 64, 64>}, {pipeline_mode = #tpu.pipeline_mode<synchronous>, transform_indices = @transform_2, window_bounds = array<i64: 1, 64>}, {transform_indices = @transform_3, window_bounds = array<i64: 16, 64>}]} {
    %c0 = arith.constant 0 : index
    %c0_0 = arith.constant 0 : index
    %0 = vector.load %arg1[%c0, %c0_0] : memref<16x64xf32, #tpu.memory_space<vmem>>, vector<16x64xf32>
    %c0_1 = arith.constant 0 : index
    %c0_2 = arith.constant 0 : index
    %1 = vector.load %arg2[%c0_1, %c0_2] : memref<64x64xf32, #tpu.memory_space<vmem>>, vector<64x64xf32>
    %cst = arith.constant dense<0.000000e+00> : vector<16x64xf32>
    %2 = tpu.matmul %0, %1, %cst {dimension_numbers = #tpu.dot_dimension_numbers<[1], [0], [0], [1], [0, 0, 1, 1], [], []>} : vector<16x64xf32>, vector<64x64xf32>, vector<16x64xf32> -> vector<16x64xf32>
    %c0_3 = arith.constant 0 : index
    %c0_4 = arith.constant 0 : index
    %3 = vector.load %arg3[%c0_3, %c0_4] : memref<1x64xf32, #tpu.memory_space<vmem>>, vector<1x64xf32>
    %4 = vector.broadcast %3 : vector<1x64xf32> to vector<16x64xf32>
    %5 = arith.addf %2, %4 : vector<16x64xf32>
    %c0_5 = arith.constant 0 : index
    %c0_6 = arith.constant 0 : index
    %6 = vector.load %arg4[%c0_5, %c0_6] : memref<16x64xf32, #tpu.memory_space<vmem>>, vector<16x64xf32>
    tpu.vector_store %arg4[%c0_5, %c0_6], %5 {strides = array<i32>} : memref<16x64xf32, #tpu.memory_space<vmem>>, vector<16x64xf32>,
    return
  }
  func.func @transform_0(%arg0: i32) -> (i32, i32) {
    %c0_i32 = arith.constant 0 : i32
    %c0_i32_0 = arith.constant 0 : i32
    return %arg0, %c0_i32 : i32, i32
  }
  func.func @transform_1(%arg0: i32) -> (i32, i32) {
    %c0_i32 = arith.constant 0 : i32
    %c0_i32_0 = arith.constant 0 : i32
    %c0_i32_1 = arith.constant 0 : i32
    return %c0_i32, %c0_i32_0 : i32, i32
  }
  func.func @transform_2(%arg0: i32) -> (i32, i32) {
    %c0_i32 = arith.constant 0 : i32
    %c0_i32_0 = arith.constant 0 : i32
    %c0_i32_1 = arith.constant 0 : i32
    return %c0_i32, %c0_i32_0 : i32, i32
  }
  func.func @transform_3(%arg0: i32) -> (i32, i32) {
    %c0_i32 = arith.constant 0 : i32
    %c0_i32_0 = arith.constant 0 : i32
    return %arg0, %c0_i32 : i32, i32
  }
}

module attributes {stable_mosaic.version = 11 : i64} {
  func.func @_cls_head_kernel(%arg0: memref<2x64xf32, #tpu.memory_space<vmem>>, %arg1: memref<64x256xf32, #tpu.memory_space<vmem>>, %arg2: memref<1x256xf32, #tpu.memory_space<vmem>>, %arg3: memref<256x64xf32, #tpu.memory_space<vmem>>, %arg4: memref<1x64xf32, #tpu.memory_space<vmem>>, %arg5: memref<64x4xf32, #tpu.memory_space<vmem>>, %arg6: memref<1x4xf32, #tpu.memory_space<vmem>>, %arg7: memref<2x4xf32, #tpu.memory_space<vmem>>) attributes {dimension_semantics = [], scalar_prefetch = 0 : i64, scratch_operands = 0 : i64, tpu.core_type = #tpu.core_type<tc>} {
    %c0 = arith.constant 0 : index
    %c0_0 = arith.constant 0 : index
    %0 = vector.load %arg0[%c0, %c0_0] : memref<2x64xf32, #tpu.memory_space<vmem>>, vector<2x64xf32>
    %c0_1 = arith.constant 0 : index
    %c0_2 = arith.constant 0 : index
    %1 = vector.load %arg1[%c0_1, %c0_2] : memref<64x256xf32, #tpu.memory_space<vmem>>, vector<64x256xf32>
    %cst = arith.constant dense<0.000000e+00> : vector<2x256xf32>
    %2 = tpu.matmul %0, %1, %cst {dimension_numbers = #tpu.dot_dimension_numbers<[1], [0], [0], [1], [0, 0, 1, 1], [], []>} : vector<2x64xf32>, vector<64x256xf32>, vector<2x256xf32> -> vector<2x256xf32>
    %c0_3 = arith.constant 0 : index
    %c0_4 = arith.constant 0 : index
    %3 = vector.load %arg2[%c0_3, %c0_4] : memref<1x256xf32, #tpu.memory_space<vmem>>, vector<1x256xf32>
    %4 = vector.broadcast %3 : vector<1x256xf32> to vector<2x256xf32>
    %5 = arith.addf %2, %4 : vector<2x256xf32>
    %cst_5 = arith.constant 0.000000e+00 : f32
    %6 = vector.broadcast %cst_5 : f32 to vector<2x256xf32>
    %7 = arith.maximumf %5, %6 : vector<2x256xf32>
    %c0_6 = arith.constant 0 : index
    %c0_7 = arith.constant 0 : index
    %8 = vector.load %arg3[%c0_6, %c0_7] : memref<256x64xf32, #tpu.memory_space<vmem>>, vector<256x64xf32>
    %cst_8 = arith.constant dense<0.000000e+00> : vector<2x64xf32>
    %9 = tpu.matmul %7, %8, %cst_8 {dimension_numbers = #tpu.dot_dimension_numbers<[1], [0], [0], [1], [0, 0, 1, 1], [], []>} : vector<2x256xf32>, vector<256x64xf32>, vector<2x64xf32> -> vector<2x64xf32>
    %c0_9 = arith.constant 0 : index
    %c0_10 = arith.constant 0 : index
    %10 = vector.load %arg4[%c0_9, %c0_10] : memref<1x64xf32, #tpu.memory_space<vmem>>, vector<1x64xf32>
    %11 = vector.broadcast %10 : vector<1x64xf32> to vector<2x64xf32>
    %12 = arith.addf %9, %11 : vector<2x64xf32>
    %cst_11 = arith.constant 0.000000e+00 : f32
    %13 = vector.broadcast %cst_11 : f32 to vector<2x64xf32>
    %14 = arith.maximumf %12, %13 : vector<2x64xf32>
    %c0_12 = arith.constant 0 : index
    %c0_13 = arith.constant 0 : index
    %15 = vector.load %arg5[%c0_12, %c0_13] : memref<64x4xf32, #tpu.memory_space<vmem>>, vector<64x4xf32>
    %cst_14 = arith.constant dense<0.000000e+00> : vector<2x4xf32>
    %16 = tpu.matmul %14, %15, %cst_14 {dimension_numbers = #tpu.dot_dimension_numbers<[1], [0], [0], [1], [0, 0, 1, 1], [], []>} : vector<2x64xf32>, vector<64x4xf32>, vector<2x4xf32> -> vector<2x4xf32>
    %c0_15 = arith.constant 0 : index
    %c0_16 = arith.constant 0 : index
    %17 = vector.load %arg6[%c0_15, %c0_16] : memref<1x4xf32, #tpu.memory_space<vmem>>, vector<1x4xf32>
    %18 = vector.broadcast %17 : vector<1x4xf32> to vector<2x4xf32>
    %19 = arith.addf %16, %18 : vector<2x4xf32>
    %c0_17 = arith.constant 0 : index
    %c0_18 = arith.constant 0 : index
    %20 = vector.load %arg7[%c0_17, %c0_18] : memref<2x4xf32, #tpu.memory_space<vmem>>, vector<2x4xf32>
    tpu.vector_store %arg7[%c0_17, %c0_18], %19 {strides = array<i32>} : memref<2x4xf32, #tpu.memory_space<vmem>>, vector<2x4xf32>,
    return
  }
}

</mosaic_0001>

<bundles_post_ra>
// kernel: neg.2
= control target key start
LH: loop header
LB: loop body
LE: loop exit
PB: predicated region body
PF: predicated region fallthrough
CT: control target
= control target key end

     0   :  { %s72_s0 = inlined_call_operand.vmem [shape: f32[2,16,16], index: 0, kind: input, shape index: {}]   ;;  %s73_s1 = inlined_call_operand.vmem [shape: f32[2,16,16], index: 1, kind: output, shape index: {}]  }
   0x1   :  { %v2_v0 = vld [vmem:[%s72_s0] sm:$0xff]  ;;  %v32_v1 = vld [vmem:[%s72_s0 + $0x10] sm:$0xff]  ;;  %v34_v2 = vld [vmem:[%s72_s0 + $0x8] sm:$0xff] }
   0x2   :  { %v5_v3 = vxor.u32 2147483648, %v2_v0  ;;  %v12_v4 = vxor.u32 2147483648, %v32_v1  ;;  %v20_v5 = vxor.u32 2147483648, %v34_v2  ;;  %v36_v6 = vld [vmem:[%s72_s0 + $0x18] sm:$0xff] }
   0x3   :  { %v28_v7 = vxor.u32 2147483648, %v36_v6 }
   0x4   :  { %7 = vst [vmem:[%s73_s1] sm:$0xff] %v5_v3 }
   0x5   :  { %33 = vst [vmem:[%s73_s1 + $0x10] sm:$0xff] %v12_v4 }
   0x6   :  { %35 = vst [vmem:[%s73_s1 + $0x8] sm:$0xff] %v20_v5 }
   0x7   :  { %37 = vst [vmem:[%s73_s1 + $0x18] sm:$0xff] %v28_v7 }

// kernel: point_transformer_cls.9
= control target key start
LH: loop header
LB: loop body
LE: loop exit
PB: predicated region body
PF: predicated region fallthrough
CT: control target
= control target key end

     0   :  { %s531_s9 = smov 0   ;;  %s533_s10 = smov 0   ;;  %s583_s0 = inlined_call_operand.vmem [shape: f32[2,16,3], index: 0, kind: input, shape index: {}, may-alias: {0,1}]   ;;  %s584_s1 = inlined_call_operand.vmem [shape: f32[2,16,3], index: 1, kind: input, shape index: {}, may-alias: {0,1}]   ;;  %s585_s2 = inlined_call_operand.vmem [shape: f32[2,16,16], index: 2, kind: output, shape index: {}]  }
   0x1   :  { %s535_s11 = smov 0  }
   0x2 LB: > { %s31_s12 = sadd.s32 1, %s509_s10  ;;  %p445_p0 = scmp.ge.s32.totalorder %s513_s11, 1  ;;  %s513_s11 = sphi %s535_s11, %s12_s11   ;;  %s509_s10 = sphi %s533_s10, %s587_s10   ;;  %s505_s9 = sphi %s531_s9, %s586_s9  }
   0x3   : > { %p33_p1 = scmp.ge.s32.totalorder %s31_s12, 2  ;;  %p159_p2 = scmp.lt.s32.totalorder %s513_s11, 3 }
   0x5   : > { %s589_s12 = smov (%p33_p1, %s31_s12), 0  ;;  %p160_p3 = pnand %p445_p0, %p159_p2 }
   0x6   : > { %p202_p4 = scmp.lt.s32.totalorder (!%p160_p3), %s505_s9, 1 }
   0x7   : > { %163 = sbr.rel (%p160_p3) target bundleno = 160 (0xa0), region = 28 }
   0xc   : > { %s591_s9 = smov (!%p202_p4, %s505_s9), 1  ;;  %vm238_vm0 = vcmask 23552   ;;  %v515_v9 = vmov 1.0   ;;  %vm320_vm1 = vcmask 130048  }
   0xd   : > { %s549_s13 = sshll.u32 %s591_s9, 4 }
   0xe   : > { %s219_s16 = scalar_lea.vmem %s584_s1, %s549_s13  ;;  %s209_s19 = scalar_lea.vmem %s583_s0, %s549_s13 }
   0xf   : > { %v237_v0 = vld [vmem:[%s219_s16 + $0x8] sm:$0xff]  ;;  %v236_v1 = vld [vmem:[%s219_s16] sm:$0xff]  ;;  %s232_s22 = scalar_lea.vmem %s585_s2, %s549_s13 }
  0x10   : > { %464 = vmatpush.xpose.msk.msra.mxu2 %vm238_vm0, %v237_v0  ;;  %v283_v2 = vmul.f32 %v237_v0, %v237_v0  ;;  %452 = vmatpush.xpose.msk.msra.mxu0 %vm238_vm0, %v237_v0  ;;  %v234_v3 = vld [vmem:[%s209_s19] sm:$0xff]  ;;  %v282_v5 = vmul.f32 %v236_v1, %v236_v1  ;;  %v235_v7 = vld [vmem:[%s209_s19 + $0x8] sm:$0xff] }
  0x11   : > { %v274_v4 = vmul.f32 %v234_v3, %v234_v3  ;;  %v275_v8 = vmul.f32 %v235_v7, %v235_v7 }
  0x12   : > { %456 = vmatpush.xpose.msk.msra.mxu1 %vm238_vm0, %v283_v2 }
  0x13   : > { %v276_v6 = vsel %vm238_vm0, %v274_v4, 0.0  ;;  %v279_v10 = vsel %vm238_vm0, %v275_v8, 0.0 }
  0x14   : > { %465 = vmatpush.xpose.msk.msra.mxu2 %vm238_vm0, %v236_v1  ;;  %453 = vmatpush.xpose.msk.msra.mxu0 %vm238_vm0, %v236_v1 }
  0x15   : > { %277 = vadd.xlane.f32.xlu0 %v276_v6 }
  0x16   : > { %457 = vmatpush.xpose.msk.msra.mxu1 %vm238_vm0, %v282_v5 }
  0x17   : > { %455 = vmatmul.msk.f32.vlgmr.msra.gmra.mxu2 %vm238_vm0, %v235_v7  ;;  %454 = vmatmul.msk.f32.vlgmr.msra.gmra.mxu0 %vm238_vm0, %v234_v3 }
  0x19   : > { %458 = vmatmul.msk.f32.vlgmr.msra.gmra.mxu1 %vm238_vm0, %v515_v9 }
  0x1d   : > { %280 = vadd.xlane.f32.xlu0 %v279_v10 }
  0x88   : > { %v278_v11 = vpop.xlane.xlu0 %277 }
  0x90   : > { %v281_v14 = vpop.xlane.xlu0 %280 }
  0x94   : > { %v268_v12 = vpop.f32.mrf.mxu0 }
  0x95   : > { %v316_v16 = vmul.f32 2.0, %v268_v12 }
  0x96   : > { %v310_v13 = vpop.f32.mrf.mxu1 }
  0x97   : > { %v313_v15 = vperm.slane %v310_v13, 0 }
  0x99   : > { %v314_v17 = vadd.f32 %v313_v15, %v278_v11  ;;  %v315_v18 = vadd.f32 %v313_v15, %v281_v14 }
  0x9a   : > { %v271_v19 = vpop.f32.mrf.mxu2 }
  0x9b   : > { %v318_v20 = vsub.f32 %v314_v17, %v316_v16  ;;  %v317_v21 = vmul.f32 2.0, %v271_v19 }
  0x9d   : > { %321 = vst.msk [vmem:[%s232_s22] sm:$0xff] %vm320_vm1, %v318_v20  ;;  %v319_v22 = vsub.f32 %v315_v18, %v317_v21 }
  0x9f   : > { %322 = vst.msk [vmem:[%s232_s22 + $0x8] sm:$0xff] %vm320_vm1, %v319_v22 }
  0xa0 PF: > { %s12_s11 = sadd.s32 1, %s513_s11   ;;  %s586_s9 = smov %s509_s10 }
  0xa1   : > { %p9_p5 = scmp.ge.s32.totalorder %s12_s11, 4   ;;  %s587_s10 = smov %s589_s12 }
  0xa3   :  { %11 = sbr.rel (!%p9_p5) target bundleno = 2 (0x2), region = 61 }

// kernel: point_transformer_cls.11
= control target key start
LH: loop header
LB: loop body
LE: loop exit
PB: predicated region body
PF: predicated region fallthrough
CT: control target
= control target key end

     0   :  { %s328_s12 = smov 0   ;;  %s364_s0 = inlined_call_operand.vmem [shape: f32[32,32], index: 0, kind: input, shape index: {}]   ;;  %s365_s1 = inlined_call_operand.vmem [shape: f32[32,32], index: 1, kind: input, shape index: {}]   ;;  %s366_s2 = inlined_call_operand.vmem [shape: f32[1,32], index: 2, kind: input, shape index: {}]   ;;  %s367_s3 = inlined_call_operand.vmem [shape: f32[32,32], index: 3, kind: output, shape index: {}]  }
   0x1 LB: > { %s274_s13 = sadd.s32 4294967295, %s306_s12   ;;  %p278_p0 = scmp.ge.s32.totalorder %s306_s12, 1  ;;  %s306_s12 = sphi %s328_s12, %s13_s12  }
   0x2   : > { %p138_p1 = scmp.lt.s32.totalorder %s306_s12, 3 }
   0x4   : > { %p139_p2 = pnand %p278_p0, %p138_p1 }
   0x5   : > { %s279_s18 = sshll.u32 (!%p139_p2), %s274_s13, 1 }
   0x6   : > { %142 = sbr.rel (%p139_p2) target bundleno = 151 (0x97), region = 32  ;;  %p163_p3 = scmp.lt.s32.totalorder (!%p139_p2), %s279_s18, 3 }
   0xb   : > { %v179_v0 = vld [vmem:[%s365_s1 + $0x18] sm:$0xff]  ;;  %v178_v1 = vld [vmem:[%s365_s1 + $0x10] sm:$0xff]  ;;  %v177_v2 = vld [vmem:[%s365_s1 + $0x8] sm:$0xff]  ;;  %s369_s18 = smov (!%p163_p3, %s279_s18), 3  ;;  %vm184_vm0 = vcmask 261120  }
   0xc   : > { %203 = vmatpush.msra.mxu0 %v179_v0  ;;  %287 = vmatpush.msra.mxu1 %v179_v0  ;;  %v176_v3 = vld [vmem:[%s365_s1] sm:$0xff]  ;;  %s280_s23 = sshll.u32 %s369_s18, 3 }
   0xd   : > { %s166_s26 = scalar_lea.vmem %s364_s0, %s280_s23  ;;  %v299_v6 = vld [vmem:[%s366_s2] ss:$0 sm:$0xff]  ;;  %s172_s4 = scalar_lea.vmem %s367_s3, %s280_s23 }
   0xe   : > { %204 = vmatpush.msra.mxu0 %v178_v1  ;;  %288 = vmatpush.msra.mxu1 %v178_v1  ;;  %v174_v4 = vld [vmem:[%s166_s26] sm:$0xff]  ;;  %v175_v5 = vld [vmem:[%s166_s26 + $0x8] sm:$0xff] }
  0x10   : > { %205 = vmatpush.msra.mxu0 %v177_v2  ;;  %289 = vmatpush.msra.mxu1 %v177_v2 }
  0x12   : > { %206 = vmatpush.msra.mxu0 %v176_v3  ;;  %290 = vmatpush.msra.mxu1 %v176_v3 }
  0x13   : > { %283 = vmatmul.msk.f32.vlgmr.msra.gmra.mxu0 %vm184_vm0, %v174_v4  ;;  %284 = vmatmul.msk.f32.vlgmr.msra.gmra.mxu1 %vm184_vm0, %v175_v5 }
  0x90   : > { %v208_v7 = vpop.f32.mrf.mxu0  ;;  %v211_v8 = vpop.f32.mrf.mxu1 }
  0x91   : > { %v209_v9 = vadd.f32 %v299_v6, %v208_v7  ;;  %v212_v10 = vadd.f32 %v299_v6, %v211_v8 }
  0x93   : > { %v214_v11 = vmax.f32 %v209_v9, 0.0  ;;  %v215_v12 = vmax.f32 %v212_v10, 0.0 }
  0x95   : > { %216 = vst.msk [vmem:[%s172_s4] sm:$0xff] %vm184_vm0, %v214_v11 }
  0x96   : > { %217 = vst.msk [vmem:[%s172_s4 + $0x8] sm:$0xff] %vm184_vm0, %v215_v12 }
  0x97 PF: > { %s13_s12 = sadd.s32 1, %s306_s12  }
  0x98   : > { %p10_p4 = scmp.ge.s32.totalorder %s13_s12, 4  }
  0x9a   :  { %12 = sbr.rel (!%p10_p4) target bundleno = 1 (0x1), region = 62 }

// kernel: point_transformer_cls.10
= control target key start
LH: loop header
LB: loop body
LE: loop exit
PB: predicated region body
PF: predicated region fallthrough
CT: control target
= control target key end

     0   :  { %s394_s12 = smov 0   ;;  %s436_s0 = inlined_call_operand.vmem [shape: f32[128,9], index: 0, kind: input, shape index: {}]   ;;  %s437_s1 = inlined_call_operand.vmem [shape: f32[9,32], index: 1, kind: input, shape index: {}]   ;;  %s438_s2 = inlined_call_operand.vmem [shape: f32[1,32], index: 2, kind: input, shape index: {}]   ;;  %s439_s3 = inlined_call_operand.vmem [shape: f32[128,32], index: 3, kind: output, shape index: {}]  }
   0x1 LB: > { %s331_s13 = sadd.s32 4294967295, %s372_s12   ;;  %p335_p0 = scmp.ge.s32.totalorder %s372_s12, 1  ;;  %s372_s12 = sphi %s394_s12, %s13_s12  }
   0x2   : > { %p138_p1 = scmp.lt.s32.totalorder %s372_s12, 3 }
   0x4   : > { %p139_p2 = pnand %p335_p0, %p138_p1 }
   0x5   : > { %s336_s18 = sshll.u32 (!%p139_p2), %s331_s13, 3 }
   0x6   : > { %142 = sbr.rel (%p139_p2) target bundleno = 162 (0xa2), region = 32  ;;  %p163_p3 = scmp.lt.s32.totalorder (!%p139_p2), %s336_s18, 15 }
   0xb   : > { %v183_v0 = vld [vmem:[%s437_s1 + $0x8] sm:$0x1]  ;;  %vm213_vm0 = vcmask 1040384   ;;  %v182_v1 = vld [vmem:[%s437_s1] sm:$0xff]  ;;  %s441_s18 = smov (!%p163_p3, %s336_s18), 15  ;;  %vm188_vm1 = vcmask 72704  }
   0xc   : > { %352 = vmatpush.msk.msra.mxu2 %vm213_vm0, %v183_v0  ;;  %353 = vmatpush.msk.msra.mxu3 %vm213_vm0, %v183_v0  ;;  %s337_s19 = sshll.u32 %s441_s18, 3  ;;  %v365_v10 = vld [vmem:[%s438_s2] ss:$0 sm:$0xff]  ;;  %vm266_vm2 = vcmask 261120  }
   0xd   : > { %340 = vmatpush.msk.msra.mxu0 %vm213_vm0, %v183_v0  ;;  %351 = vmatpush.msk.msra.mxu1 %vm213_vm0, %v183_v0  ;;  %s166_s22 = scalar_lea.vmem %s436_s0, %s337_s19  ;;  %s172_s27 = scalar_lea.vmem %s439_s3, %s337_s19 }
   0xe   : > { %355 = vmatpush.msra.mxu2 %v182_v1  ;;  %356 = vmatpush.msra.mxu3 %v182_v1  ;;  %v178_v2 = vld [vmem:[%s166_s22 + $0x20] sm:$0xff]  ;;  %v180_v3 = vld [vmem:[%s166_s22 + $0x30] sm:$0xff]  ;;  %v179_v6 = vld [vmem:[%s166_s22 + $0x28] sm:$0xff] }
   0xf   : > { %232 = vmatpush.msra.mxu0 %v182_v1  ;;  %354 = vmatpush.msra.mxu1 %v182_v1  ;;  %v174_v4 = vld [vmem:[%s166_s22] sm:$0xff]  ;;  %v176_v5 = vld [vmem:[%s166_s22 + $0x10] sm:$0xff]  ;;  %v181_v7 = vld [vmem:[%s166_s22 + $0x38] sm:$0xff] }
  0x10   : > { %345 = vmatmul.msk.f32.vlgmr.msra.gmra.mxu2 %vm188_vm1, %v178_v2  ;;  %347 = vmatmul.msk.f32.vlgmr.msra.gmra.mxu3 %vm188_vm1, %v180_v3  ;;  %v175_v8 = vld [vmem:[%s166_s22 + $0x8] sm:$0xff]  ;;  %v177_v9 = vld [vmem:[%s166_s22 + $0x18] sm:$0xff] }
  0x11   : > { %341 = vmatmul.msk.f32.vlgmr.msra.gmra.mxu0 %vm188_vm1, %v174_v4  ;;  %343 = vmatmul.msk.f32.vlgmr.msra.gmra.mxu1 %vm188_vm1, %v176_v5 }
  0x18   : > { %346 = vmatmul.msk.f32.gmra.mxu2 %vm188_vm1, %v179_v6  ;;  %348 = vmatmul.msk.f32.gmra.mxu3 %vm188_vm1, %v181_v7 }
  0x19   : > { %342 = vmatmul.msk.f32.gmra.mxu0 %vm188_vm1, %v175_v8  ;;  %344 = vmatmul.msk.f32.gmra.mxu1 %vm188_vm1, %v177_v9 }
  0x8e   : > { %v234_v11 = vpop.f32.mrf.mxu0  ;;  %v240_v12 = vpop.f32.mrf.mxu1 }
  0x8f   : > { %v235_v13 = vadd.f32 %v365_v10, %v234_v11  ;;  %v241_v14 = vadd.f32 %v365_v10, %v240_v12 }
  0x91   : > { %v258_v15 = vmax.f32 %v235_v13, 0.0  ;;  %v260_v16 = vmax.f32 %v241_v14, 0.0 }
  0x93   : > { %267 = vst.msk [vmem:[%s172_s27] sm:$0xff] %vm266_vm2, %v258_v15  ;;  %v246_v17 = vpop.f32.mrf.mxu2  ;;  %v252_v18 = vpop.f32.mrf.mxu3 }
  0x94   : > { %269 = vst.msk [vmem:[%s172_s27 + $0x10] sm:$0xff] %vm266_vm2, %v260_v16  ;;  %v247_v19 = vadd.f32 %v365_v10, %v246_v17  ;;  %v253_v20 = vadd.f32 %v365_v10, %v252_v18 }
  0x96   : > { %v262_v21 = vmax.f32 %v247_v19, 0.0  ;;  %v264_v22 = vmax.f32 %v253_v20, 0.0  ;;  %v237_v23 = vpop.f32.mrf.mxu0  ;;  %v243_v24 = vpop.f32.mrf.mxu1 }
  0x97   : > { %v238_v25 = vadd.f32 %v365_v10, %v237_v23  ;;  %v244_v26 = vadd.f32 %v365_v10, %v243_v24 }
  0x98   : > { %271 = vst.msk [vmem:[%s172_s27 + $0x20] sm:$0xff] %vm266_vm2, %v262_v21 }
  0x99   : > { %273 = vst.msk [vmem:[%s172_s27 + $0x30] sm:$0xff] %vm266_vm2, %v264_v22  ;;  %v259_v27 = vmax.f32 %v238_v25, 0.0  ;;  %v261_v28 = vmax.f32 %v244_v26, 0.0 }
  0x9b   : > { %268 = vst.msk [vmem:[%s172_s27 + $0x8] sm:$0xff] %vm266_vm2, %v259_v27  ;;  %v249_v29 = vpop.f32.mrf.mxu2  ;;  %v255_v30 = vpop.f32.mrf.mxu3 }
  0x9c   : > { %270 = vst.msk [vmem:[%s172_s27 + $0x18] sm:$0xff] %vm266_vm2, %v261_v28  ;;  %v250_v31 = vadd.f32 %v365_v10, %v249_v29  ;;  %v256_v32 = vadd.f32 %v365_v10, %v255_v30 }
  0x9e   : > { %v263_v33 = vmax.f32 %v250_v31, 0.0  ;;  %v265_v34 = vmax.f32 %v256_v32, 0.0 }
  0xa0   : > { %272 = vst.msk [vmem:[%s172_s27 + $0x28] sm:$0xff] %vm266_vm2, %v263_v33 }
  0xa1   : > { %274 = vst.msk [vmem:[%s172_s27 + $0x38] sm:$0xff] %vm266_vm2, %v265_v34 }
  0xa2 PF: > { %s13_s12 = sadd.s32 1, %s372_s12  }
  0xa3   : > { %p10_p4 = scmp.ge.s32.totalorder %s13_s12, 4  }
  0xa5   :  { %12 = sbr.rel (!%p10_p4) target bundleno = 1 (0x1), region = 62 }

// kernel: custom-call.10
= control target key start
LH: loop header
LB: loop body
LE: loop exit
PB: predicated region body
PF: predicated region fallthrough
CT: control target
= control target key end

     0   :  { %s6_s0 = inlined_call_operand.vmem [shape: f32[2,16], index: 0, kind: output, shape index: {}]  }

// kernel: point_transformer_cls.12
= control target key start
LH: loop header
LB: loop body
LE: loop exit
PB: predicated region body
PF: predicated region fallthrough
CT: control target
= control target key end

     0   :  { %s740_s30 = smov 0   ;;  %s856_s0 = inlined_call_operand.vmem [shape: f32[2,16,32], index: 0, kind: input, shape index: {}]   ;;  %s857_s1 = inlined_call_operand.vmem [shape: f32[32,64], index: 1, kind: input, shape index: {}]   ;;  %s858_s2 = inlined_call_operand.vmem [shape: f32[32,64], index: 2, kind: input, shape index: {}]   ;;  %s859_s3 = inlined_call_operand.vmem [shape: f32[32,64], index: 3, kind: input, shape index: {}]   ;;  %s860_s4 = inlined_call_operand.vmem [shape: f32[1,64], index: 4, kind: input, shape index: {}]   ;;  %s861_s5 = inlined_call_operand.vmem [shape: f32[1,64], index: 5, kind: input, shape index: {}]   ;;  %s862_s6 = inlined_call_operand.vmem [shape: f32[1,64], index: 6, kind: input, shape index: {}]   ;;  %s863_s7 = inlined_call_operand.vmem [shape: f32[64,32], index: 7, kind: input, shape index: {}]   ;;  %s864_s8 = inlined_call_operand.vmem [shape: f32[1,32], index: 8, kind: input, shape index: {}]   ;;  %s865_s9 = inlined_call_operand.vmem [shape: f32[2,16,32], index: 9, kind: output, shape index: {}]  }
   0x1 LB: > { %s623_s10 = sadd.s32 4294967295, %s688_s30   ;;  %p627_p0 = scmp.ge.s32.totalorder %s688_s30, 1  ;;  %s688_s30 = sphi %s740_s30, %s19_s30  }
   0x2   : > { %p287_p1 = scmp.lt.s32.totalorder %s688_s30, 3 }
   0x4   : > { %p288_p2 = pnand %p627_p0, %p287_p1 }
   0x5   : > { %p323_p3 = scmp.lt.s32.totalorder (!%p288_p2), %s623_s10, 1 }
   0x6   : > { %291 = sbr.rel (%p288_p2) target bundleno = 819 (0x333), region = 56 }
   0xb   : > { %v340_v0 = vld [vmem:[%s858_s2 + $0x18] sm:$0xff]  ;;  %v339_v1 = vld [vmem:[%s858_s2 + $0x10] sm:$0xff]  ;;  %v338_v4 = vld [vmem:[%s858_s2 + $0x8] sm:$0xff]  ;;  %s867_s10 = smov (!%p323_p3, %s623_s10), 1  ;;  %vm362_vm0 = vcmask 261120   ;;  %vm444_vm1 = vcmask 523264  }
   0xc   : > { %407 = vmatpush.msra.mxu1 %v340_v0  ;;  %v336_v2 = vld [vmem:[%s857_s1 + $0x18] sm:$0xff]  ;;  %v335_v3 = vld [vmem:[%s857_s1 + $0x10] sm:$0xff]  ;;  %v334_v5 = vld [vmem:[%s857_s1 + $0x8] sm:$0xff]  ;;  %s648_s25 = sshll.u32 %s867_s10, 4  ;;  %vm480_vm2 = vcmask 130048  }
   0xd   : > { %381 = vmatpush.msra.mxu0 %v336_v2  ;;  %650 = vmatpush.msra.mxu2 %v336_v2  ;;  %v337_v6 = vld [vmem:[%s858_s2] sm:$0xff]  ;;  %s327_s28 = scalar_lea.vmem %s856_s0, %s648_s25  ;;  %v344_v20 = vld [vmem:[%s859_s3 + $0x18] sm:$0xff]  ;;  %v343_v21 = vld [vmem:[%s859_s3 + $0x10] sm:$0xff]  ;;  %s332_s29 = scalar_lea.vmem %s865_s9, %s648_s25 }
   0xe   : > { %408 = vmatpush.msra.mxu1 %v339_v1  ;;  %v333_v7 = vld [vmem:[%s857_s1] sm:$0xff]  ;;  %v358_v9 = vld [vmem:[%s327_s28 + $0x8] sm:$0xff]  ;;  %v352_v43 = vld [vmem:[%s863_s7 + $0x38] sm:$0xff] }
   0xf   : > { %382 = vmatpush.msra.mxu0 %v335_v3  ;;  %651 = vmatpush.msra.mxu2 %v335_v3  ;;  %v357_v8 = vld [vmem:[%s327_s28] sm:$0xff]  ;;  %v342_v22 = vld [vmem:[%s859_s3 + $0x8] sm:$0xff]  ;;  %v351_v44 = vld [vmem:[%s863_s7 + $0x30] sm:$0xff] }
  0x10   : > { %409 = vmatpush.msra.mxu1 %v338_v4  ;;  %v670_v11 = vld [vmem:[%s861_s5] ss:$0 sm:$0xff]  ;;  %v350_v45 = vld [vmem:[%s863_s7 + $0x28] sm:$0xff]  ;;  %v348_v47 = vld [vmem:[%s863_s7 + $0x18] sm:$0xff] }
  0x11   : > { %383 = vmatpush.msra.mxu0 %v334_v5  ;;  %652 = vmatpush.msra.mxu2 %v334_v5  ;;  %v671_v14 = vld [vmem:[%s860_s4] ss:$0 sm:$0xff]  ;;  %v347_v48 = vld [vmem:[%s863_s7 + $0x10] sm:$0xff]  ;;  %v346_v49 = vld [vmem:[%s863_s7 + $0x8] sm:$0xff] }
  0x12   : > { %410 = vmatpush.msra.mxu1 %v337_v6  ;;  %v341_v23 = vld [vmem:[%s859_s3] sm:$0xff] }
  0x13   : > { %634 = vmatmul.msk.f32.vlgmr.msra.gmra.mxu1 %vm362_vm0, %v357_v8  ;;  %384 = vmatpush.msra.mxu0 %v333_v7  ;;  %v672_v32 = vld [vmem:[%s862_s6] ss:$0 sm:$0xff] }
  0x14   : > { %632 = vmatmul.msk.f32.vlgmr.msra.gmra.mxu0 %vm362_vm0, %v357_v8  ;;  %653 = vmatpush.msra.mxu2 %v333_v7  ;;  %v349_v46 = vld [vmem:[%s863_s7 + $0x20] sm:$0xff] }
  0x15   : > { %633 = vmatmul.msk.f32.vlgmr.msra.gmra.mxu2 %vm362_vm0, %v358_v9  ;;  %549 = vmatpush.msrb.mxu1 %v352_v43  ;;  %v345_v56 = vld [vmem:[%s863_s7] sm:$0xff] }
  0x16   : > { %433 = vmatpush.msrb.mxu2 %v344_v20  ;;  %v673_v59 = vld [vmem:[%s864_s8] ss:$0 sm:$0xff] }
  0x17   : > { %550 = vmatpush.msrb.mxu1 %v351_v44 }
  0x18   : > { %434 = vmatpush.msrb.mxu2 %v343_v21 }
  0x19   : > { %551 = vmatpush.msrb.mxu1 %v350_v45 }
  0x1a   : > { %435 = vmatpush.msrb.mxu2 %v342_v22 }
  0x1b   : > { %635 = vmatmul.msk.f32.gmra.mxu1 %vm362_vm0, %v358_v9 }
  0x1c   : > { %436 = vmatpush.msrb.mxu2 %v341_v23  ;;  %552 = vmatpush.msrb.mxu1 %v349_v46 }
  0x1d   : > { %636 = vmatmul.msk.f32.vlgmr.msrb.gmra.mxu2 %vm362_vm0, %v357_v8 }
  0x1e   : > { %553 = vmatpush.msrb.mxu1 %v348_v47 }
  0x20   : > { %554 = vmatpush.msrb.mxu1 %v347_v48 }
  0x22   : > { %555 = vmatpush.msrb.mxu1 %v346_v49 }
  0x24   : > { %556 = vmatpush.msrb.mxu1 %v345_v56 }
  0x25   : > { %637 = vmatmul.msk.f32.gmra.mxu2 %vm362_vm0, %v358_v9 }
  0x90   : > { %v412_v10 = vpop.f32.mrf.mxu1 }
  0x91   : > { %v386_v15 = vpop.f32.mrf.mxu0  ;;  %v413_v16 = vadd.f32 %v670_v11, %v412_v10 }
  0x92   : > { %v387_v17 = vadd.f32 %v671_v14, %v386_v15 }
  0x98   : > { %v415_v12 = vpop.f32.mrf.mxu1  ;;  %v389_v18 = vpop.f32.mrf.mxu2 }
  0x99   : > { %v416_v13 = vadd.f32 %v670_v11, %v415_v12  ;;  %v390_v19 = vadd.f32 %v671_v14, %v389_v18 }
  0x9b   : > { %638 = vmatpush.xpose.msk.msra.mxu3 %vm444_vm1, %v416_v13 }
  0x9f   : > { %639 = vmatpush.xpose.msk.msra.mxu3 %vm444_vm1, %v413_v16 }
  0xa0   : > { %v438_v29 = vpop.f32.mrf.mxu2 }
  0xa1   : > { %v439_v36 = vadd.f32 %v672_v32, %v438_v29 }
  0xa2   : > { %640 = vmatmul.msk.f32.vlgmr.msra.gmra.mxu3 %vm444_vm1, %v387_v17 }
  0xa3   : > { %654 = vmatpush.msrb.mxu3 %v352_v43 }
  0xa5   : > { %655 = vmatpush.msrb.mxu3 %v351_v44 }
  0xa7   : > { %656 = vmatpush.msrb.mxu3 %v350_v45 }
  0xa8   : > { %v441_v34 = vpop.f32.mrf.mxu2 }
  0xa9   : > { %v442_v37 = vadd.f32 %v672_v32, %v441_v34  ;;  %657 = vmatpush.msrb.mxu3 %v349_v46 }
  0xaa   : > { %641 = vmatmul.msk.f32.gmra.mxu3 %vm444_vm1, %v390_v19 }
  0xab   : > { %523 = vmatpush.msrb.mxu0 %v442_v37  ;;  %658 = vmatpush.msrb.mxu3 %v348_v47 }
  0xad   : > { %524 = vmatpush.msrb.mxu0 %v439_v36  ;;  %659 = vmatpush.msrb.mxu3 %v347_v48 }
  0xaf   : > { %660 = vmatpush.msrb.mxu3 %v346_v49 }
  0xb1   : > { %661 = vmatpush.msrb.mxu3 %v345_v56 }
 0x125   : > { %v474_v24 = vpop.f32.mrf.mxu3 }
 0x126   : > { %v481_v25 = vsel %vm480_vm2, %v474_v24, -inf }
 0x127   : > { %482 = vmax.xlane.f32.xlu0 %v481_v25 }
 0x12d   : > { %v477_v26 = vpop.f32.mrf.mxu3 }
 0x12e   : > { %v484_v27 = vsel %vm480_vm2, %v477_v26, -inf }
 0x12f   : > { %485 = vmax.xlane.f32.xlu0 %v484_v27 }
 0x19a   : > { %v483_v28 = vpop.xlane.xlu0 %482 }
 0x19b   : > { %v487_v30 = vsub.f32 %v474_v24, %v483_v28 }
 0x19d   : > { %v489_v31 = vmul.f32 1.442695, %v487_v30 }
 0x19f   : > { %674 = vpow2.f32 %v489_v31 }
 0x1a2   : > { %v486_v33 = vpop.xlane.xlu0 %485 }
 0x1a3   : > { %v488_v35 = vsub.f32 %v477_v26, %v486_v33 }
 0x1a5   : > { %v675_v38 = vpop.eup %674  ;;  %v491_v39 = vmul.f32 1.442695, %v488_v35 }
 0x1a6   : > { %v493_v40 = vsel %vm480_vm2, %v675_v38, 0.0 }
 0x1a7   : > { %676 = vpow2.f32 %v491_v39  ;;  %494 = vadd.xlane.f32.xlu1 %v493_v40 }
 0x1ad   : > { %v677_v41 = vpop.eup %676 }
 0x1ae   : > { %v496_v42 = vsel %vm480_vm2, %v677_v41, 0.0 }
 0x1af   : > { %497 = vadd.xlane.f32.xlu1 %v496_v42 }
 0x21a   : > { %v495_v50 = vpop.xlane.xlu1 %494 }
 0x21b   : > { %678 = vrcp.f32 %v495_v50 }
 0x221   : > { %v679_v51 = vpop.eup %678 }
 0x222   : > { %v498_v52 = vpop.xlane.xlu1 %497  ;;  %v501_v53 = vmul.f32 %v679_v51, %v675_v38 }
 0x223   : > { %680 = vrcp.f32 %v498_v52 }
 0x224   : > { %642 = vmatmul.msk.f32.vlgmr.msrb.gmra.mxu0 %vm480_vm2, %v501_v53 }
 0x229   : > { %v681_v54 = vpop.eup %680 }
 0x22a   : > { %v502_v55 = vmul.f32 %v681_v54, %v677_v41 }
 0x22c   : > { %643 = vmatmul.msk.f32.gmra.mxu0 %vm480_vm2, %v502_v55 }
 0x2a1   : > { %v526_v57 = vpop.f32.mrf.mxu0 }
 0x2a2   : > { %644 = vmatmul.msk.f32.vlgmr.msrb.gmra.mxu1 %vm444_vm1, %v526_v57 }
 0x2a9   : > { %v529_v58 = vpop.f32.mrf.mxu0 }
 0x2aa   : > { %645 = vmatmul.msk.f32.vlgmr.msrb.gmra.mxu3 %vm444_vm1, %v529_v58 }
 0x31f   : > { %v558_v60 = vpop.f32.mrf.mxu1 }
 0x320   : > { %v559_v61 = vadd.f32 %v673_v59, %v558_v60 }
 0x322   : > { %v564_v62 = vmax.f32 %v559_v61, 0.0 }
 0x324   : > { %566 = vst.msk [vmem:[%s332_s29] sm:$0xff] %vm362_vm0, %v564_v62 }
 0x32d   : > { %v561_v63 = vpop.f32.mrf.mxu3 }
 0x32e   : > { %v562_v0 = vadd.f32 %v673_v59, %v561_v63 }
 0x330   : > { %v565_v1 = vmax.f32 %v562_v0, 0.0 }
 0x332   : > { %567 = vst.msk [vmem:[%s332_s29 + $0x8] sm:$0xff] %vm362_vm0, %v565_v1 }
 0x333 PF: > { %s19_s30 = sadd.s32 1, %s688_s30  }
 0x334   : > { %p16_p4 = scmp.ge.s32.totalorder %s19_s30, 4  }
 0x336   :  { %18 = sbr.rel (!%p16_p4) target bundleno = 1 (0x1), region = 86 }

// kernel: point_transformer_cls.13
= control target key start
LH: loop header
LB: loop body
LE: loop exit
PB: predicated region body
PF: predicated region fallthrough
CT: control target
= control target key end

     0   :  { %s483_s9 = smov 0   ;;  %s485_s10 = smov 0   ;;  %s519_s0 = inlined_call_operand.vmem [shape: f32[2,8,3], index: 0, kind: input, shape index: {}]   ;;  %s520_s1 = inlined_call_operand.vmem [shape: f32[2,16,3], index: 1, kind: input, shape index: {}]   ;;  %s521_s2 = inlined_call_operand.vmem [shape: f32[2,8,16], index: 2, kind: output, shape index: {}]  }
   0x1   :  { %s487_s11 = smov 0  }
   0x2 LB: > { %s31_s12 = sadd.s32 1, %s461_s10  ;;  %p404_p0 = scmp.ge.s32.totalorder %s465_s11, 1  ;;  %s465_s11 = sphi %s487_s11, %s12_s11   ;;  %s461_s10 = sphi %s485_s10, %s523_s10   ;;  %s457_s9 = sphi %s483_s9, %s522_s9  }
   0x3   : > { %p33_p1 = scmp.ge.s32.totalorder %s31_s12, 2  ;;  %p156_p2 = scmp.lt.s32.totalorder %s465_s11, 3 }
   0x5   : > { %s525_s12 = smov (%p33_p1, %s31_s12), 0  ;;  %p157_p3 = pnand %p404_p0, %p156_p2 }
   0x6   : > { %p194_p4 = scmp.lt.s32.totalorder (!%p157_p3), %s457_s9, 1 }
   0x7   : > { %160 = sbr.rel (%p157_p3) target bundleno = 158 (0x9e), region = 28 }
   0xc   : > { %s527_s9 = smov (!%p194_p4, %s457_s9), 1  ;;  %vm224_vm0 = vcmask 23552   ;;  %v467_v7 = vmov 1.0   ;;  %vm293_vm1 = vcmask 130048  }
   0xd   : > { %s417_s13 = sshll.u32 %s527_s9, 4  ;;  %s405_s14 = sshll.u32 %s527_s9, 3 }
   0xe   : > { %s209_s17 = scalar_lea.vmem %s520_s1, %s417_s13  ;;  %s200_s20 = scalar_lea.vmem %s519_s0, %s405_s14 }
   0xf   : > { %v222_v0 = vld [vmem:[%s209_s17] sm:$0xff]  ;;  %v223_v1 = vld [vmem:[%s209_s17 + $0x8] sm:$0xff]  ;;  %s220_s23 = scalar_lea.vmem %s521_s2, %s405_s14 }
  0x10   : > { %v221_v2 = vld [vmem:[%s200_s20] sm:$0xff]  ;;  %v259_v3 = vmul.f32 %v223_v1, %v223_v1  ;;  %409 = vmatpush.xpose.msk.msra.mxu0 %vm224_vm0, %v223_v1  ;;  %v258_v5 = vmul.f32 %v222_v0, %v222_v0 }
  0x11   : > { %v254_v4 = vmul.f32 %v221_v2, %v221_v2 }
  0x12   : > { %412 = vmatpush.xpose.msk.msra.mxu1 %vm224_vm0, %v259_v3 }
  0x13   : > { %v255_v6 = vsel %vm224_vm0, %v254_v4, 0.0 }
  0x14   : > { %256 = vadd.xlane.f32.xlu0 %v255_v6  ;;  %410 = vmatpush.xpose.msk.msra.mxu0 %vm224_vm0, %v222_v0 }
  0x16   : > { %413 = vmatpush.xpose.msk.msra.mxu1 %vm224_vm0, %v258_v5 }
  0x17   : > { %411 = vmatmul.msk.f32.vlgmr.msra.gmra.mxu0 %vm224_vm0, %v221_v2 }
  0x19   : > { %414 = vmatmul.msk.f32.vlgmr.msra.gmra.mxu1 %vm224_vm0, %v467_v7 }
  0x87   : > { %v257_v10 = vpop.xlane.xlu0 %256 }
  0x94   : > { %v251_v8 = vpop.f32.mrf.mxu0 }
  0x95   : > { %v291_v12 = vmul.f32 2.0, %v251_v8 }
  0x96   : > { %v286_v9 = vpop.f32.mrf.mxu1 }
  0x97   : > { %v289_v11 = vperm.slane %v286_v9, 0 }
  0x99   : > { %v290_v13 = vadd.f32 %v289_v11, %v257_v10 }
  0x9b   : > { %v292_v14 = vsub.f32 %v290_v13, %v291_v12 }
  0x9d   : > { %294 = vst.msk [vmem:[%s220_s23] sm:$0xff] %vm293_vm1, %v292_v14 }
  0x9e PF: > { %s12_s11 = sadd.s32 1, %s465_s11   ;;  %s522_s9 = smov %s461_s10 }
  0x9f   : > { %p9_p5 = scmp.ge.s32.totalorder %s12_s11, 4   ;;  %s523_s10 = smov %s525_s12 }
  0xa1   :  { %11 = sbr.rel (!%p9_p5) target bundleno = 2 (0x2), region = 61 }

// kernel: point_transformer_cls.14
= control target key start
LH: loop header
LB: loop body
LE: loop exit
PB: predicated region body
PF: predicated region fallthrough
CT: control target
= control target key end

     0   :  { %s2999_s30 = smov 0   ;;  %s4819_s0 = inlined_call_operand.vmem [shape: f32[8,4,35], index: 0, kind: input, shape index: {}]   ;;  %s4820_s1 = inlined_call_operand.vmem [shape: f32[35,512], index: 1, kind: input, shape index: {}]   ;;  %s4821_s2 = inlined_call_operand.vmem [shape: f32[35,512], index: 2, kind: input, shape index: {}]   ;;  %s4822_s3 = inlined_call_operand.vmem [shape: f32[35,512], index: 3, kind: input, shape index: {}]   ;;  %s4823_s4 = inlined_call_operand.vmem [shape: f32[1,512], index: 4, kind: input, shape index: {}]   ;;  %s4824_s5 = inlined_call_operand.vmem [shape: f32[1,512], index: 5, kind: input, shape index: {}]   ;;  %s4825_s6 = inlined_call_operand.vmem [shape: f32[1,512], index: 6, kind: input, shape index: {}]   ;;  %s4826_s7 = inlined_call_operand.vmem [shape: f32[512,35], index: 7, kind: input, shape index: {}]   ;;  %s4827_s8 = inlined_call_operand.vmem [shape: f32[1,35], index: 8, kind: input, shape index: {}]   ;;  %s4828_s9 = inlined_call_operand.vmem [shape: f32[8,4,35], index: 9, kind: output, shape index: {}]  }
   0x1 LB: > { %s2646_s10 = sadd.s32 4294967295, %s2947_s30   ;;  %p2650_p0 = scmp.ge.s32.totalorder %s2947_s30, 1  ;;  %s2947_s30 = sphi %s2999_s30, %s19_s30  }
   0x2   : > { %p288_p1 = scmp.lt.s32.totalorder %s2947_s30, 3 }
   0x4   : > { %p289_p2 = pnand %p2650_p0, %p288_p1 }
   0x6   : > { %292 = sbr.rel (%p289_p2) target bundleno = 2866 (0xb32), region = 56 }
   0xb   : > { %v3010_v0 = vld [vmem:[%s4820_s1 + $0x80] sm:$0x7]  ;;  %vm478_vm0 = vcmask 1042432   ;;  %v3015_v1 = vld [vmem:[%s4820_s1 + $0x88] sm:$0x7]  ;;  %s2651_s23 = sshll.u32 %s2646_s10, 2 }
   0xc   : > { %v3020_v2 = vld [vmem:[%s4820_s1 + $0x60] sm:$0xff]  ;;  %2655 = vmatpush.msk.msra.mxu0 %vm478_vm0, %v3010_v0  ;;  %2657 = vmatpush.msk.msra.mxu1 %vm478_vm0, %v3015_v1  ;;  %v3029_v3 = vld [vmem:[%s4820_s1 + $0x90] sm:$0x7]  ;;  %v3034_v4 = vld [vmem:[%s4820_s1 + $0x98] sm:$0x7]  ;;  %p325_p3 = scmp.lt.s32.totalorder %s2651_s23, 7 }
   0xd   : > { %v3039_v5 = vld [vmem:[%s4820_s1 + $0x68] sm:$0xff]  ;;  %2659 = vmatpush.msk.msra.mxu2 %vm478_vm0, %v3029_v3  ;;  %2661 = vmatpush.msk.msra.mxu3 %vm478_vm0, %v3034_v4  ;;  %v3048_v6 = vld [vmem:[%s4820_s1 + $0x70] sm:$0xff]  ;;  %v3053_v7 = vld [vmem:[%s4820_s1 + $0x78] sm:$0xff]  ;;  %vm474_vm1 = vcmask 285696   ;;  %vm869_vm2 = vcmask 1043456   ;;  %vm853_vm3 = vcmask 27648  }
   0xe   : > { %v3058_v8 = vld [vmem:[%s4820_s1 + $0x40] sm:$0xff]  ;;  %503 = vmatpush.msra.mxu0 %v3020_v2  ;;  %523 = vmatpush.msra.mxu1 %v3039_v5  ;;  %v3065_v9 = vld [vmem:[%s4820_s1 + $0x48] sm:$0xff]  ;;  %v3070_v10 = vld [vmem:[%s4820_s1 + $0x50] sm:$0xff]  ;;  %s5301_s23 = smov (!%p325_p3, %s2651_s23), 7  ;;  %vm865_vm4 = vcmask 31744   ;;  %vm1046_vm5 = vcmask 281600  }
   0xf   : > { %v3075_v11 = vld [vmem:[%s4820_s1 + $0x58] sm:$0xff]  ;;  %543 = vmatpush.msra.mxu2 %v3048_v6  ;;  %563 = vmatpush.msra.mxu3 %v3053_v7  ;;  %v3082_v12 = vld [vmem:[%s4820_s1 + $0x20] sm:$0xff]  ;;  %v3087_v13 = vld [vmem:[%s4820_s1 + $0x28] sm:$0xff]  ;;  %s2652_s29 = sshll.u32 %s5301_s23, 2 }
  0x10   : > { %504 = vmatpush.msra.mxu0 %v3058_v8  ;;  %524 = vmatpush.msra.mxu1 %v3065_v9  ;;  %v3096_v14 = vld [vmem:[%s4820_s1 + $0x30] sm:$0xff]  ;;  %v3101_v15 = vld [vmem:[%s4820_s1 + $0x38] sm:$0xff]  ;;  %v3108_v16 = vld [vmem:[%s4820_s1] sm:$0xff]  ;;  %s3133_s16 = scalar_lea.vmem %s4819_s0, %s2652_s29  ;;  %s3955_s13 = scalar_lea.vmem %s4828_s9, %s2652_s29 }
  0x11   : > { %544 = vmatpush.msra.mxu2 %v3070_v10  ;;  %564 = vmatpush.msra.mxu3 %v3075_v11  ;;  %v3113_v17 = vld [vmem:[%s4820_s1 + $0x8] sm:$0xff]  ;;  %v3121_v18 = vld [vmem:[%s4820_s1 + $0x10] sm:$0xff]  ;;  %v3126_v19 = vld [vmem:[%s4820_s1 + $0x18] sm:$0xff] }
  0x12   : > { %505 = vmatpush.msra.mxu0 %v3082_v12  ;;  %525 = vmatpush.msra.mxu1 %v3087_v13  ;;  %v3140_v20 = vld [vmem:[%s4821_s2 + $0x80] sm:$0x7]  ;;  %v3145_v21 = vld [vmem:[%s4821_s2 + $0x88] sm:$0x7]  ;;  %v3152_v22 = vld [vmem:[%s4821_s2 + $0x90] sm:$0x7] }
  0x13   : > { %545 = vmatpush.msra.mxu2 %v3096_v14  ;;  %565 = vmatpush.msra.mxu3 %v3101_v15  ;;  %v3157_v23 = vld [vmem:[%s4821_s2 + $0x98] sm:$0x7]  ;;  %v3162_v24 = vld [vmem:[%s3133_s16] sm:$0xf]  ;;  %v3180_v26 = vld [vmem:[%s4821_s2 + $0x68] sm:$0xff] }
  0x14   : > { %506 = vmatpush.msra.mxu0 %v3108_v16  ;;  %526 = vmatpush.msra.mxu1 %v3113_v17  ;;  %v3175_v25 = vld [vmem:[%s4821_s2 + $0x60] sm:$0xff]  ;;  %v3189_v27 = vld [vmem:[%s4821_s2 + $0x70] sm:$0xff]  ;;  %v3194_v28 = vld [vmem:[%s4821_s2 + $0x78] sm:$0xff] }
  0x15   : > { %546 = vmatpush.msra.mxu2 %v3121_v18  ;;  %566 = vmatpush.msra.mxu3 %v3126_v19  ;;  %v3203_v29 = vld [vmem:[%s4821_s2 + $0x40] sm:$0xff]  ;;  %v3208_v30 = vld [vmem:[%s4821_s2 + $0x48] sm:$0xff]  ;;  %v3215_v31 = vld [vmem:[%s4821_s2 + $0x50] sm:$0xff] }
  0x16   : > { %2663 = vmatpush.msk.msrb.mxu0 %vm478_vm0, %v3140_v20  ;;  %2665 = vmatpush.msk.msrb.mxu1 %vm478_vm0, %v3145_v21  ;;  %v3220_v32 = vld [vmem:[%s4821_s2 + $0x58] sm:$0xff]  ;;  %v3227_v33 = vld [vmem:[%s4821_s2 + $0x20] sm:$0xff]  ;;  %v3232_v34 = vld [vmem:[%s4821_s2 + $0x28] sm:$0xff] }
  0x17   : > { %2667 = vmatpush.msk.msrb.mxu2 %vm478_vm0, %v3152_v22  ;;  %2669 = vmatpush.msk.msrb.mxu3 %vm478_vm0, %v3157_v23  ;;  %v3239_v35 = vld [vmem:[%s4821_s2 + $0x30] sm:$0xff]  ;;  %v3244_v36 = vld [vmem:[%s4821_s2 + $0x38] sm:$0xff]  ;;  %v3251_v37 = vld [vmem:[%s4821_s2] sm:$0xff] }
  0x18   : > { %2656 = vmatmul.msk.f32.vlgmr.msra.gmra.mxu0 %vm474_vm1, %v3162_v24  ;;  %2658 = vmatmul.msk.f32.vlgmr.msra.gmra.mxu1 %vm474_vm1, %v3162_v24  ;;  %v3256_v38 = vld [vmem:[%s4821_s2 + $0x8] sm:$0xff]  ;;  %v3263_v39 = vld [vmem:[%s4821_s2 + $0x10] sm:$0xff]  ;;  %v3268_v40 = vld [vmem:[%s4821_s2 + $0x18] sm:$0xff] }
  0x19   : > { %2660 = vmatmul.msk.f32.vlgmr.msra.gmra.mxu2 %vm474_vm1, %v3162_v24  ;;  %2662 = vmatmul.msk.f32.vlgmr.msra.gmra.mxu3 %vm474_vm1, %v3162_v24  ;;  %v3279_v41 = vld [vmem:[%s4822_s3 + $0x80] sm:$0x7]  ;;  %v3284_v42 = vld [vmem:[%s4822_s3 + $0x88] sm:$0x7]  ;;  %v3335_v49 = vld [vmem:[%s4822_s3 + $0x90] sm:$0x7] }
  0x1a   : > { %604 = vmatpush.msrb.mxu0 %v3175_v25  ;;  %624 = vmatpush.msrb.mxu1 %v3180_v26  ;;  %v3297_v43 = vld [vmem:[%s4822_s3 + $0x60] sm:$0xff]  ;;  %v3302_v44 = vld [vmem:[%s4822_s3 + $0x68] sm:$0xff]  ;;  %5024 = vst [vmem:[#allocation7_spill] sm:$0xff] %v3335_v49  ;;  %v3340_v50 = vld [vmem:[%s4822_s3 + $0x98] sm:$0x7] }
  0x1b   : > { %644 = vmatpush.msrb.mxu2 %v3189_v27  ;;  %664 = vmatpush.msrb.mxu3 %v3194_v28  ;;  %5019 = vst [vmem:[#allocation2_spill] sm:$0xff] %v3302_v44  ;;  %v3313_v45 = vld [vmem:[%s4822_s3 + $0x40] sm:$0xff]  ;;  %v3318_v46 = vld [vmem:[%s4822_s3 + $0x48] sm:$0xff]  ;;  %v3359_v53 = vld [vmem:[%s4822_s3 + $0x70] sm:$0xff] }
  0x1c   : > { %605 = vmatpush.msrb.mxu0 %v3203_v29  ;;  %625 = vmatpush.msrb.mxu1 %v3208_v30  ;;  %5020 = vst [vmem:[#allocation3_spill] sm:$0xff] %v3313_v45  ;;  %v3323_v47 = vld [vmem:[%s4822_s3 + $0x20] sm:$0xff]  ;;  %v3330_v48 = vld [vmem:[%s4822_s3 + $0x28] sm:$0xff]  ;;  %v3366_v54 = vld [vmem:[%s4822_s3 + $0x78] sm:$0xff] }
  0x1d   : > { %645 = vmatpush.msrb.mxu2 %v3215_v31  ;;  %665 = vmatpush.msrb.mxu3 %v3220_v32  ;;  %5021 = vst [vmem:[#allocation4_spill] sm:$0xff] %v3318_v46  ;;  %v3349_v51 = vld [vmem:[%s4822_s3] sm:$0xff]  ;;  %v3354_v52 = vld [vmem:[%s4822_s3 + $0x8] sm:$0xff]  ;;  %v3379_v55 = vld [vmem:[%s4822_s3 + $0x50] sm:$0xff] }
  0x1e   : > { %606 = vmatpush.msrb.mxu0 %v3227_v33  ;;  %626 = vmatpush.msrb.mxu1 %v3232_v34  ;;  %5022 = vst [vmem:[#allocation5_spill] sm:$0xff] %v3323_v47  ;;  %v3384_v56 = vld [vmem:[%s4822_s3 + $0x58] sm:$0xff]  ;;  %v3391_v57 = vld [vmem:[%s4822_s3 + $0x30] sm:$0xff]  ;;  %v461_v63 = vld [vmem:[%s4824_s5] sm:$0xf] }
  0x1f   : > { %646 = vmatpush.msrb.mxu2 %v3239_v35  ;;  %666 = vmatpush.msrb.mxu3 %v3244_v36  ;;  %5023 = vst [vmem:[#allocation6_spill] sm:$0xff] %v3330_v48  ;;  %v3396_v58 = vld [vmem:[%s4822_s3 + $0x38] sm:$0xff]  ;;  %v3401_v59 = vld [vmem:[%s4822_s3 + $0x10] sm:$0xff] }
  0x20   : > { %607 = vmatpush.msrb.mxu0 %v3251_v37  ;;  %627 = vmatpush.msrb.mxu1 %v3256_v38  ;;  %5025 = vst [vmem:[#allocation8_spill] sm:$0xff] %v3340_v50  ;;  %v3408_v60 = vld [vmem:[%s4822_s3 + $0x18] sm:$0xff] }
  0x21   : > { %647 = vmatpush.msrb.mxu2 %v3263_v39  ;;  %667 = vmatpush.msrb.mxu3 %v3268_v40  ;;  %5026 = vst [vmem:[#allocation9_spill] sm:$0xff] %v3349_v51 }
  0x22   : > { %2664 = vmatmul.msk.f32.vlgmr.msrb.gmra.mxu0 %vm474_vm1, %v3162_v24  ;;  %2666 = vmatmul.msk.f32.vlgmr.msrb.gmra.mxu1 %vm474_vm1, %v3162_v24  ;;  %5027 = vst [vmem:[#allocation10_spill] sm:$0xff] %v3354_v52 }
  0x23   : > { %2668 = vmatmul.msk.f32.vlgmr.msrb.gmra.mxu2 %vm474_vm1, %v3162_v24  ;;  %2670 = vmatmul.msk.f32.vlgmr.msrb.gmra.mxu3 %vm474_vm1, %v3162_v24  ;;  %5028 = vst [vmem:[#allocation11_spill] sm:$0xff] %v3359_v53 }
  0x24   : > { %2671 = vmatpush.msk.msra.mxu0 %vm478_vm0, %v3279_v41  ;;  %2673 = vmatpush.msk.msra.mxu1 %vm478_vm0, %v3284_v42  ;;  %5029 = vst [vmem:[#allocation12_spill] sm:$0xff] %v3366_v54 }
  0x25   : > { %2675 = vmatpush.msk.msra.mxu2 %vm478_vm0, %v3335_v49  ;;  %2677 = vmatpush.msk.msra.mxu3 %vm478_vm0, %v3340_v50  ;;  %5030 = vst [vmem:[#allocation13_spill] sm:$0xff] %v3379_v55 }
  0x26   : > { %705 = vmatpush.msra.mxu0 %v3297_v43  ;;  %725 = vmatpush.msra.mxu1 %v3302_v44  ;;  %5031 = vst [vmem:[#allocation14_spill] sm:$0xff] %v3384_v56 }
  0x27   : > { %745 = vmatpush.msra.mxu2 %v3359_v53  ;;  %765 = vmatpush.msra.mxu3 %v3366_v54  ;;  %5032 = vst [vmem:[#allocation15_spill] sm:$0xff] %v3391_v57 }
  0x28   : > { %706 = vmatpush.msra.mxu0 %v3313_v45  ;;  %726 = vmatpush.msra.mxu1 %v3318_v46  ;;  %5033 = vst [vmem:[#allocation16_spill] sm:$0xff] %v3396_v58  ;;  %v3434_v46 = vperm.slane %v461_v63, 2  ;;  %v3436_v45 = vperm.slane %v461_v63, 3 }
  0x29   : > { %746 = vmatpush.msra.mxu2 %v3379_v55  ;;  %766 = vmatpush.msra.mxu3 %v3384_v56  ;;  %5034 = vst [vmem:[#allocation17_spill] sm:$0xff] %v3401_v59 }
  0x2a   : > { %707 = vmatpush.msra.mxu0 %v3323_v47  ;;  %727 = vmatpush.msra.mxu1 %v3330_v48  ;;  %5035 = vst [vmem:[#allocation18_spill] sm:$0xff] %v3408_v60 }
  0x2b   : > { %747 = vmatpush.msra.mxu2 %v3391_v57  ;;  %767 = vmatpush.msra.mxu3 %v3396_v58  ;;  %v460_v58 = vld [vmem:[%s4823_s4] sm:$0xf]  ;;  %5036 = vst [vmem:[#allocation19_spill] sm:$0xff] %v3434_v46 }
  0x2c   : > { %708 = vmatpush.msra.mxu0 %v3349_v51  ;;  %728 = vmatpush.msra.mxu1 %v3354_v52  ;;  %v3422_v52 = vperm.slane %v461_v63, 0  ;;  %v3426_v51 = vperm.slane %v460_v58, 0  ;;  %v3428_v56 = vperm.slane %v460_v58, 1  ;;  %5037 = vst [vmem:[#allocation20_spill] sm:$0xff] %v3436_v45  ;;  %v3438_v50 = vperm.slane %v460_v58, 2 }
  0x2d   : > { %2672 = vmatmul.msk.f32.vlgmr.msra.gmra.mxu0 %vm474_vm1, %v3162_v24  ;;  %2674 = vmatmul.msk.f32.vlgmr.msra.gmra.mxu1 %vm474_vm1, %v3162_v24  ;;  %v3440_v49 = vperm.slane %v460_v58, 3 }
  0x2e   : > { %748 = vmatpush.msra.mxu2 %v3401_v59  ;;  %768 = vmatpush.msra.mxu3 %v3408_v60  ;;  %v3424_v60 = vperm.slane %v461_v63, 1  ;;  %5038 = vst [vmem:[#allocation21_spill] sm:$0xff] %v3438_v50 }
  0x2f   : > { %2676 = vmatmul.msk.f32.vlgmr.msra.gmra.mxu2 %vm474_vm1, %v3162_v24  ;;  %2678 = vmatmul.msk.f32.vlgmr.msra.gmra.mxu3 %vm474_vm1, %v3162_v24  ;;  %5039 = vst [vmem:[#allocation22_spill] sm:$0xff] %v3440_v49 }
  0x95   : > { %v508_v61 = vpop.f32.mrf.mxu0  ;;  %v528_v62 = vpop.f32.mrf.mxu1 }
  0x96   : > { %v509_v54 = vadd.f32 %v508_v61, %v3426_v51  ;;  %v529_v53 = vadd.f32 %v528_v62, %v3428_v56 }
  0x9c   : > { %v548_v57 = vpop.f32.mrf.mxu2  ;;  %v568_v59 = vpop.f32.mrf.mxu3 }
  0x9f   : > { %v609_v24 = vpop.f32.mrf.mxu0  ;;  %v629_v55 = vpop.f32.mrf.mxu1 }
  0xa0   : > { %v610_v48 = vadd.f32 %v609_v24, %v3422_v52  ;;  %v630_v47 = vadd.f32 %v629_v55, %v3424_v60 }
  0xa2   : > { %788 = vmatpush.xpose.msrb.mxu0 %v610_v48  ;;  %808 = vmatpush.xpose.msrb.mxu1 %v630_v47  ;;  %v549_v47 = vadd.f32 %v548_v57, %v3438_v50  ;;  %v569_v48 = vadd.f32 %v568_v59, %v3440_v49 }
  0xa5   : > { %789 = vmatmul.f32.vlgmr.msrb.gmra.mxu0 %v509_v54  ;;  %809 = vmatmul.f32.vlgmr.msrb.gmra.mxu1 %v529_v53  ;;  %v462_v53 = vld [vmem:[%s4825_s6] sm:$0xf] }
  0xa6   : > { %v649_v44 = vpop.f32.mrf.mxu2  ;;  %v669_v24 = vpop.f32.mrf.mxu3  ;;  %v3449_v54 = vperm.slane %v462_v53, 0  ;;  %v3451_v58 = vperm.slane %v462_v53, 1  ;;  %v3455_v57 = vperm.slane %v462_v53, 2  ;;  %v3457_v59 = vperm.slane %v462_v53, 3 }
  0xa7   : > { %v650_v55 = vadd.f32 %v649_v44, %v3434_v46  ;;  %v670_v61 = vadd.f32 %v669_v24, %v3436_v45 }
  0xa8   : > { %5040 = vst [vmem:[#allocation23_spill] sm:$0xff] %v3451_v58 }
  0xa9   : > { %828 = vmatpush.xpose.msrb.mxu2 %v650_v55  ;;  %848 = vmatpush.xpose.msrb.mxu3 %v670_v61  ;;  %5041 = vst [vmem:[#allocation24_spill] sm:$0xff] %v3455_v57 }
  0xaa   : > { %v710_v62 = vpop.f32.mrf.mxu0  ;;  %v730_v44 = vpop.f32.mrf.mxu1  ;;  %5042 = vst [vmem:[#allocation25_spill] sm:$0xff] %v3457_v59 }
  0xab   : > { %v711_v63 = vadd.f32 %v710_v62, %v3449_v54  ;;  %v731_v24 = vadd.f32 %v730_v44, %v3451_v58 }
  0xac   : > { %829 = vmatmul.f32.vlgmr.msrb.gmra.mxu2 %v549_v47  ;;  %849 = vmatmul.f32.vlgmr.msrb.gmra.mxu3 %v569_v48 }
  0xad   : > { %2679 = vmatpush.msk.msra.mxu0 %vm869_vm2, %v711_v63  ;;  %2681 = vmatpush.msk.msra.mxu1 %vm869_vm2, %v731_v24 }
  0xb2   : > { %v750_v55 = vpop.f32.mrf.mxu2  ;;  %v770_v61 = vpop.f32.mrf.mxu3 }
  0xb3   : > { %v751_v47 = vadd.f32 %v750_v55, %v3455_v57  ;;  %v771_v48 = vadd.f32 %v770_v61, %v3457_v59  ;;  %v3558_v59 = vld [vmem:[%s4826_s7 + $0xd8] sm:$0xff]  ;;  %v3577_v57 = vld [vmem:[%s4826_s7 + $0x50] sm:$0xff] }
  0xb4   : > { %5052 = vst [vmem:[#allocation35_spill] sm:$0xff] %v3558_v59 }
  0xb5   : > { %2683 = vmatpush.msk.msra.mxu2 %vm869_vm2, %v751_v47  ;;  %2685 = vmatpush.msk.msra.mxu3 %vm869_vm2, %v771_v48  ;;  %v3500_v48 = vld [vmem:[%s4826_s7 + $0xe8] sm:$0xff]  ;;  %5055 = vst [vmem:[#allocation38_spill] sm:$0xff] %v3577_v57 }
 0x122   : > { %v790_v62 = vpop.f32.mrf.mxu0  ;;  %v810_v44 = vpop.f32.mrf.mxu1 }
 0x123   : > { %v811_v49 = vadd.f32 %v810_v44, %v790_v62  ;;  %v3505_v62 = vld [vmem:[%s4826_s7 + $0x178] sm:$0xff] }
 0x124   : > { %5043 = vst [vmem:[#allocation26_spill] sm:$0xff] %v3505_v62  ;;  %v3510_v44 = vld [vmem:[%s4826_s7 + $0x1f8] sm:$0xff]  ;;  %1005 = vmatpush.msrb.mxu2 %v3505_v62 }
 0x125   : > { %5044 = vst [vmem:[#allocation27_spill] sm:$0xff] %v3510_v44  ;;  %1025 = vmatpush.msrb.mxu3 %v3510_v44  ;;  %v3546_v44 = vld [vmem:[%s4826_s7 + $0x1e8] sm:$0xff]  ;;  %v3553_v62 = vld [vmem:[%s4826_s7 + $0x58] sm:$0xff] }
 0x126   : > { %5050 = vst [vmem:[#allocation33_spill] sm:$0xff] %v3546_v44 }
 0x127   : > { %5051 = vst [vmem:[#allocation34_spill] sm:$0xff] %v3553_v62 }
 0x12f   : > { %v830_v50 = vpop.f32.mrf.mxu2  ;;  %v850_v45 = vpop.f32.mrf.mxu3 }
 0x130   : > { %v831_v53 = vadd.f32 %v830_v50, %v811_v49  ;;  %v3473_v49 = vld [vmem:[%s4826_s7 + $0x78] sm:$0xff]  ;;  %v3490_v50 = vld [vmem:[%s4826_s7 + $0xf0] sm:$0xff] }
 0x131   : > { %965 = vmatpush.msrb.mxu0 %v3473_v49 }
 0x132   : > { %v851_v63 = vadd.f32 %v850_v45, %v831_v53  ;;  %v3478_v45 = vld [vmem:[%s4826_s7 + $0xf8] sm:$0xff]  ;;  %v3517_v53 = vld [vmem:[%s4826_s7 + $0x170] sm:$0xff] }
 0x133   : > { %985 = vmatpush.msrb.mxu1 %v3478_v45  ;;  %5045 = vst [vmem:[#allocation28_spill] sm:$0xff] %v3517_v53  ;;  %1006 = vmatpush.msrb.mxu2 %v3517_v53  ;;  %v3565_v53 = vld [vmem:[%s4826_s7 + $0x160] sm:$0xff] }
 0x134   : > { %v854_v24 = vsel %vm853_vm3, %v851_v63, -inf  ;;  %5053 = vst [vmem:[#allocation36_spill] sm:$0xff] %v3565_v53 }
 0x135   : > { %855 = vmax.xlane.f32.xlu0 %v854_v24  ;;  %986 = vmatpush.msrb.mxu1 %v3490_v50  ;;  %v3529_v24 = vld [vmem:[%s4826_s7 + $0x60] sm:$0xff] }
 0x136   : > { %5047 = vst [vmem:[#allocation30_spill] sm:$0xff] %v3529_v24 }
 0x137   : > { %987 = vmatpush.msrb.mxu1 %v3500_v48 }
 0x1a8   : > { %v856_v46 = vpop.xlane.xlu0 %855 }
 0x1a9   : > { %v857_v58 = vsub.f32 %v851_v63, %v856_v46  ;;  %v3483_v46 = vld [vmem:[%s4826_s7 + $0x70] sm:$0xff] }
 0x1aa   : > { %966 = vmatpush.msrb.mxu0 %v3483_v46  ;;  %v3522_v63 = vld [vmem:[%s4826_s7 + $0x1f0] sm:$0xff] }
 0x1ab   : > { %v858_v55 = vmul.f32 1.442695, %v857_v58  ;;  %v3495_v58 = vld [vmem:[%s4826_s7 + $0x68] sm:$0xff]  ;;  %5046 = vst [vmem:[#allocation29_spill] sm:$0xff] %v3522_v63  ;;  %1026 = vmatpush.msrb.mxu3 %v3522_v63  ;;  %v3570_v63 = vld [vmem:[%s4826_s7 + $0x1e0] sm:$0xff] }
 0x1ac   : > { %967 = vmatpush.msrb.mxu0 %v3495_v58  ;;  %5054 = vst [vmem:[#allocation37_spill] sm:$0xff] %v3570_v63 }
 0x1ad   : > { %2800 = vpow2.f32 %v858_v55  ;;  %v3534_v55 = vld [vmem:[%s4826_s7 + $0xe0] sm:$0xff]  ;;  %1027 = vmatpush.msrb.mxu3 %v3546_v44  ;;  %v3594_v44 = vld [vmem:[%s4826_s7 + $0x1d8] sm:$0xff] }
 0x1ae   : > { %5048 = vst [vmem:[#allocation31_spill] sm:$0xff] %v3534_v55  ;;  %968 = vmatpush.msrb.mxu0 %v3529_v24  ;;  %988 = vmatpush.msrb.mxu1 %v3534_v55  ;;  %v3582_v55 = vld [vmem:[%s4826_s7 + $0xd0] sm:$0xff] }
 0x1af   : > { %5056 = vst [vmem:[#allocation39_spill] sm:$0xff] %v3582_v55  ;;  %1028 = vmatpush.msrb.mxu3 %v3570_v63  ;;  %v3618_v63 = vld [vmem:[%s4826_s7 + $0x1d0] sm:$0xff] }
 0x1b0   : > { %969 = vmatpush.msrb.mxu0 %v3553_v62  ;;  %989 = vmatpush.msrb.mxu1 %v3558_v59  ;;  %5058 = vst [vmem:[#allocation41_spill] sm:$0xff] %v3594_v44  ;;  %v3601_v62 = vld [vmem:[%s4826_s7 + $0x48] sm:$0xff] }
 0x1b1   : > { %5059 = vst [vmem:[#allocation42_spill] sm:$0xff] %v3601_v62  ;;  %v3606_v59 = vld [vmem:[%s4826_s7 + $0xc8] sm:$0xff]  ;;  %1029 = vmatpush.msrb.mxu3 %v3594_v44 }
 0x1b2   : > { %5060 = vst [vmem:[#allocation43_spill] sm:$0xff] %v3606_v59  ;;  %970 = vmatpush.msrb.mxu0 %v3577_v57  ;;  %990 = vmatpush.msrb.mxu1 %v3582_v55  ;;  %v3625_v57 = vld [vmem:[%s4826_s7 + $0x40] sm:$0xff]  ;;  %v3642_v44 = vld [vmem:[%s4826_s7 + $0x1c8] sm:$0xff] }
 0x1b3   : > { %v3466_v61 = vpop.eup %2800  ;;  %5062 = vst [vmem:[#allocation45_spill] sm:$0xff] %v3618_v63  ;;  %v3630_v55 = vld [vmem:[%s4826_s7 + $0xc0] sm:$0xff]  ;;  %1030 = vmatpush.msrb.mxu3 %v3618_v63 }
 0x1b4   : > { %v860_v47 = vsel %vm853_vm3, %v3466_v61, 0.0  ;;  %5063 = vst [vmem:[#allocation46_spill] sm:$0xff] %v3625_v57  ;;  %971 = vmatpush.msrb.mxu0 %v3601_v62  ;;  %991 = vmatpush.msrb.mxu1 %v3606_v59  ;;  %v3649_v62 = vld [vmem:[%s4826_s7 + $0x38] sm:$0xff]  ;;  %v3666_v63 = vld [vmem:[%s4826_s7 + $0x1c0] sm:$0xff] }
 0x1b5   : > { %861 = vadd.xlane.f32.xlu0 %v860_v47  ;;  %v3541_v47 = vld [vmem:[%s4826_s7 + $0x168] sm:$0xff]  ;;  %5064 = vst [vmem:[#allocation47_spill] sm:$0xff] %v3630_v55  ;;  %v3654_v59 = vld [vmem:[%s4826_s7 + $0xb8] sm:$0xff]  ;;  %1031 = vmatpush.msrb.mxu3 %v3642_v44 }
 0x1b6   : > { %5049 = vst [vmem:[#allocation32_spill] sm:$0xff] %v3541_v47  ;;  %1007 = vmatpush.msrb.mxu2 %v3541_v47  ;;  %v3589_v47 = vld [vmem:[%s4826_s7 + $0x158] sm:$0xff]  ;;  %972 = vmatpush.msrb.mxu0 %v3625_v57  ;;  %v3673_v57 = vld [vmem:[%s4826_s7 + $0x30] sm:$0xff] }
 0x1b7   : > { %5057 = vst [vmem:[#allocation40_spill] sm:$0xff] %v3589_v47  ;;  %992 = vmatpush.msrb.mxu1 %v3630_v55  ;;  %v3678_v55 = vld [vmem:[%s4826_s7 + $0xb0] sm:$0xff]  ;;  %1032 = vmatpush.msrb.mxu3 %v3666_v63 }
 0x1b8   : > { %1008 = vmatpush.msrb.mxu2 %v3565_v53  ;;  %v3613_v53 = vld [vmem:[%s4826_s7 + $0x150] sm:$0xff]  ;;  %5066 = vst [vmem:[#allocation49_spill] sm:$0xff] %v3642_v44  ;;  %973 = vmatpush.msrb.mxu0 %v3649_v62  ;;  %v3690_v44 = vld [vmem:[%s4826_s7 + $0x1b8] sm:$0xff] }
 0x1b9   : > { %5061 = vst [vmem:[#allocation44_spill] sm:$0xff] %v3613_v53  ;;  %993 = vmatpush.msrb.mxu1 %v3654_v59  ;;  %1033 = vmatpush.msrb.mxu3 %v3690_v44 }
 0x1ba   : > { %1009 = vmatpush.msrb.mxu2 %v3589_v47  ;;  %v3637_v47 = vld [vmem:[%s4826_s7 + $0x148] sm:$0xff]  ;;  %5067 = vst [vmem:[#allocation50_spill] sm:$0xff] %v3649_v62  ;;  %974 = vmatpush.msrb.mxu0 %v3673_v57 }
 0x1bb   : > { %5065 = vst [vmem:[#allocation48_spill] sm:$0xff] %v3637_v47  ;;  %v3697_v62 = vld [vmem:[%s4826_s7 + $0x28] sm:$0xff]  ;;  %994 = vmatpush.msrb.mxu1 %v3678_v55 }
 0x1bc   : > { %1010 = vmatpush.msrb.mxu2 %v3613_v53  ;;  %5068 = vst [vmem:[#allocation51_spill] sm:$0xff] %v3654_v59  ;;  %v3661_v53 = vld [vmem:[%s4826_s7 + $0x140] sm:$0xff]  ;;  %v3702_v59 = vld [vmem:[%s4826_s7 + $0xa8] sm:$0xff]  ;;  %975 = vmatpush.msrb.mxu0 %v3697_v62 }
 0x1bd   : > { %5069 = vst [vmem:[#allocation52_spill] sm:$0xff] %v3661_v53  ;;  %995 = vmatpush.msrb.mxu1 %v3702_v59 }
 0x1be   : > { %5070 = vst [vmem:[#allocation53_spill] sm:$0xff] %v3666_v63  ;;  %1011 = vmatpush.msrb.mxu2 %v3637_v47  ;;  %v3685_v47 = vld [vmem:[%s4826_s7 + $0x138] sm:$0xff]  ;;  %v3714_v63 = vld [vmem:[%s4826_s7 + $0x1b0] sm:$0xff] }
 0x1bf   : > { %5071 = vst [vmem:[#allocation54_spill] sm:$0xff] %v3673_v57  ;;  %v3721_v57 = vld [vmem:[%s4826_s7 + $0x20] sm:$0xff]  ;;  %1034 = vmatpush.msrb.mxu3 %v3714_v63 }
 0x1c0   : > { %5072 = vst [vmem:[#allocation55_spill] sm:$0xff] %v3678_v55  ;;  %1012 = vmatpush.msrb.mxu2 %v3661_v53  ;;  %v3709_v53 = vld [vmem:[%s4826_s7 + $0x130] sm:$0xff]  ;;  %v3726_v55 = vld [vmem:[%s4826_s7 + $0xa0] sm:$0xff]  ;;  %976 = vmatpush.msrb.mxu0 %v3721_v57 }
 0x1c1   : > { %5073 = vst [vmem:[#allocation56_spill] sm:$0xff] %v3685_v47  ;;  %996 = vmatpush.msrb.mxu1 %v3726_v55 }
 0x1c2   : > { %5074 = vst [vmem:[#allocation57_spill] sm:$0xff] %v3690_v44  ;;  %1013 = vmatpush.msrb.mxu2 %v3685_v47  ;;  %v3733_v47 = vld [vmem:[%s4826_s7 + $0x128] sm:$0xff] }
 0x1c3   : > { %5075 = vst [vmem:[#allocation58_spill] sm:$0xff] %v3697_v62  ;;  %v3738_v44 = vld [vmem:[%s4826_s7 + $0x1a8] sm:$0xff]  ;;  %v3745_v62 = vld [vmem:[%s4826_s7 + $0x18] sm:$0xff] }
 0x1c4   : > { %5076 = vst [vmem:[#allocation59_spill] sm:$0xff] %v3702_v59  ;;  %1014 = vmatpush.msrb.mxu2 %v3709_v53  ;;  %v3750_v59 = vld [vmem:[%s4826_s7 + $0x98] sm:$0xff]  ;;  %1035 = vmatpush.msrb.mxu3 %v3738_v44 }
 0x1c5   : > { %5077 = vst [vmem:[#allocation60_spill] sm:$0xff] %v3709_v53  ;;  %v3769_v53 = vld [vmem:[%s4826_s7 + $0x10] sm:$0xff]  ;;  %977 = vmatpush.msrb.mxu0 %v3745_v62  ;;  %997 = vmatpush.msrb.mxu1 %v3750_v59 }
 0x1c6   : > { %5078 = vst [vmem:[#allocation61_spill] sm:$0xff] %v3714_v63  ;;  %v3762_v63 = vld [vmem:[%s4826_s7 + $0x1a0] sm:$0xff]  ;;  %1015 = vmatpush.msrb.mxu2 %v3733_v47 }
 0x1c7   : > { %5079 = vst [vmem:[#allocation62_spill] sm:$0xff] %v3721_v57  ;;  %1036 = vmatpush.msrb.mxu3 %v3762_v63  ;;  %978 = vmatpush.msrb.mxu0 %v3769_v53 }
 0x1c8   : > { %5080 = vst [vmem:[#allocation63_spill] sm:$0xff] %v3726_v55  ;;  %v3774_v55 = vld [vmem:[%s4826_s7 + $0x90] sm:$0xff] }
 0x1c9   : > { %5081 = vst [vmem:[#allocation64_spill] sm:$0xff] %v3733_v47  ;;  %v3781_v47 = vld [vmem:[%s4826_s7 + $0x118] sm:$0xff]  ;;  %998 = vmatpush.msrb.mxu1 %v3774_v55 }
 0x1ca   : > { %5082 = vst [vmem:[#allocation65_spill] sm:$0xff] %v3738_v44  ;;  %v3786_v44 = vld [vmem:[%s4826_s7 + $0x198] sm:$0xff] }
 0x1cb   : > { %5083 = vst [vmem:[#allocation66_spill] sm:$0xff] %v3745_v62  ;;  %v3793_v62 = vld [vmem:[%s4826_s7 + $0x8] sm:$0xff]  ;;  %1037 = vmatpush.msrb.mxu3 %v3786_v44 }
 0x1cc   : > { %5084 = vst [vmem:[#allocation67_spill] sm:$0xff] %v3750_v59  ;;  %v3798_v59 = vld [vmem:[%s4826_s7 + $0x88] sm:$0xff]  ;;  %979 = vmatpush.msrb.mxu0 %v3793_v62 }
 0x1cd   : > { %5086 = vst [vmem:[#allocation69_spill] sm:$0xff] %v3762_v63  ;;  %999 = vmatpush.msrb.mxu1 %v3798_v59 }
 0x1ce   : > { %5087 = vst [vmem:[#allocation70_spill] sm:$0xff] %v3769_v53 }
 0x1cf   : > { %5088 = vst [vmem:[#allocation71_spill] sm:$0xff] %v3774_v55 }
 0x1d0   : > { %5089 = vst [vmem:[#allocation72_spill] sm:$0xff] %v3781_v47 }
 0x1d1   : > { %5090 = vst [vmem:[#allocation73_spill] sm:$0xff] %v3786_v44  ;;  %v3836_v44 = vld [vmem:[%s4826_s7 + $0x108] sm:$0xff] }
 0x1d2   : > { %5091 = vst [vmem:[#allocation74_spill] sm:$0xff] %v3793_v62 }
 0x1d3   : > { %5092 = vst [vmem:[#allocation75_spill] sm:$0xff] %v3798_v59 }
 0x1d4   : > { %5097 = vst [vmem:[#allocation80_spill] sm:$0xff] %v3836_v44 }
 0x228   : > { %v862_v24 = vpop.xlane.xlu0 %861 }
 0x229   : > { %2802 = vrcp.f32 %v862_v24  ;;  %v3757_v24 = vld [vmem:[%s4826_s7 + $0x120] sm:$0xff] }
 0x22a   : > { %5085 = vst [vmem:[#allocation68_spill] sm:$0xff] %v3757_v24  ;;  %1016 = vmatpush.msrb.mxu2 %v3757_v24  ;;  %v3841_v24 = vld [vmem:[%s4826_s7 + $0x188] sm:$0xff] }
 0x22b   : > { %5098 = vst [vmem:[#allocation81_spill] sm:$0xff] %v3841_v24 }
 0x22c   : > { %1017 = vmatpush.msrb.mxu2 %v3781_v47  ;;  %v3814_v47 = vld [vmem:[%s4826_s7] sm:$0xff] }
 0x22d   : > { %5093 = vst [vmem:[#allocation76_spill] sm:$0xff] %v3814_v47  ;;  %980 = vmatpush.msrb.mxu0 %v3814_v47  ;;  %v3853_v47 = vld [vmem:[%s4826_s7 + $0x180] sm:$0xff] }
 0x22e   : > { %5100 = vst [vmem:[#allocation83_spill] sm:$0xff] %v3853_v47 }
 0x22f   : > { %v2803_v57 = vpop.eup %2802 }
 0x230   : > { %v864_v63 = vmul.f32 %v2803_v57, %v3466_v61  ;;  %v3819_v57 = vld [vmem:[%s4826_s7 + $0x80] sm:$0xff]  ;;  %v3824_v61 = vld [vmem:[%s4826_s7 + $0x110] sm:$0xff] }
 0x231   : > { %5094 = vst [vmem:[#allocation77_spill] sm:$0xff] %v3819_v57  ;;  %1000 = vmatpush.msrb.mxu1 %v3819_v57  ;;  %1018 = vmatpush.msrb.mxu2 %v3824_v61  ;;  %v3848_v57 = vld [vmem:[%s4826_s7 + $0x100] sm:$0xff] }
 0x232   : > { %2680 = vmatmul.msk.f32.vlgmr.msra.gmra.mxu0 %vm865_vm4, %v864_v63  ;;  %2682 = vmatmul.msk.f32.vlgmr.msra.gmra.mxu1 %vm865_vm4, %v864_v63  ;;  %5095 = vst [vmem:[#allocation78_spill] sm:$0xff] %v3824_v61 }
 0x233   : > { %2684 = vmatmul.msk.f32.vlgmr.msra.gmra.mxu2 %vm865_vm4, %v864_v63  ;;  %2686 = vmatmul.msk.f32.vlgmr.msra.gmra.mxu3 %vm865_vm4, %v864_v63  ;;  %v3831_v63 = vld [vmem:[%s4826_s7 + $0x190] sm:$0xff]  ;;  %5099 = vst [vmem:[#allocation82_spill] sm:$0xff] %v3848_v57 }
 0x234   : > { %5096 = vst [vmem:[#allocation79_spill] sm:$0xff] %v3831_v63  ;;  %1038 = vmatpush.msrb.mxu3 %v3831_v63  ;;  %2688 = vmatpush.msk.msra.mxu0 %vm478_vm0, %v3010_v0 }
 0x235   : > { %2690 = vmatpush.msk.msra.mxu1 %vm478_vm0, %v3015_v1  ;;  %1019 = vmatpush.msrb.mxu2 %v3836_v44 }
 0x236   : > { %1039 = vmatpush.msrb.mxu3 %v3841_v24  ;;  %1065 = vmatpush.msra.mxu0 %v3020_v2  ;;  %v2687_v2 = vld [vmem:[%s3133_s16 + $0x4] sm:$0xf] }
 0x237   : > { %1085 = vmatpush.msra.mxu1 %v3039_v5  ;;  %1020 = vmatpush.msrb.mxu2 %v3848_v57  ;;  %v5101_v5 = vld [vmem:[#allocation2_spill] sm:$0xff] }
 0x238   : > { %1040 = vmatpush.msrb.mxu3 %v3853_v47  ;;  %1066 = vmatpush.msra.mxu0 %v3058_v8  ;;  %v5104_v8 = vld [vmem:[#allocation3_spill] sm:$0xff] }
 0x239   : > { %2692 = vmatpush.msk.msra.mxu2 %vm478_vm0, %v3029_v3  ;;  %1086 = vmatpush.msra.mxu1 %v3065_v9  ;;  %v5105_v9 = vld [vmem:[#allocation4_spill] sm:$0xff] }
 0x23a   : > { %2694 = vmatpush.msk.msra.mxu3 %vm478_vm0, %v3034_v4  ;;  %1067 = vmatpush.msra.mxu0 %v3082_v12  ;;  %v5108_v12 = vld [vmem:[#allocation5_spill] sm:$0xff] }
 0x23b   : > { %1105 = vmatpush.msra.mxu2 %v3048_v6  ;;  %1087 = vmatpush.msra.mxu1 %v3087_v13  ;;  %v5102_v6 = vld [vmem:[#allocation7_spill] sm:$0xff]  ;;  %v5109_v13 = vld [vmem:[#allocation6_spill] sm:$0xff] }
 0x23c   : > { %1125 = vmatpush.msra.mxu3 %v3053_v7  ;;  %1068 = vmatpush.msra.mxu0 %v3108_v16  ;;  %v5103_v7 = vld [vmem:[#allocation8_spill] sm:$0xff]  ;;  %v5112_v16 = vld [vmem:[#allocation9_spill] sm:$0xff] }
 0x23d   : > { %1106 = vmatpush.msra.mxu2 %v3070_v10  ;;  %1088 = vmatpush.msra.mxu1 %v3113_v17  ;;  %v5106_v10 = vld [vmem:[#allocation11_spill] sm:$0xff]  ;;  %v5113_v17 = vld [vmem:[#allocation10_spill] sm:$0xff] }
 0x23e   : > { %1126 = vmatpush.msra.mxu3 %v3075_v11  ;;  %v5107_v11 = vld [vmem:[#allocation12_spill] sm:$0xff] }
 0x23f   : > { %1107 = vmatpush.msra.mxu2 %v3096_v14  ;;  %v5110_v14 = vld [vmem:[#allocation13_spill] sm:$0xff] }
 0x240   : > { %1127 = vmatpush.msra.mxu3 %v3101_v15  ;;  %v5111_v15 = vld [vmem:[#allocation14_spill] sm:$0xff] }
 0x241   : > { %1108 = vmatpush.msra.mxu2 %v3121_v18  ;;  %v5114_v18 = vld [vmem:[#allocation15_spill] sm:$0xff] }
 0x242   : > { %1128 = vmatpush.msra.mxu3 %v3126_v19  ;;  %v5115_v19 = vld [vmem:[#allocation16_spill] sm:$0xff] }
 0x2af   : > { %v899_v0 = vpop.f32.mrf.mxu0  ;;  %v919_v1 = vpop.f32.mrf.mxu1 }
 0x2b0   : > { %981 = vmatmul.f32.vlgmr.msrb.gmra.mxu0 %v899_v0  ;;  %1001 = vmatmul.f32.vlgmr.msrb.gmra.mxu1 %v919_v1 }
 0x2b1   : > { %2696 = vmatpush.msk.msrb.mxu0 %vm478_vm0, %v3140_v20  ;;  %2698 = vmatpush.msk.msrb.mxu1 %vm478_vm0, %v3145_v21  ;;  %v5116_v20 = vld [vmem:[#allocation17_spill] sm:$0xff]  ;;  %v5117_v21 = vld [vmem:[#allocation18_spill] sm:$0xff] }
 0x2b3   : > { %1145 = vmatpush.msrb.mxu0 %v3175_v25  ;;  %1165 = vmatpush.msrb.mxu1 %v3180_v26  ;;  %v3947_v25 = vld [vmem:[%s4827_s8] ss:$0 sm:$0xff] }
 0x2b5   : > { %1146 = vmatpush.msrb.mxu0 %v3203_v29  ;;  %1166 = vmatpush.msrb.mxu1 %v3208_v30 }
 0x2b6   : > { %v939_v3 = vpop.f32.mrf.mxu2  ;;  %v959_v4 = vpop.f32.mrf.mxu3 }
 0x2b7   : > { %1021 = vmatmul.f32.vlgmr.msrb.gmra.mxu2 %v939_v3  ;;  %1041 = vmatmul.f32.vlgmr.msrb.gmra.mxu3 %v959_v4 }
 0x2b8   : > { %2689 = vmatmul.msk.f32.vlgmr.msra.gmra.mxu0 %vm474_vm1, %v2687_v2  ;;  %2691 = vmatmul.msk.f32.vlgmr.msra.gmra.mxu1 %vm474_vm1, %v2687_v2 }
 0x2b9   : > { %2700 = vmatpush.msk.msrb.mxu2 %vm478_vm0, %v3152_v22  ;;  %2702 = vmatpush.msk.msrb.mxu3 %vm478_vm0, %v3157_v23 }
 0x2ba   : > { %1147 = vmatpush.msrb.mxu0 %v3227_v33  ;;  %1167 = vmatpush.msrb.mxu1 %v3232_v34 }
 0x2bb   : > { %1185 = vmatpush.msrb.mxu2 %v3189_v27  ;;  %1205 = vmatpush.msrb.mxu3 %v3194_v28 }
 0x2bc   : > { %1148 = vmatpush.msrb.mxu0 %v3251_v37  ;;  %1168 = vmatpush.msrb.mxu1 %v3256_v38 }
 0x2bd   : > { %1186 = vmatpush.msrb.mxu2 %v3215_v31  ;;  %1206 = vmatpush.msrb.mxu3 %v3220_v32 }
 0x2be   : > { %2704 = vmatpush.msk.msra.mxu0 %vm478_vm0, %v3279_v41  ;;  %2706 = vmatpush.msk.msra.mxu1 %vm478_vm0, %v3284_v42 }
 0x2bf   : > { %2693 = vmatmul.msk.f32.vlgmr.msra.gmra.mxu2 %vm474_vm1, %v2687_v2  ;;  %2695 = vmatmul.msk.f32.vlgmr.msra.gmra.mxu3 %vm474_vm1, %v2687_v2 }
 0x2c0   : > { %1187 = vmatpush.msrb.mxu2 %v3239_v35  ;;  %1207 = vmatpush.msrb.mxu3 %v3244_v36 }
 0x2c1   : > { %2697 = vmatmul.msk.f32.vlgmr.msrb.gmra.mxu0 %vm474_vm1, %v2687_v2  ;;  %2699 = vmatmul.msk.f32.vlgmr.msrb.gmra.mxu1 %vm474_vm1, %v2687_v2 }
 0x2c2   : > { %1188 = vmatpush.msrb.mxu2 %v3263_v39  ;;  %1208 = vmatpush.msrb.mxu3 %v3268_v40 }
 0x2c3   : > { %1225 = vmatpush.msra.mxu0 %v3297_v43  ;;  %1245 = vmatpush.msra.mxu1 %v5101_v5 }
 0x2c4   : > { %2708 = vmatpush.msk.msra.mxu2 %vm478_vm0, %v5102_v6  ;;  %2710 = vmatpush.msk.msra.mxu3 %vm478_vm0, %v5103_v7  ;;  %v5119_v6 = vld [vmem:[#allocation19_spill] sm:$0xff] }
 0x2c5   : > { %1226 = vmatpush.msra.mxu0 %v5104_v8  ;;  %1246 = vmatpush.msra.mxu1 %v5105_v9  ;;  %v5120_v8 = vld [vmem:[#allocation20_spill] sm:$0xff] }
 0x2c6   : > { %1265 = vmatpush.msra.mxu2 %v5106_v10  ;;  %1285 = vmatpush.msra.mxu3 %v5107_v11 }
 0x2c7   : > { %2701 = vmatmul.msk.f32.vlgmr.msrb.gmra.mxu2 %vm474_vm1, %v2687_v2  ;;  %2703 = vmatmul.msk.f32.vlgmr.msrb.gmra.mxu3 %vm474_vm1, %v2687_v2 }
 0x2c8   : > { %1227 = vmatpush.msra.mxu0 %v5108_v12  ;;  %1247 = vmatpush.msra.mxu1 %v5109_v13  ;;  %v5121_v12 = vld [vmem:[#allocation21_spill] sm:$0xff] }
 0x2c9   : > { %1266 = vmatpush.msra.mxu2 %v5110_v14  ;;  %1286 = vmatpush.msra.mxu3 %v5111_v15 }
 0x2ca   : > { %1228 = vmatpush.msra.mxu0 %v5112_v16  ;;  %1248 = vmatpush.msra.mxu1 %v5113_v17  ;;  %v5122_v16 = vld [vmem:[#allocation22_spill] sm:$0xff] }
 0x2cb   : > { %2705 = vmatmul.msk.f32.vlgmr.msra.gmra.mxu0 %vm474_vm1, %v2687_v2  ;;  %2707 = vmatmul.msk.f32.vlgmr.msra.gmra.mxu1 %vm474_vm1, %v2687_v2 }
 0x2cc   : > { %1267 = vmatpush.msra.mxu2 %v5114_v18  ;;  %1287 = vmatpush.msra.mxu3 %v5115_v19 }
 0x2ce   : > { %1268 = vmatpush.msra.mxu2 %v5116_v20  ;;  %1288 = vmatpush.msra.mxu3 %v5117_v21 }
 0x2cf   : > { %2709 = vmatmul.msk.f32.vlgmr.msra.gmra.mxu2 %vm474_vm1, %v2687_v2  ;;  %2711 = vmatmul.msk.f32.vlgmr.msra.gmra.mxu3 %vm474_vm1, %v2687_v2  ;;  %v5118_v2 = vld [vmem:[#allocation23_spill] sm:$0xff] }
 0x32d   : > { %v982_v22 = vpop.f32.mrf.mxu0  ;;  %v1002_v23 = vpop.f32.mrf.mxu1 }
 0x32e   : > { %v983_v26 = vadd.f32 %v3947_v25, %v982_v22  ;;  %v5123_v22 = vld [vmem:[#allocation30_spill] sm:$0xff] }
 0x330   : > { %v1003_v29 = vadd.f32 %v1002_v23, %v983_v26  ;;  %v5124_v23 = vld [vmem:[#allocation31_spill] sm:$0xff]  ;;  %v5125_v26 = vld [vmem:[#allocation34_spill] sm:$0xff] }
 0x335   : > { %v1070_v27 = vpop.f32.mrf.mxu0  ;;  %v1090_v28 = vpop.f32.mrf.mxu1 }
 0x336   : > { %v1071_v39 = vadd.f32 %v1070_v27, %v3426_v51  ;;  %v1091_v40 = vadd.f32 %v1090_v28, %v3428_v56  ;;  %v5126_v27 = vld [vmem:[#allocation35_spill] sm:$0xff]  ;;  %v5127_v28 = vld [vmem:[#allocation38_spill] sm:$0xff] }
 0x33a   : > { %v1022_v30 = vpop.f32.mrf.mxu2  ;;  %v1042_v31 = vpop.f32.mrf.mxu3 }
 0x33b   : > { %v1023_v32 = vadd.f32 %v1022_v30, %v1003_v29  ;;  %v5128_v29 = vld [vmem:[#allocation39_spill] sm:$0xff]  ;;  %v5129_v30 = vld [vmem:[#allocation42_spill] sm:$0xff] }
 0x33d   : > { %v1043_v33 = vadd.f32 %v1042_v31, %v1023_v32  ;;  %v5130_v31 = vld [vmem:[#allocation43_spill] sm:$0xff]  ;;  %v5131_v32 = vld [vmem:[#allocation46_spill] sm:$0xff] }
 0x33e   : > { %v1150_v34 = vpop.f32.mrf.mxu0  ;;  %v1170_v35 = vpop.f32.mrf.mxu1 }
 0x33f   : > { %v1045_v36 = vmax.f32 %v1043_v33, 0.0  ;;  %v1151_v37 = vadd.f32 %v1150_v34, %v3422_v52  ;;  %v1171_v38 = vadd.f32 %v1170_v35, %v3424_v60  ;;  %v5132_v33 = vld [vmem:[#allocation47_spill] sm:$0xff]  ;;  %v5133_v34 = vld [vmem:[#allocation50_spill] sm:$0xff] }
 0x340   : > { %v5134_v35 = vld [vmem:[#allocation51_spill] sm:$0xff] }
 0x341   : > { %1047 = vst.msk [vmem:[%s3955_s13] sm:$0xf] %vm1046_vm5, %v1045_v36  ;;  %1308 = vmatpush.xpose.msrb.mxu0 %v1151_v37  ;;  %1328 = vmatpush.xpose.msrb.mxu1 %v1171_v38  ;;  %v5135_v36 = vld [vmem:[#allocation54_spill] sm:$0xff]  ;;  %v5136_v37 = vld [vmem:[#allocation55_spill] sm:$0xff] }
 0x342   : > { %v1110_v41 = vpop.f32.mrf.mxu2  ;;  %v1130_v42 = vpop.f32.mrf.mxu3  ;;  %v5137_v38 = vld [vmem:[#allocation58_spill] sm:$0xff] }
 0x343   : > { %v1111_v13 = vadd.f32 %v1110_v41, %v5121_v12  ;;  %v1131_v17 = vadd.f32 %v1130_v42, %v5122_v16  ;;  %v5140_v41 = vld [vmem:[#allocation63_spill] sm:$0xff]  ;;  %v5141_v42 = vld [vmem:[#allocation66_spill] sm:$0xff] }
 0x344   : > { %1309 = vmatmul.f32.vlgmr.msrb.gmra.mxu0 %v1071_v39  ;;  %1329 = vmatmul.f32.vlgmr.msrb.gmra.mxu1 %v1091_v40  ;;  %v5138_v39 = vld [vmem:[#allocation59_spill] sm:$0xff]  ;;  %v5139_v40 = vld [vmem:[#allocation62_spill] sm:$0xff] }
 0x348   : > { %v1230_v43 = vpop.f32.mrf.mxu0  ;;  %v1250_v0 = vpop.f32.mrf.mxu1 }
 0x349   : > { %v1231_v1 = vadd.f32 %v1230_v43, %v3449_v54  ;;  %v1251_v3 = vadd.f32 %v1250_v0, %v5118_v2  ;;  %v5142_v43 = vld [vmem:[#allocation67_spill] sm:$0xff]  ;;  %v5143_v0 = vld [vmem:[#allocation76_spill] sm:$0xff] }
 0x34a   : > { %v1190_v4 = vpop.f32.mrf.mxu2  ;;  %v1210_v5 = vpop.f32.mrf.mxu3 }
 0x34b   : > { %v1191_v7 = vadd.f32 %v1190_v4, %v5119_v6  ;;  %v1211_v9 = vadd.f32 %v1210_v5, %v5120_v8  ;;  %2712 = vmatpush.msk.msra.mxu0 %vm869_vm2, %v1231_v1  ;;  %2714 = vmatpush.msk.msra.mxu1 %vm869_vm2, %v1251_v3  ;;  %v5144_v1 = vld [vmem:[#allocation77_spill] sm:$0xff]  ;;  %v5145_v5 = vld [vmem:[#allocation24_spill] sm:$0xff] }
 0x34d   : > { %1479 = vmatpush.msrb.mxu0 %v3473_v49  ;;  %1499 = vmatpush.msrb.mxu1 %v3478_v45 }
 0x34e   : > { %1348 = vmatpush.xpose.msrb.mxu2 %v1191_v7  ;;  %1368 = vmatpush.xpose.msrb.mxu3 %v1211_v9  ;;  %v5146_v9 = vld [vmem:[#allocation25_spill] sm:$0xff] }
 0x34f   : > { %1480 = vmatpush.msrb.mxu0 %v3483_v46  ;;  %1500 = vmatpush.msrb.mxu1 %v3490_v50 }
 0x351   : > { %1349 = vmatmul.f32.vlgmr.msrb.gmra.mxu2 %v1111_v13  ;;  %1369 = vmatmul.f32.vlgmr.msrb.gmra.mxu3 %v1131_v17  ;;  %v5147_v17 = vld [vmem:[#allocation26_spill] sm:$0xff] }
 0x352   : > { %1481 = vmatpush.msrb.mxu0 %v3495_v58  ;;  %1501 = vmatpush.msrb.mxu1 %v3500_v48  ;;  %v1270_v3 = vpop.f32.mrf.mxu2  ;;  %v1290_v4 = vpop.f32.mrf.mxu3 }
 0x353   : > { %v1271_v7 = vadd.f32 %v1270_v3, %v5145_v5  ;;  %v1291_v13 = vadd.f32 %v1290_v4, %v5146_v9  ;;  %v5154_v3 = vld [vmem:[#allocation37_spill] sm:$0xff]  ;;  %v5155_v4 = vld [vmem:[#allocation40_spill] sm:$0xff] }
 0x354   : > { %1482 = vmatpush.msrb.mxu0 %v5123_v22  ;;  %1502 = vmatpush.msrb.mxu1 %v5124_v23 }
 0x355   : > { %2716 = vmatpush.msk.msra.mxu2 %vm869_vm2, %v1271_v7  ;;  %2718 = vmatpush.msk.msra.mxu3 %vm869_vm2, %v1291_v13  ;;  %v5156_v7 = vld [vmem:[#allocation41_spill] sm:$0xff]  ;;  %v5157_v13 = vld [vmem:[#allocation44_spill] sm:$0xff] }
 0x356   : > { %1483 = vmatpush.msrb.mxu0 %v5125_v26  ;;  %1503 = vmatpush.msrb.mxu1 %v5126_v27 }
 0x357   : > { %1519 = vmatpush.msrb.mxu2 %v5147_v17  ;;  %v5158_v17 = vld [vmem:[#allocation45_spill] sm:$0xff] }
 0x358   : > { %1484 = vmatpush.msrb.mxu0 %v5127_v28  ;;  %1504 = vmatpush.msrb.mxu1 %v5128_v29 }
 0x35a   : > { %1485 = vmatpush.msrb.mxu0 %v5129_v30  ;;  %1505 = vmatpush.msrb.mxu1 %v5130_v31 }
 0x35c   : > { %1486 = vmatpush.msrb.mxu0 %v5131_v32  ;;  %1506 = vmatpush.msrb.mxu1 %v5132_v33 }
 0x35e   : > { %1487 = vmatpush.msrb.mxu0 %v5133_v34  ;;  %1507 = vmatpush.msrb.mxu1 %v5134_v35 }
 0x360   : > { %1488 = vmatpush.msrb.mxu0 %v5135_v36  ;;  %1508 = vmatpush.msrb.mxu1 %v5136_v37 }
 0x362   : > { %1489 = vmatpush.msrb.mxu0 %v5137_v38  ;;  %1509 = vmatpush.msrb.mxu1 %v5138_v39 }
 0x364   : > { %1490 = vmatpush.msrb.mxu0 %v5139_v40  ;;  %1510 = vmatpush.msrb.mxu1 %v5140_v41 }
 0x366   : > { %1491 = vmatpush.msrb.mxu0 %v5141_v42  ;;  %1511 = vmatpush.msrb.mxu1 %v5142_v43 }
 0x368   : > { %1492 = vmatpush.msrb.mxu0 %v3769_v53  ;;  %1512 = vmatpush.msrb.mxu1 %v3774_v55  ;;  %v5148_v55 = vld [vmem:[#allocation27_spill] sm:$0xff]  ;;  %v5153_v53 = vld [vmem:[#allocation36_spill] sm:$0xff] }
 0x369   : > { %1539 = vmatpush.msrb.mxu3 %v5148_v55  ;;  %v5159_v55 = vld [vmem:[#allocation48_spill] sm:$0xff] }
 0x36a   : > { %1493 = vmatpush.msrb.mxu0 %v3793_v62  ;;  %1513 = vmatpush.msrb.mxu1 %v3798_v59  ;;  %v5149_v62 = vld [vmem:[#allocation28_spill] sm:$0xff]  ;;  %v5150_v59 = vld [vmem:[#allocation29_spill] sm:$0xff] }
 0x36b   : > { %1520 = vmatpush.msrb.mxu2 %v5149_v62  ;;  %1540 = vmatpush.msrb.mxu3 %v5150_v59  ;;  %v5160_v62 = vld [vmem:[#allocation49_spill] sm:$0xff]  ;;  %v5161_v59 = vld [vmem:[#allocation52_spill] sm:$0xff] }
 0x36c   : > { %1494 = vmatpush.msrb.mxu0 %v5143_v0  ;;  %1514 = vmatpush.msrb.mxu1 %v5144_v1  ;;  %v5151_v0 = vld [vmem:[#allocation32_spill] sm:$0xff]  ;;  %v5152_v1 = vld [vmem:[#allocation33_spill] sm:$0xff] }
 0x36d   : > { %1521 = vmatpush.msrb.mxu2 %v5151_v0  ;;  %1541 = vmatpush.msrb.mxu3 %v5152_v1  ;;  %v5162_v0 = vld [vmem:[#allocation53_spill] sm:$0xff]  ;;  %v5163_v1 = vld [vmem:[#allocation56_spill] sm:$0xff] }
 0x36f   : > { %1522 = vmatpush.msrb.mxu2 %v5153_v53  ;;  %1542 = vmatpush.msrb.mxu3 %v5154_v3  ;;  %v5164_v53 = vld [vmem:[#allocation57_spill] sm:$0xff]  ;;  %v5165_v3 = vld [vmem:[#allocation60_spill] sm:$0xff] }
 0x371   : > { %1523 = vmatpush.msrb.mxu2 %v5155_v4  ;;  %1543 = vmatpush.msrb.mxu3 %v5156_v7  ;;  %v5166_v4 = vld [vmem:[#allocation61_spill] sm:$0xff]  ;;  %v5167_v7 = vld [vmem:[#allocation64_spill] sm:$0xff] }
 0x373   : > { %1524 = vmatpush.msrb.mxu2 %v5157_v13  ;;  %1544 = vmatpush.msrb.mxu3 %v5158_v17  ;;  %v5168_v13 = vld [vmem:[#allocation65_spill] sm:$0xff]  ;;  %v5169_v17 = vld [vmem:[#allocation68_spill] sm:$0xff] }
 0x375   : > { %1525 = vmatpush.msrb.mxu2 %v5159_v55  ;;  %1545 = vmatpush.msrb.mxu3 %v5160_v62  ;;  %v5170_v55 = vld [vmem:[#allocation69_spill] sm:$0xff]  ;;  %v5171_v62 = vld [vmem:[#allocation72_spill] sm:$0xff] }
 0x377   : > { %1526 = vmatpush.msrb.mxu2 %v5161_v59  ;;  %1546 = vmatpush.msrb.mxu3 %v5162_v0  ;;  %v5172_v59 = vld [vmem:[#allocation73_spill] sm:$0xff] }
 0x379   : > { %1527 = vmatpush.msrb.mxu2 %v5163_v1  ;;  %1547 = vmatpush.msrb.mxu3 %v5164_v53 }
 0x37b   : > { %1528 = vmatpush.msrb.mxu2 %v5165_v3  ;;  %1548 = vmatpush.msrb.mxu3 %v5166_v4 }
 0x37d   : > { %1529 = vmatpush.msrb.mxu2 %v5167_v7  ;;  %1549 = vmatpush.msrb.mxu3 %v5168_v13 }
 0x37f   : > { %1530 = vmatpush.msrb.mxu2 %v5169_v17  ;;  %1550 = vmatpush.msrb.mxu3 %v5170_v55 }
 0x381   : > { %1531 = vmatpush.msrb.mxu2 %v5171_v62  ;;  %1551 = vmatpush.msrb.mxu3 %v5172_v59 }
 0x383   : > { %1532 = vmatpush.msrb.mxu2 %v3824_v61  ;;  %1552 = vmatpush.msrb.mxu3 %v3831_v63 }
 0x385   : > { %1533 = vmatpush.msrb.mxu2 %v3836_v44  ;;  %1553 = vmatpush.msrb.mxu3 %v3841_v24 }
 0x387   : > { %1534 = vmatpush.msrb.mxu2 %v3848_v57  ;;  %1554 = vmatpush.msrb.mxu3 %v3853_v47 }
 0x3c1   : > { %v1310_v13 = vpop.f32.mrf.mxu0  ;;  %v1330_v17 = vpop.f32.mrf.mxu1 }
 0x3c2   : > { %v1331_v7 = vadd.f32 %v1330_v17, %v1310_v13  ;;  %v4118_v17 = vld [vmem:[%s4820_s1 + $0x58] sm:$0xff] }
 0x3c3   : > { %5177 = vst [vmem:[#allocation4_spill] sm:$0xff] %v4118_v17  ;;  %v4142_v13 = vld [vmem:[%s4820_s1 + $0x38] sm:$0xff] }
 0x3c4   : > { %5181 = vst [vmem:[#allocation6_spill] sm:$0xff] %v4142_v13 }
 0x3d4   : > { %v1350_v55 = vpop.f32.mrf.mxu2  ;;  %v1370_v62 = vpop.f32.mrf.mxu3 }
 0x3d5   : > { %v1351_v4 = vadd.f32 %v1350_v55, %v1331_v7  ;;  %v4076_v55 = vld [vmem:[%s4820_s1 + $0x60] sm:$0xff]  ;;  %v4136_v7 = vld [vmem:[%s4820_s1 + $0x30] sm:$0xff] }
 0x3d6   : > { %5180 = vst [vmem:[#allocation5_spill] sm:$0xff] %v4136_v7 }
 0x3d7   : > { %v1371_v3 = vadd.f32 %v1370_v62, %v1351_v4  ;;  %v4055_v62 = vld [vmem:[%s4820_s1 + $0x88] sm:$0x7] }
 0x3d8   : > { %v4130_v4 = vld [vmem:[%s4820_s1 + $0x28] sm:$0xff] }
 0x3d9   : > { %v1373_v59 = vsel %vm853_vm3, %v1371_v3, -inf  ;;  %5179 = vst [vmem:[#allocation12_spill] sm:$0xff] %v4130_v4 }
 0x3da   : > { %1374 = vmax.xlane.f32.xlu1 %v1373_v59  ;;  %v4048_v59 = vld [vmem:[%s4820_s1 + $0x80] sm:$0x7] }
 0x44d   : > { %v1375_v61 = vpop.xlane.xlu1 %1374 }
 0x44e   : > { %v1376_v63 = vsub.f32 %v1371_v3, %v1375_v61  ;;  %v4100_v61 = vld [vmem:[%s4820_s1 + $0x40] sm:$0xff] }
 0x44f   : > { %5174 = vst [vmem:[#allocation7_spill] sm:$0xff] %v4100_v61  ;;  %v4124_v3 = vld [vmem:[%s4820_s1 + $0x20] sm:$0xff] }
 0x450   : > { %v1377_v53 = vmul.f32 1.442695, %v1376_v63  ;;  %v4106_v63 = vld [vmem:[%s4820_s1 + $0x48] sm:$0xff]  ;;  %5178 = vst [vmem:[#allocation11_spill] sm:$0xff] %v4124_v3 }
 0x451   : > { %5175 = vst [vmem:[#allocation8_spill] sm:$0xff] %v4106_v63 }
 0x452   : > { %2804 = vpow2.f32 %v1377_v53  ;;  %v4069_v53 = vld [vmem:[%s4820_s1 + $0x98] sm:$0x7] }
 0x458   : > { %v2805_v44 = vpop.eup %2804 }
 0x459   : > { %v1379_v24 = vsel %vm853_vm3, %v2805_v44, 0.0 }
 0x45a   : > { %1380 = vadd.xlane.f32.xlu1 %v1379_v24  ;;  %v4088_v24 = vld [vmem:[%s4820_s1 + $0x70] sm:$0xff] }
 0x4cd   : > { %v1381_v57 = vpop.xlane.xlu1 %1380 }
 0x4ce   : > { %2806 = vrcp.f32 %v1381_v57  ;;  %v4094_v57 = vld [vmem:[%s4820_s1 + $0x78] sm:$0xff] }
 0x4cf   : > { %5173 = vst [vmem:[#allocation2_spill] sm:$0xff] %v4094_v57 }
 0x4d4   : > { %v2807_v47 = vpop.eup %2806 }
 0x4d5   : > { %v1383_v1 = vmul.f32 %v2807_v47, %v2805_v44  ;;  %v4062_v44 = vld [vmem:[%s4820_s1 + $0x90] sm:$0x7]  ;;  %v4082_v47 = vld [vmem:[%s4820_s1 + $0x68] sm:$0xff] }
 0x4d7   : > { %2713 = vmatmul.msk.f32.vlgmr.msra.gmra.mxu0 %vm865_vm4, %v1383_v1  ;;  %2715 = vmatmul.msk.f32.vlgmr.msra.gmra.mxu1 %vm865_vm4, %v1383_v1 }
 0x4d8   : > { %2717 = vmatmul.msk.f32.vlgmr.msra.gmra.mxu2 %vm865_vm4, %v1383_v1  ;;  %2719 = vmatmul.msk.f32.vlgmr.msra.gmra.mxu3 %vm865_vm4, %v1383_v1  ;;  %v4112_v1 = vld [vmem:[%s4820_s1 + $0x50] sm:$0xff] }
 0x4d9   : > { %2722 = vmatpush.msk.msra.mxu0 %vm478_vm0, %v4048_v59  ;;  %2724 = vmatpush.msk.msra.mxu1 %vm478_vm0, %v4055_v62  ;;  %5176 = vst [vmem:[#allocation3_spill] sm:$0xff] %v4112_v1 }
 0x4da   : > { %2726 = vmatpush.msk.msra.mxu2 %vm478_vm0, %v4062_v44  ;;  %2728 = vmatpush.msk.msra.mxu3 %vm478_vm0, %v4069_v53 }
 0x4db   : > { %1579 = vmatpush.msra.mxu0 %v4076_v55  ;;  %1599 = vmatpush.msra.mxu1 %v4082_v47 }
 0x4dc   : > { %1619 = vmatpush.msra.mxu2 %v4088_v24  ;;  %1639 = vmatpush.msra.mxu3 %v4094_v57 }
 0x4dd   : > { %1580 = vmatpush.msra.mxu0 %v4100_v61  ;;  %1600 = vmatpush.msra.mxu1 %v4106_v63 }
 0x4de   : > { %1620 = vmatpush.msra.mxu2 %v4112_v1  ;;  %1640 = vmatpush.msra.mxu3 %v4118_v17 }
 0x4df   : > { %1581 = vmatpush.msra.mxu0 %v4124_v3  ;;  %1601 = vmatpush.msra.mxu1 %v4130_v4  ;;  %v4148_v3 = vld [vmem:[%s4820_s1] sm:$0xff]  ;;  %v4154_v4 = vld [vmem:[%s4820_s1 + $0x8] sm:$0xff] }
 0x4e0   : > { %1621 = vmatpush.msra.mxu2 %v4136_v7  ;;  %1641 = vmatpush.msra.mxu3 %v4142_v13  ;;  %5182 = vst [vmem:[#allocation13_spill] sm:$0xff] %v4148_v3  ;;  %v4160_v7 = vld [vmem:[%s4820_s1 + $0x10] sm:$0xff]  ;;  %v4166_v13 = vld [vmem:[%s4820_s1 + $0x18] sm:$0xff] }
 0x4e1   : > { %1582 = vmatpush.msra.mxu0 %v4148_v3  ;;  %5183 = vst [vmem:[#allocation14_spill] sm:$0xff] %v4154_v4  ;;  %1602 = vmatpush.msra.mxu1 %v4154_v4  ;;  %v4172_v4 = vld [vmem:[%s4821_s2 + $0x80] sm:$0x7] }
 0x4e2   : > { %5184 = vst [vmem:[#allocation9_spill] sm:$0xff] %v4160_v7  ;;  %1622 = vmatpush.msra.mxu2 %v4160_v7  ;;  %1642 = vmatpush.msra.mxu3 %v4166_v13  ;;  %v4179_v7 = vld [vmem:[%s4821_s2 + $0x88] sm:$0x7] }
 0x4e3   : > { %5185 = vst [vmem:[#allocation10_spill] sm:$0xff] %v4166_v13 }
 0x4e4   : > { %5186 = vst [vmem:[#allocation15_spill] sm:$0xff] %v4172_v4 }
 0x4e5   : > { %5187 = vst [vmem:[#allocation16_spill] sm:$0xff] %v4179_v7 }
 0x554   : > { %v1416_v3 = vpop.f32.mrf.mxu0  ;;  %v1436_v17 = vpop.f32.mrf.mxu1 }
 0x555   : > { %1495 = vmatmul.f32.vlgmr.msrb.gmra.mxu0 %v1416_v3  ;;  %1515 = vmatmul.f32.vlgmr.msrb.gmra.mxu1 %v1436_v17  ;;  %v4186_v17 = vld [vmem:[%s4821_s2 + $0x60] sm:$0xff]  ;;  %v4192_v3 = vld [vmem:[%s4821_s2 + $0x68] sm:$0xff] }
 0x556   : > { %2730 = vmatpush.msk.msrb.mxu0 %vm478_vm0, %v4172_v4  ;;  %2732 = vmatpush.msk.msrb.mxu1 %vm478_vm0, %v4179_v7  ;;  %5188 = vst [vmem:[#allocation17_spill] sm:$0xff] %v4186_v17  ;;  %v4196_v4 = vld [vmem:[%s3133_s16 + $0x8] sm:$0xf]  ;;  %v4201_v7 = vld [vmem:[%s4821_s2 + $0x40] sm:$0xff] }
 0x557   : > { %5189 = vst [vmem:[#allocation18_spill] sm:$0xff] %v4192_v3 }
 0x558   : > { %1659 = vmatpush.msrb.mxu0 %v4186_v17  ;;  %1679 = vmatpush.msrb.mxu1 %v4192_v3  ;;  %5190 = vst [vmem:[#allocation23_spill] sm:$0xff] %v4201_v7  ;;  %v4207_v17 = vld [vmem:[%s4821_s2 + $0x48] sm:$0xff] }
 0x559   : > { %5191 = vst [vmem:[#allocation19_spill] sm:$0xff] %v4207_v17 }
 0x55a   : > { %1660 = vmatpush.msrb.mxu0 %v4201_v7  ;;  %1680 = vmatpush.msrb.mxu1 %v4207_v17  ;;  %v4217_v7 = vld [vmem:[%s4821_s2 + $0x90] sm:$0x7]  ;;  %v4224_v17 = vld [vmem:[%s4821_s2 + $0x98] sm:$0x7] }
 0x55b   : > { %v1456_v13 = vpop.f32.mrf.mxu2  ;;  %v1476_v1 = vpop.f32.mrf.mxu3  ;;  %5192 = vst [vmem:[#allocation20_spill] sm:$0xff] %v4217_v7 }
 0x55c   : > { %1535 = vmatmul.f32.vlgmr.msrb.gmra.mxu2 %v1456_v13  ;;  %1555 = vmatmul.f32.vlgmr.msrb.gmra.mxu3 %v1476_v1  ;;  %5193 = vst [vmem:[#allocation21_spill] sm:$0xff] %v4224_v17  ;;  %v4231_v1 = vld [vmem:[%s4821_s2 + $0x20] sm:$0xff]  ;;  %v4237_v13 = vld [vmem:[%s4821_s2 + $0x28] sm:$0xff] }
 0x55d   : > { %2723 = vmatmul.msk.f32.vlgmr.msra.gmra.mxu0 %vm474_vm1, %v4196_v4  ;;  %2725 = vmatmul.msk.f32.vlgmr.msra.gmra.mxu1 %vm474_vm1, %v4196_v4  ;;  %5194 = vst [vmem:[#allocation22_spill] sm:$0xff] %v4231_v1 }
 0x55e   : > { %2734 = vmatpush.msk.msrb.mxu2 %vm478_vm0, %v4217_v7  ;;  %2736 = vmatpush.msk.msrb.mxu3 %vm478_vm0, %v4224_v17  ;;  %5195 = vst [vmem:[#allocation30_spill] sm:$0xff] %v4237_v13  ;;  %v4243_v7 = vld [vmem:[%s4821_s2 + $0x70] sm:$0xff]  ;;  %v4249_v17 = vld [vmem:[%s4821_s2 + $0x78] sm:$0xff] }
 0x55f   : > { %1661 = vmatpush.msrb.mxu0 %v4231_v1  ;;  %1681 = vmatpush.msrb.mxu1 %v4237_v13  ;;  %5196 = vst [vmem:[#allocation31_spill] sm:$0xff] %v4243_v7  ;;  %v4255_v1 = vld [vmem:[%s4821_s2] sm:$0xff]  ;;  %v4261_v13 = vld [vmem:[%s4821_s2 + $0x8] sm:$0xff] }
 0x560   : > { %1699 = vmatpush.msrb.mxu2 %v4243_v7  ;;  %5197 = vst [vmem:[#allocation34_spill] sm:$0xff] %v4249_v17  ;;  %1719 = vmatpush.msrb.mxu3 %v4249_v17  ;;  %v4267_v7 = vld [vmem:[%s4821_s2 + $0x50] sm:$0xff]  ;;  %v4273_v17 = vld [vmem:[%s4821_s2 + $0x58] sm:$0xff] }
 0x561   : > { %5198 = vst [vmem:[#allocation35_spill] sm:$0xff] %v4255_v1  ;;  %1662 = vmatpush.msrb.mxu0 %v4255_v1  ;;  %1682 = vmatpush.msrb.mxu1 %v4261_v13  ;;  %v4279_v1 = vld [vmem:[%s4822_s3 + $0x80] sm:$0x7] }
 0x562   : > { %5199 = vst [vmem:[#allocation38_spill] sm:$0xff] %v4261_v13  ;;  %1700 = vmatpush.msrb.mxu2 %v4267_v7  ;;  %1720 = vmatpush.msrb.mxu3 %v4273_v17  ;;  %v4286_v13 = vld [vmem:[%s4822_s3 + $0x88] sm:$0x7] }
 0x563   : > { %5200 = vst [vmem:[#allocation39_spill] sm:$0xff] %v4267_v7  ;;  %2738 = vmatpush.msk.msra.mxu0 %vm478_vm0, %v4279_v1  ;;  %2740 = vmatpush.msk.msra.mxu1 %vm478_vm0, %v4286_v13  ;;  %v4331_v7 = vld [vmem:[%s4822_s3 + $0x68] sm:$0xff] }
 0x564   : > { %5201 = vst [vmem:[#allocation42_spill] sm:$0xff] %v4273_v17  ;;  %2727 = vmatmul.msk.f32.vlgmr.msra.gmra.mxu2 %vm474_vm1, %v4196_v4  ;;  %2729 = vmatmul.msk.f32.vlgmr.msra.gmra.mxu3 %vm474_vm1, %v4196_v4  ;;  %v4297_v17 = vld [vmem:[%s4821_s2 + $0x30] sm:$0xff] }
 0x565   : > { %5202 = vst [vmem:[#allocation43_spill] sm:$0xff] %v4279_v1  ;;  %1701 = vmatpush.msrb.mxu2 %v4297_v17  ;;  %v4303_v1 = vld [vmem:[%s4821_s2 + $0x38] sm:$0xff]  ;;  %2731 = vmatmul.msk.f32.vlgmr.msrb.gmra.mxu0 %vm474_vm1, %v4196_v4 }
 0x566   : > { %5203 = vst [vmem:[#allocation46_spill] sm:$0xff] %v4286_v13  ;;  %1721 = vmatpush.msrb.mxu3 %v4303_v1  ;;  %2733 = vmatmul.msk.f32.vlgmr.msrb.gmra.mxu1 %vm474_vm1, %v4196_v4  ;;  %v4313_v13 = vld [vmem:[%s4821_s2 + $0x10] sm:$0xff] }
 0x567   : > { %5204 = vst [vmem:[#allocation47_spill] sm:$0xff] %v4297_v17  ;;  %1702 = vmatpush.msrb.mxu2 %v4313_v13  ;;  %v4319_v17 = vld [vmem:[%s4821_s2 + $0x18] sm:$0xff]  ;;  %1759 = vmatpush.msra.mxu1 %v4331_v7 }
 0x568   : > { %5205 = vst [vmem:[#allocation50_spill] sm:$0xff] %v4303_v1  ;;  %1722 = vmatpush.msrb.mxu3 %v4319_v17  ;;  %v4325_v1 = vld [vmem:[%s4822_s3 + $0x60] sm:$0xff] }
 0x569   : > { %5206 = vst [vmem:[#allocation51_spill] sm:$0xff] %v4313_v13  ;;  %1739 = vmatpush.msra.mxu0 %v4325_v1  ;;  %v4337_v13 = vld [vmem:[%s4822_s3 + $0x90] sm:$0x7] }
 0x56a   : > { %5207 = vst [vmem:[#allocation54_spill] sm:$0xff] %v4319_v17  ;;  %2742 = vmatpush.msk.msra.mxu2 %vm478_vm0, %v4337_v13  ;;  %v4344_v17 = vld [vmem:[%s4822_s3 + $0x98] sm:$0x7] }
 0x56b   : > { %5208 = vst [vmem:[#allocation55_spill] sm:$0xff] %v4325_v1  ;;  %2744 = vmatpush.msk.msra.mxu3 %vm478_vm0, %v4344_v17  ;;  %v4357_v1 = vld [vmem:[%s4822_s3 + $0x48] sm:$0xff] }
 0x56c   : > { %5209 = vst [vmem:[#allocation58_spill] sm:$0xff] %v4331_v7  ;;  %v4351_v7 = vld [vmem:[%s4822_s3 + $0x40] sm:$0xff]  ;;  %1760 = vmatpush.msra.mxu1 %v4357_v1  ;;  %1779 = vmatpush.msra.mxu2 %v5106_v10 }
 0x56d   : > { %5210 = vst [vmem:[#allocation59_spill] sm:$0xff] %v4337_v13  ;;  %1740 = vmatpush.msra.mxu0 %v4351_v7  ;;  %1799 = vmatpush.msra.mxu3 %v5107_v11  ;;  %v4383_v10 = vld [vmem:[%s4822_s3] sm:$0xff]  ;;  %v4389_v11 = vld [vmem:[%s4822_s3 + $0x8] sm:$0xff] }
 0x56e   : > { %5211 = vst [vmem:[#allocation62_spill] sm:$0xff] %v4344_v17  ;;  %2735 = vmatmul.msk.f32.vlgmr.msrb.gmra.mxu2 %vm474_vm1, %v4196_v4  ;;  %2737 = vmatmul.msk.f32.vlgmr.msrb.gmra.mxu3 %vm474_vm1, %v4196_v4 }
 0x56f   : > { %5212 = vst [vmem:[#allocation63_spill] sm:$0xff] %v4351_v7  ;;  %v4369_v7 = vld [vmem:[%s4822_s3 + $0x20] sm:$0xff]  ;;  %1780 = vmatpush.msra.mxu2 %v5110_v14  ;;  %1800 = vmatpush.msra.mxu3 %v5111_v15 }
 0x570   : > { %5213 = vst [vmem:[#allocation66_spill] sm:$0xff] %v4357_v1  ;;  %1741 = vmatpush.msra.mxu0 %v4369_v7  ;;  %v4375_v1 = vld [vmem:[%s4822_s3 + $0x28] sm:$0xff] }
 0x571   : > { %5214 = vst [vmem:[#allocation67_spill] sm:$0xff] %v4369_v7  ;;  %1761 = vmatpush.msra.mxu1 %v4375_v1  ;;  %1781 = vmatpush.msra.mxu2 %v5114_v18 }
 0x572   : > { %5215 = vst [vmem:[#allocation24_spill] sm:$0xff] %v4375_v1  ;;  %1742 = vmatpush.msra.mxu0 %v4383_v10  ;;  %1801 = vmatpush.msra.mxu3 %v5115_v19 }
 0x573   : > { %5216 = vst [vmem:[#allocation25_spill] sm:$0xff] %v4383_v10  ;;  %1762 = vmatpush.msra.mxu1 %v4389_v11  ;;  %2739 = vmatmul.msk.f32.vlgmr.msra.gmra.mxu0 %vm474_vm1, %v4196_v4 }
 0x574   : > { %5217 = vst [vmem:[#allocation53_spill] sm:$0xff] %v4389_v11  ;;  %2741 = vmatmul.msk.f32.vlgmr.msra.gmra.mxu1 %vm474_vm1, %v4196_v4  ;;  %1782 = vmatpush.msra.mxu2 %v5116_v20 }
 0x575   : > { %1802 = vmatpush.msra.mxu3 %v5117_v21 }
 0x576   : > { %2743 = vmatmul.msk.f32.vlgmr.msra.gmra.mxu2 %vm474_vm1, %v4196_v4  ;;  %2745 = vmatmul.msk.f32.vlgmr.msra.gmra.mxu3 %vm474_vm1, %v4196_v4 }
 0x5d2   : > { %v1496_v14 = vpop.f32.mrf.mxu0  ;;  %v1516_v15 = vpop.f32.mrf.mxu1 }
 0x5d3   : > { %v1497_v11 = vadd.f32 %v3947_v25, %v1496_v14 }
 0x5d5   : > { %v1517_v18 = vadd.f32 %v1516_v15, %v1497_v11 }
 0x5da   : > { %v1584_v10 = vpop.f32.mrf.mxu0  ;;  %v1604_v1 = vpop.f32.mrf.mxu1 }
 0x5db   : > { %v1585_v4 = vadd.f32 %v1584_v10, %v3426_v51  ;;  %v1605_v57 = vadd.f32 %v1604_v1, %v3428_v56 }
 0x5df   : > { %v1536_v7 = vpop.f32.mrf.mxu2  ;;  %v1556_v19 = vpop.f32.mrf.mxu3 }
 0x5e0   : > { %v1537_v17 = vadd.f32 %v1536_v7, %v1517_v18 }
 0x5e2   : > { %v1557_v20 = vadd.f32 %v1556_v19, %v1537_v17  ;;  %v1664_v13 = vpop.f32.mrf.mxu0 }
 0x5e3   : > { %v1684_v21 = vpop.f32.mrf.mxu1  ;;  %v1665_v63 = vadd.f32 %v1664_v13, %v3422_v52 }
 0x5e4   : > { %v1559_v3 = vmax.f32 %v1557_v20, 0.0  ;;  %v1685_v61 = vadd.f32 %v1684_v21, %v3424_v60  ;;  %v5242_v20 = vld [vmem:[#allocation61_spill] sm:$0xff]  ;;  %v5243_v21 = vld [vmem:[#allocation64_spill] sm:$0xff] }
 0x5e5   : > { %1822 = vmatpush.xpose.msrb.mxu0 %v1665_v63  ;;  %v5240_v63 = vld [vmem:[#allocation57_spill] sm:$0xff] }
 0x5e6   : > { %2720 = vst.msk [vmem:[%s3955_s13 + $0x4] sm:$0xf] %vm1046_vm5, %v1559_v3  ;;  %1842 = vmatpush.xpose.msrb.mxu1 %v1685_v61  ;;  %v5241_v3 = vld [vmem:[#allocation60_spill] sm:$0xff] }
 0x5e7   : > { %v1624_v11 = vpop.f32.mrf.mxu2  ;;  %v1644_v14 = vpop.f32.mrf.mxu3 }
 0x5e8   : > { %1823 = vmatmul.f32.vlgmr.msrb.gmra.mxu0 %v1585_v4  ;;  %v1645_v61 = vadd.f32 %v1644_v14, %v5122_v16  ;;  %v5244_v4 = vld [vmem:[#allocation65_spill] sm:$0xff] }
 0x5e9   : > { %1843 = vmatmul.f32.vlgmr.msrb.gmra.mxu1 %v1605_v57  ;;  %v1625_v57 = vadd.f32 %v1624_v11, %v5121_v12  ;;  %v5245_v11 = vld [vmem:[#allocation68_spill] sm:$0xff]  ;;  %v5246_v14 = vld [vmem:[#allocation69_spill] sm:$0xff] }
 0x5f0   : > { %v1744_v7 = vpop.f32.mrf.mxu0 }
 0x5f1   : > { %v1764_v17 = vpop.f32.mrf.mxu1  ;;  %v1745_v15 = vadd.f32 %v1744_v7, %v3449_v54  ;;  %v1704_v18 = vpop.f32.mrf.mxu2  ;;  %v5247_v7 = vld [vmem:[#allocation72_spill] sm:$0xff] }
 0x5f2   : > { %v1765_v13 = vadd.f32 %v1764_v17, %v5118_v2  ;;  %v1724_v19 = vpop.f32.mrf.mxu3  ;;  %v1705_v10 = vadd.f32 %v1704_v18, %v5119_v6  ;;  %v5248_v17 = vld [vmem:[#allocation73_spill] sm:$0xff] }
 0x5f3   : > { %v1725_v1 = vadd.f32 %v1724_v19, %v5120_v8  ;;  %2746 = vmatpush.msk.msra.mxu0 %vm869_vm2, %v1745_v15  ;;  %v5250_v15 = vld [vmem:[#allocation79_spill] sm:$0xff]  ;;  %v5252_v18 = vld [vmem:[#allocation81_spill] sm:$0xff]  ;;  %v5253_v19 = vld [vmem:[#allocation82_spill] sm:$0xff] }
 0x5f4   : > { %2748 = vmatpush.msk.msra.mxu1 %vm869_vm2, %v1765_v13  ;;  %1862 = vmatpush.xpose.msrb.mxu2 %v1705_v10  ;;  %v5251_v13 = vld [vmem:[#allocation80_spill] sm:$0xff]  ;;  %v5254_v10 = vld [vmem:[#allocation83_spill] sm:$0xff] }
 0x5f5   : > { %1993 = vmatpush.msrb.mxu0 %v3473_v49  ;;  %1882 = vmatpush.xpose.msrb.mxu3 %v1725_v1  ;;  %v5218_v49 = vld [vmem:[#allocation70_spill] sm:$0xff] }
 0x5f6   : > { %2013 = vmatpush.msrb.mxu1 %v3478_v45  ;;  %v5219_v45 = vld [vmem:[#allocation71_spill] sm:$0xff] }
 0x5f7   : > { %1994 = vmatpush.msrb.mxu0 %v3483_v46  ;;  %1863 = vmatmul.f32.vlgmr.msrb.gmra.mxu2 %v1625_v57  ;;  %v5220_v46 = vld [vmem:[#allocation74_spill] sm:$0xff] }
 0x5f8   : > { %2014 = vmatpush.msrb.mxu1 %v3490_v50  ;;  %1883 = vmatmul.f32.vlgmr.msrb.gmra.mxu3 %v1645_v61  ;;  %v5221_v50 = vld [vmem:[#allocation75_spill] sm:$0xff] }
 0x5f9   : > { %1995 = vmatpush.msrb.mxu0 %v3495_v58  ;;  %v5222_v58 = vld [vmem:[#allocation76_spill] sm:$0xff] }
 0x5fa   : > { %2015 = vmatpush.msrb.mxu1 %v3500_v48  ;;  %v5223_v48 = vld [vmem:[#allocation77_spill] sm:$0xff] }
 0x5fb   : > { %1996 = vmatpush.msrb.mxu0 %v5123_v22  ;;  %v1784_v22 = vpop.f32.mrf.mxu2 }
 0x5fc   : > { %2016 = vmatpush.msrb.mxu1 %v5124_v23  ;;  %v1804_v23 = vpop.f32.mrf.mxu3 }
 0x5fd   : > { %1997 = vmatpush.msrb.mxu0 %v5125_v26  ;;  %v1785_v26 = vadd.f32 %v1784_v22, %v5145_v5 }
 0x5fe   : > { %2017 = vmatpush.msrb.mxu1 %v5126_v27  ;;  %v1805_v27 = vadd.f32 %v1804_v23, %v5146_v9 }
 0x5ff   : > { %1998 = vmatpush.msrb.mxu0 %v5127_v28  ;;  %2750 = vmatpush.msk.msra.mxu2 %vm869_vm2, %v1785_v26  ;;  %v5224_v28 = vld [vmem:[#allocation26_spill] sm:$0xff] }
 0x600   : > { %2018 = vmatpush.msrb.mxu1 %v5128_v29  ;;  %2752 = vmatpush.msk.msra.mxu3 %vm869_vm2, %v1805_v27  ;;  %v5225_v29 = vld [vmem:[#allocation27_spill] sm:$0xff] }
 0x601   : > { %1999 = vmatpush.msrb.mxu0 %v5129_v30  ;;  %2033 = vmatpush.msrb.mxu2 %v5224_v28  ;;  %v5226_v30 = vld [vmem:[#allocation28_spill] sm:$0xff] }
 0x602   : > { %2019 = vmatpush.msrb.mxu1 %v5130_v31  ;;  %2053 = vmatpush.msrb.mxu3 %v5225_v29  ;;  %v5227_v31 = vld [vmem:[#allocation29_spill] sm:$0xff] }
 0x603   : > { %2000 = vmatpush.msrb.mxu0 %v5131_v32  ;;  %2034 = vmatpush.msrb.mxu2 %v5226_v30  ;;  %v5228_v32 = vld [vmem:[#allocation32_spill] sm:$0xff] }
 0x604   : > { %2020 = vmatpush.msrb.mxu1 %v5132_v33  ;;  %2054 = vmatpush.msrb.mxu3 %v5227_v31  ;;  %v5229_v33 = vld [vmem:[#allocation33_spill] sm:$0xff]  ;;  %v5255_v31 = vld [vmem:[#allocation2_spill] sm:$0xff] }
 0x605   : > { %2001 = vmatpush.msrb.mxu0 %v5133_v34  ;;  %2035 = vmatpush.msrb.mxu2 %v5228_v32  ;;  %v5230_v34 = vld [vmem:[#allocation36_spill] sm:$0xff]  ;;  %v5256_v32 = vld [vmem:[#allocation7_spill] sm:$0xff] }
 0x606   : > { %2021 = vmatpush.msrb.mxu1 %v5134_v35  ;;  %2055 = vmatpush.msrb.mxu3 %v5229_v33  ;;  %v5231_v35 = vld [vmem:[#allocation37_spill] sm:$0xff]  ;;  %v5258_v33 = vld [vmem:[#allocation3_spill] sm:$0xff] }
 0x607   : > { %2002 = vmatpush.msrb.mxu0 %v5135_v36  ;;  %2036 = vmatpush.msrb.mxu2 %v5230_v34  ;;  %v5232_v36 = vld [vmem:[#allocation40_spill] sm:$0xff] }
 0x608   : > { %2022 = vmatpush.msrb.mxu1 %v5136_v37  ;;  %2056 = vmatpush.msrb.mxu3 %v5231_v35  ;;  %v5233_v37 = vld [vmem:[#allocation41_spill] sm:$0xff]  ;;  %v5261_v34 = vld [vmem:[#allocation12_spill] sm:$0xff] }
 0x609   : > { %2003 = vmatpush.msrb.mxu0 %v5137_v38  ;;  %2037 = vmatpush.msrb.mxu2 %v5232_v36  ;;  %v5234_v38 = vld [vmem:[#allocation44_spill] sm:$0xff]  ;;  %v5266_v35 = vld [vmem:[#allocation9_spill] sm:$0xff]  ;;  %v5267_v36 = vld [vmem:[#allocation10_spill] sm:$0xff] }
 0x60a   : > { %2023 = vmatpush.msrb.mxu1 %v5138_v39  ;;  %2057 = vmatpush.msrb.mxu3 %v5233_v37  ;;  %v5235_v39 = vld [vmem:[#allocation45_spill] sm:$0xff] }
 0x60b   : > { %2004 = vmatpush.msrb.mxu0 %v5139_v40  ;;  %2038 = vmatpush.msrb.mxu2 %v5234_v38  ;;  %v5236_v40 = vld [vmem:[#allocation48_spill] sm:$0xff] }
 0x60c   : > { %2024 = vmatpush.msrb.mxu1 %v5140_v41  ;;  %2058 = vmatpush.msrb.mxu3 %v5235_v39  ;;  %v5237_v41 = vld [vmem:[#allocation49_spill] sm:$0xff]  ;;  %v5268_v39 = vld [vmem:[#allocation15_spill] sm:$0xff] }
 0x60d   : > { %2005 = vmatpush.msrb.mxu0 %v5141_v42  ;;  %2039 = vmatpush.msrb.mxu2 %v5236_v40  ;;  %v5238_v42 = vld [vmem:[#allocation52_spill] sm:$0xff] }
 0x60e   : > { %2025 = vmatpush.msrb.mxu1 %v5142_v43  ;;  %2059 = vmatpush.msrb.mxu3 %v5237_v41  ;;  %v5239_v43 = vld [vmem:[#allocation56_spill] sm:$0xff]  ;;  %v5270_v41 = vld [vmem:[#allocation17_spill] sm:$0xff] }
 0x60f   : > { %2006 = vmatpush.msrb.mxu0 %v5218_v49  ;;  %2040 = vmatpush.msrb.mxu2 %v5238_v42  ;;  %v5269_v40 = vld [vmem:[#allocation16_spill] sm:$0xff]  ;;  %v5271_v42 = vld [vmem:[#allocation18_spill] sm:$0xff] }
 0x610   : > { %2026 = vmatpush.msrb.mxu1 %v5219_v45  ;;  %2060 = vmatpush.msrb.mxu3 %v5162_v0  ;;  %v5249_v0 = vld [vmem:[#allocation78_spill] sm:$0xff] }
 0x611   : > { %2007 = vmatpush.msrb.mxu0 %v5220_v46  ;;  %2041 = vmatpush.msrb.mxu2 %v5239_v43  ;;  %v2755_v43 = vld [vmem:[%s3133_s16 + $0xc] sm:$0xf] }
 0x612   : > { %2027 = vmatpush.msrb.mxu1 %v5221_v50  ;;  %2061 = vmatpush.msrb.mxu3 %v5240_v63  ;;  %v5272_v63 = vld [vmem:[#allocation23_spill] sm:$0xff] }
 0x613   : > { %2008 = vmatpush.msrb.mxu0 %v5222_v58  ;;  %2042 = vmatpush.msrb.mxu2 %v5241_v3  ;;  %v5273_v3 = vld [vmem:[#allocation19_spill] sm:$0xff] }
 0x614   : > { %2028 = vmatpush.msrb.mxu1 %v5223_v48  ;;  %2062 = vmatpush.msrb.mxu3 %v5242_v20 }
 0x615   : > { %2043 = vmatpush.msrb.mxu2 %v5243_v21 }
 0x616   : > { %2063 = vmatpush.msrb.mxu3 %v5244_v4  ;;  %v5274_v4 = vld [vmem:[#allocation20_spill] sm:$0xff] }
 0x617   : > { %2044 = vmatpush.msrb.mxu2 %v5245_v11  ;;  %v5275_v11 = vld [vmem:[#allocation21_spill] sm:$0xff] }
 0x618   : > { %2064 = vmatpush.msrb.mxu3 %v5246_v14  ;;  %v5276_v14 = vld [vmem:[#allocation22_spill] sm:$0xff] }
 0x619   : > { %2045 = vmatpush.msrb.mxu2 %v5247_v7  ;;  %v5277_v7 = vld [vmem:[#allocation30_spill] sm:$0xff] }
 0x61a   : > { %2065 = vmatpush.msrb.mxu3 %v5248_v17  ;;  %v5278_v17 = vld [vmem:[#allocation31_spill] sm:$0xff] }
 0x61b   : > { %2046 = vmatpush.msrb.mxu2 %v5249_v0  ;;  %v5279_v0 = vld [vmem:[#allocation34_spill] sm:$0xff] }
 0x61c   : > { %2066 = vmatpush.msrb.mxu3 %v5250_v15  ;;  %v5280_v15 = vld [vmem:[#allocation35_spill] sm:$0xff] }
 0x61d   : > { %2047 = vmatpush.msrb.mxu2 %v5251_v13  ;;  %v5281_v13 = vld [vmem:[#allocation38_spill] sm:$0xff] }
 0x61e   : > { %2067 = vmatpush.msrb.mxu3 %v5252_v18  ;;  %v5282_v18 = vld [vmem:[#allocation39_spill] sm:$0xff] }
 0x61f   : > { %2048 = vmatpush.msrb.mxu2 %v5253_v19  ;;  %v5283_v19 = vld [vmem:[#allocation42_spill] sm:$0xff] }
 0x620   : > { %2068 = vmatpush.msrb.mxu3 %v5254_v10  ;;  %v5284_v10 = vld [vmem:[#allocation43_spill] sm:$0xff] }
 0x665   : > { %v1824_v1 = vpop.f32.mrf.mxu0 }
 0x666   : > { %v1844_v57 = vpop.f32.mrf.mxu1 }
 0x667   : > { %v1845_v61 = vadd.f32 %v1844_v57, %v1824_v1  ;;  %v5285_v1 = vld [vmem:[#allocation46_spill] sm:$0xff]  ;;  %v5286_v57 = vld [vmem:[#allocation47_spill] sm:$0xff] }
 0x67a   : > { %v1864_v49 = vpop.f32.mrf.mxu2 }
 0x67b   : > { %v1865_v45 = vadd.f32 %v1864_v49, %v1845_v61  ;;  %v1884_v46 = vpop.f32.mrf.mxu3  ;;  %v5287_v61 = vld [vmem:[#allocation50_spill] sm:$0xff]  ;;  %v5288_v49 = vld [vmem:[#allocation51_spill] sm:$0xff] }
 0x67d   : > { %v1885_v50 = vadd.f32 %v1884_v46, %v1865_v45  ;;  %v5289_v45 = vld [vmem:[#allocation54_spill] sm:$0xff]  ;;  %v5290_v46 = vld [vmem:[#allocation55_spill] sm:$0xff] }
 0x67f   : > { %v1887_v58 = vsel %vm853_vm3, %v1885_v50, -inf }
 0x680   : > { %1888 = vmax.xlane.f32.xlu2 %v1887_v58  ;;  %v5292_v58 = vld [vmem:[#allocation59_spill] sm:$0xff] }
 0x6f3   : > { %v1889_v48 = vpop.xlane.xlu2 %1888 }
 0x6f4   : > { %v1890_v22 = vsub.f32 %v1885_v50, %v1889_v48  ;;  %v5291_v50 = vld [vmem:[#allocation58_spill] sm:$0xff] }
 0x6f5   : > { %v5293_v48 = vld [vmem:[#allocation62_spill] sm:$0xff] }
 0x6f6   : > { %v1891_v23 = vmul.f32 1.442695, %v1890_v22  ;;  %v5294_v22 = vld [vmem:[#allocation63_spill] sm:$0xff] }
 0x6f8   : > { %2808 = vpow2.f32 %v1891_v23  ;;  %v5295_v23 = vld [vmem:[#allocation66_spill] sm:$0xff] }
 0x6fe   : > { %v2809_v26 = vpop.eup %2808 }
 0x6ff   : > { %v1893_v27 = vsel %vm853_vm3, %v2809_v26, 0.0 }
 0x700   : > { %1894 = vadd.xlane.f32.xlu2 %v1893_v27  ;;  %v2869_v27 = vld [vmem:[%s4822_s3 + $0x78] sm:$0xff] }
 0x773   : > { %v1895_v28 = vpop.xlane.xlu2 %1894 }
 0x774   : > { %2810 = vrcp.f32 %v1895_v28  ;;  %v5296_v28 = vld [vmem:[#allocation67_spill] sm:$0xff] }
 0x77a   : > { %v2811_v29 = vpop.eup %2810 }
 0x77b   : > { %v1897_v30 = vmul.f32 %v2811_v29, %v2809_v26  ;;  %v2868_v26 = vld [vmem:[%s4822_s3 + $0x70] sm:$0xff] }
 0x77c   : > { %v5297_v29 = vld [vmem:[#allocation24_spill] sm:$0xff] }
 0x77d   : > { %2747 = vmatmul.msk.f32.vlgmr.msra.gmra.mxu0 %vm865_vm4, %v1897_v30  ;;  %2749 = vmatmul.msk.f32.vlgmr.msra.gmra.mxu1 %vm865_vm4, %v1897_v30 }
 0x77e   : > { %2751 = vmatmul.msk.f32.vlgmr.msra.gmra.mxu2 %vm865_vm4, %v1897_v30  ;;  %2753 = vmatmul.msk.f32.vlgmr.msra.gmra.mxu3 %vm865_vm4, %v1897_v30  ;;  %v2870_v30 = vld [vmem:[%s4822_s3 + $0x50] sm:$0xff] }
 0x77f   : > { %2756 = vmatpush.msk.msra.mxu0 %vm478_vm0, %v4048_v59  ;;  %2758 = vmatpush.msk.msra.mxu1 %vm478_vm0, %v4055_v62  ;;  %v5257_v59 = vld [vmem:[#allocation8_spill] sm:$0xff] }
 0x780   : > { %2760 = vmatpush.msk.msra.mxu2 %vm478_vm0, %v4062_v44  ;;  %2762 = vmatpush.msk.msra.mxu3 %vm478_vm0, %v4069_v53  ;;  %v5259_v62 = vld [vmem:[#allocation4_spill] sm:$0xff]  ;;  %v5260_v44 = vld [vmem:[#allocation11_spill] sm:$0xff]  ;;  %v5262_v53 = vld [vmem:[#allocation5_spill] sm:$0xff] }
 0x781   : > { %2093 = vmatpush.msra.mxu0 %v4076_v55  ;;  %2113 = vmatpush.msra.mxu1 %v4082_v47  ;;  %v5263_v55 = vld [vmem:[#allocation6_spill] sm:$0xff]  ;;  %v5264_v47 = vld [vmem:[#allocation13_spill] sm:$0xff] }
 0x782   : > { %2133 = vmatpush.msra.mxu2 %v4088_v24  ;;  %2153 = vmatpush.msra.mxu3 %v5255_v31  ;;  %v5265_v24 = vld [vmem:[#allocation14_spill] sm:$0xff]  ;;  %v2871_v31 = vld [vmem:[%s4822_s3 + $0x58] sm:$0xff] }
 0x783   : > { %2094 = vmatpush.msra.mxu0 %v5256_v32  ;;  %2114 = vmatpush.msra.mxu1 %v5257_v59  ;;  %v5298_v32 = vld [vmem:[#allocation25_spill] sm:$0xff] }
 0x784   : > { %2134 = vmatpush.msra.mxu2 %v5258_v33  ;;  %2154 = vmatpush.msra.mxu3 %v5259_v62  ;;  %v5299_v59 = vld [vmem:[#allocation53_spill] sm:$0xff]  ;;  %v2872_v33 = vld [vmem:[%s4822_s3 + $0x30] sm:$0xff] }
 0x785   : > { %2095 = vmatpush.msra.mxu0 %v5260_v44  ;;  %2115 = vmatpush.msra.mxu1 %v5261_v34  ;;  %v2873_v62 = vld [vmem:[%s4822_s3 + $0x38] sm:$0xff]  ;;  %v2874_v44 = vld [vmem:[%s4822_s3 + $0x10] sm:$0xff] }
 0x786   : > { %2135 = vmatpush.msra.mxu2 %v5262_v53  ;;  %2155 = vmatpush.msra.mxu3 %v5263_v55  ;;  %v2875_v34 = vld [vmem:[%s4822_s3 + $0x18] sm:$0xff] }
 0x787   : > { %2096 = vmatpush.msra.mxu0 %v5264_v47  ;;  %2116 = vmatpush.msra.mxu1 %v5265_v24 }
 0x788   : > { %2136 = vmatpush.msra.mxu2 %v5266_v35  ;;  %2156 = vmatpush.msra.mxu3 %v5267_v36 }
 0x7fa   : > { %v1930_v37 = vpop.f32.mrf.mxu0  ;;  %v1950_v38 = vpop.f32.mrf.mxu1 }
 0x7fb   : > { %2009 = vmatmul.f32.vlgmr.msrb.gmra.mxu0 %v1930_v37  ;;  %2029 = vmatmul.f32.vlgmr.msrb.gmra.mxu1 %v1950_v38 }
 0x7fc   : > { %2764 = vmatpush.msk.msrb.mxu0 %vm478_vm0, %v5268_v39  ;;  %2766 = vmatpush.msk.msrb.mxu1 %vm478_vm0, %v5269_v40 }
 0x7fe   : > { %2173 = vmatpush.msrb.mxu0 %v5270_v41  ;;  %2193 = vmatpush.msrb.mxu1 %v5271_v42 }
 0x800   : > { %2174 = vmatpush.msrb.mxu0 %v5272_v63  ;;  %2194 = vmatpush.msrb.mxu1 %v5273_v3 }
 0x801   : > { %v1970_v20 = vpop.f32.mrf.mxu2  ;;  %v1990_v21 = vpop.f32.mrf.mxu3 }
 0x802   : > { %2049 = vmatmul.f32.vlgmr.msrb.gmra.mxu2 %v1970_v20  ;;  %2069 = vmatmul.f32.vlgmr.msrb.gmra.mxu3 %v1990_v21 }
 0x803   : > { %2757 = vmatmul.msk.f32.vlgmr.msra.gmra.mxu0 %vm474_vm1, %v2755_v43  ;;  %2759 = vmatmul.msk.f32.vlgmr.msra.gmra.mxu1 %vm474_vm1, %v2755_v43 }
 0x804   : > { %2768 = vmatpush.msk.msrb.mxu2 %vm478_vm0, %v5274_v4  ;;  %2770 = vmatpush.msk.msrb.mxu3 %vm478_vm0, %v5275_v11 }
 0x805   : > { %2175 = vmatpush.msrb.mxu0 %v5276_v14  ;;  %2195 = vmatpush.msrb.mxu1 %v5277_v7 }
 0x806   : > { %2213 = vmatpush.msrb.mxu2 %v5278_v17  ;;  %2233 = vmatpush.msrb.mxu3 %v5279_v0  ;;  %v2876_v0 = vld [vmem:[%s4826_s7 + $0x78] sm:$0xff] }
 0x807   : > { %2176 = vmatpush.msrb.mxu0 %v5280_v15  ;;  %2196 = vmatpush.msrb.mxu1 %v5281_v13  ;;  %v2879_v15 = vld [vmem:[%s4826_s7 + $0xf0] sm:$0xff]  ;;  %v2880_v13 = vld [vmem:[%s4826_s7 + $0x68] sm:$0xff] }
 0x808   : > { %2214 = vmatpush.msrb.mxu2 %v5282_v18  ;;  %2234 = vmatpush.msrb.mxu3 %v5283_v19  ;;  %v2883_v18 = vld [vmem:[%s4826_s7 + $0xe0] sm:$0xff]  ;;  %v2884_v19 = vld [vmem:[%s4826_s7 + $0x58] sm:$0xff] }
 0x809   : > { %2772 = vmatpush.msk.msra.mxu0 %vm478_vm0, %v5284_v10  ;;  %2774 = vmatpush.msk.msra.mxu1 %vm478_vm0, %v5285_v1  ;;  %v2885_v10 = vld [vmem:[%s4826_s7 + $0xd8] sm:$0xff]  ;;  %v2886_v1 = vld [vmem:[%s4826_s7 + $0x50] sm:$0xff] }
 0x80a   : > { %2761 = vmatmul.msk.f32.vlgmr.msra.gmra.mxu2 %vm474_vm1, %v2755_v43  ;;  %2763 = vmatmul.msk.f32.vlgmr.msra.gmra.mxu3 %vm474_vm1, %v2755_v43 }
 0x80b   : > { %2215 = vmatpush.msrb.mxu2 %v5286_v57  ;;  %2235 = vmatpush.msrb.mxu3 %v5287_v61  ;;  %v2887_v57 = vld [vmem:[%s4826_s7 + $0xd0] sm:$0xff]  ;;  %v2888_v61 = vld [vmem:[%s4826_s7 + $0x48] sm:$0xff] }
 0x80c   : > { %2765 = vmatmul.msk.f32.vlgmr.msrb.gmra.mxu0 %vm474_vm1, %v2755_v43  ;;  %2767 = vmatmul.msk.f32.vlgmr.msrb.gmra.mxu1 %vm474_vm1, %v2755_v43 }
 0x80d   : > { %2216 = vmatpush.msrb.mxu2 %v5288_v49  ;;  %2236 = vmatpush.msrb.mxu3 %v5289_v45  ;;  %v2889_v49 = vld [vmem:[%s4826_s7 + $0xc8] sm:$0xff]  ;;  %v2890_v45 = vld [vmem:[%s4826_s7 + $0x40] sm:$0xff] }
 0x80e   : > { %2253 = vmatpush.msra.mxu0 %v5290_v46  ;;  %2273 = vmatpush.msra.mxu1 %v5291_v50  ;;  %v2891_v46 = vld [vmem:[%s4826_s7 + $0xc0] sm:$0xff]  ;;  %v2892_v50 = vld [vmem:[%s4826_s7 + $0x38] sm:$0xff] }
 0x80f   : > { %2776 = vmatpush.msk.msra.mxu2 %vm478_vm0, %v5292_v58  ;;  %2778 = vmatpush.msk.msra.mxu3 %vm478_vm0, %v5293_v48  ;;  %v2893_v58 = vld [vmem:[%s4826_s7 + $0xb8] sm:$0xff]  ;;  %v2894_v48 = vld [vmem:[%s4826_s7 + $0x30] sm:$0xff] }
 0x810   : > { %2254 = vmatpush.msra.mxu0 %v5294_v22  ;;  %2274 = vmatpush.msra.mxu1 %v5295_v23  ;;  %v2895_v22 = vld [vmem:[%s4826_s7 + $0xb0] sm:$0xff]  ;;  %v2896_v23 = vld [vmem:[%s4826_s7 + $0x28] sm:$0xff] }
 0x811   : > { %2293 = vmatpush.msra.mxu2 %v2868_v26  ;;  %2313 = vmatpush.msra.mxu3 %v2869_v27  ;;  %v2897_v26 = vld [vmem:[%s4826_s7 + $0xa8] sm:$0xff]  ;;  %v2898_v27 = vld [vmem:[%s4826_s7 + $0x20] sm:$0xff] }
 0x812   : > { %2769 = vmatmul.msk.f32.vlgmr.msrb.gmra.mxu2 %vm474_vm1, %v2755_v43  ;;  %2771 = vmatmul.msk.f32.vlgmr.msrb.gmra.mxu3 %vm474_vm1, %v2755_v43 }
 0x813   : > { %2255 = vmatpush.msra.mxu0 %v5296_v28  ;;  %2275 = vmatpush.msra.mxu1 %v5297_v29  ;;  %v2899_v28 = vld [vmem:[%s4826_s7 + $0xa0] sm:$0xff]  ;;  %v2900_v29 = vld [vmem:[%s4826_s7 + $0x18] sm:$0xff] }
 0x814   : > { %2294 = vmatpush.msra.mxu2 %v2870_v30  ;;  %2314 = vmatpush.msra.mxu3 %v2871_v31  ;;  %v2901_v30 = vld [vmem:[%s4826_s7 + $0x98] sm:$0xff]  ;;  %v2902_v31 = vld [vmem:[%s4826_s7 + $0x10] sm:$0xff] }
 0x815   : > { %2256 = vmatpush.msra.mxu0 %v5298_v32  ;;  %2276 = vmatpush.msra.mxu1 %v5299_v59  ;;  %v2903_v32 = vld [vmem:[%s4826_s7 + $0x90] sm:$0xff]  ;;  %v2904_v59 = vld [vmem:[%s4826_s7 + $0x8] sm:$0xff] }
 0x816   : > { %2773 = vmatmul.msk.f32.vlgmr.msra.gmra.mxu0 %vm474_vm1, %v2755_v43  ;;  %2775 = vmatmul.msk.f32.vlgmr.msra.gmra.mxu1 %vm474_vm1, %v2755_v43 }
 0x817   : > { %2295 = vmatpush.msra.mxu2 %v2872_v33  ;;  %2315 = vmatpush.msra.mxu3 %v2873_v62  ;;  %v2905_v33 = vld [vmem:[%s4826_s7 + $0x88] sm:$0xff]  ;;  %v2906_v62 = vld [vmem:[%s4826_s7] sm:$0xff] }
 0x819   : > { %2296 = vmatpush.msra.mxu2 %v2874_v44  ;;  %2316 = vmatpush.msra.mxu3 %v2875_v34  ;;  %v2907_v44 = vld [vmem:[%s4826_s7 + $0x80] sm:$0xff] }
 0x81a   : > { %2777 = vmatmul.msk.f32.vlgmr.msra.gmra.mxu2 %vm474_vm1, %v2755_v43  ;;  %2779 = vmatmul.msk.f32.vlgmr.msra.gmra.mxu3 %vm474_vm1, %v2755_v43 }
 0x878   : > { %v2010_v53 = vpop.f32.mrf.mxu0  ;;  %v2030_v55 = vpop.f32.mrf.mxu1 }
 0x879   : > { %v2011_v47 = vadd.f32 %v3947_v25, %v2010_v53 }
 0x87b   : > { %v2031_v36 = vadd.f32 %v2030_v55, %v2011_v47 }
 0x880   : > { %v2098_v24 = vpop.f32.mrf.mxu0  ;;  %v2118_v35 = vpop.f32.mrf.mxu1 }
 0x881   : > { %v2099_v43 = vadd.f32 %v2098_v24, %v3426_v51  ;;  %v2119_v21 = vadd.f32 %v2118_v35, %v3428_v56  ;;  %v2908_v24 = vld [vmem:[%s4826_s7 + $0x178] sm:$0xff] }
 0x882   : > { %v2909_v35 = vld [vmem:[%s4826_s7 + $0x1f8] sm:$0xff] }
 0x885   : > { %v2050_v37 = vpop.f32.mrf.mxu2  ;;  %v2070_v38 = vpop.f32.mrf.mxu3 }
 0x886   : > { %v2051_v39 = vadd.f32 %v2050_v37, %v2031_v36  ;;  %v2912_v36 = vld [vmem:[%s4826_s7 + $0x168] sm:$0xff] }
 0x887   : > { %v2913_v37 = vld [vmem:[%s4826_s7 + $0x1e8] sm:$0xff] }
 0x888   : > { %v2071_v40 = vadd.f32 %v2070_v38, %v2051_v39  ;;  %v2914_v38 = vld [vmem:[%s4826_s7 + $0x160] sm:$0xff] }
 0x889   : > { %v2178_v41 = vpop.f32.mrf.mxu0  ;;  %v2198_v42 = vpop.f32.mrf.mxu1  ;;  %v2915_v39 = vld [vmem:[%s4826_s7 + $0x1e0] sm:$0xff] }
 0x88a   : > { %v2073_v63 = vmax.f32 %v2071_v40, 0.0  ;;  %v2179_v3 = vadd.f32 %v2178_v41, %v3422_v52  ;;  %v2199_v20 = vadd.f32 %v2198_v42, %v3424_v60  ;;  %v2916_v40 = vld [vmem:[%s4826_s7 + $0x158] sm:$0xff]  ;;  %v2918_v42 = vld [vmem:[%s4826_s7 + $0x150] sm:$0xff] }
 0x88b   : > { %v2917_v41 = vld [vmem:[%s4826_s7 + $0x1d8] sm:$0xff] }
 0x88c   : > { %2754 = vst.msk [vmem:[%s3955_s13 + $0x8] sm:$0xf] %vm1046_vm5, %v2073_v63  ;;  %2336 = vmatpush.xpose.msrb.mxu0 %v2179_v3  ;;  %2356 = vmatpush.xpose.msrb.mxu1 %v2199_v20  ;;  %v2919_v63 = vld [vmem:[%s4826_s7 + $0x1d0] sm:$0xff]  ;;  %v2920_v3 = vld [vmem:[%s4826_s7 + $0x148] sm:$0xff] }
 0x88d   : > { %v2138_v25 = vpop.f32.mrf.mxu2  ;;  %v2158_v4 = vpop.f32.mrf.mxu3  ;;  %v2921_v20 = vld [vmem:[%s4826_s7 + $0x1c8] sm:$0xff] }
 0x88f   : > { %2337 = vmatmul.f32.vlgmr.msrb.gmra.mxu0 %v2099_v43  ;;  %2357 = vmatmul.f32.vlgmr.msrb.gmra.mxu1 %v2119_v21  ;;  %v2922_v43 = vld [vmem:[%s4826_s7 + $0x140] sm:$0xff] }
 0x890   : > { %v2923_v21 = vld [vmem:[%s4826_s7 + $0x1c0] sm:$0xff] }
 0x893   : > { %v2258_v11 = vpop.f32.mrf.mxu0  ;;  %v2278_v14 = vpop.f32.mrf.mxu1 }
 0x894   : > { %v2259_v7 = vadd.f32 %v2258_v11, %v3449_v54  ;;  %v2279_v52 = vadd.f32 %v2278_v14, %v5118_v2  ;;  %v2877_v54 = vld [vmem:[%s4826_s7 + $0xf8] sm:$0xff]  ;;  %v2139_v2 = vadd.f32 %v2138_v25, %v5121_v12  ;;  %v2881_v12 = vld [vmem:[%s4826_s7 + $0xe8] sm:$0xff]  ;;  %v2926_v11 = vld [vmem:[%s4826_s7 + $0x130] sm:$0xff] }
 0x895   : > { %v2218_v17 = vpop.f32.mrf.mxu2  ;;  %v2238_v60 = vpop.f32.mrf.mxu3  ;;  %v2924_v25 = vld [vmem:[%s4826_s7 + $0x138] sm:$0xff]  ;;  %v2927_v14 = vld [vmem:[%s4826_s7 + $0x1b0] sm:$0xff] }
 0x896   : > { %v2219_v51 = vadd.f32 %v2218_v17, %v5119_v6  ;;  %v2239_v56 = vadd.f32 %v2238_v60, %v5120_v8  ;;  %2780 = vmatpush.msk.msra.mxu0 %vm869_vm2, %v2259_v7  ;;  %2782 = vmatpush.msk.msra.mxu1 %vm869_vm2, %v2279_v52  ;;  %v2159_v6 = vadd.f32 %v2158_v4, %v5122_v16  ;;  %v2878_v8 = vld [vmem:[%s4826_s7 + $0x70] sm:$0xff]  ;;  %v2882_v16 = vld [vmem:[%s4826_s7 + $0x60] sm:$0xff]  ;;  %v2925_v4 = vld [vmem:[%s4826_s7 + $0x1b8] sm:$0xff] }
 0x897   : > { %v2928_v7 = vld [vmem:[%s4826_s7 + $0x128] sm:$0xff]  ;;  %v2930_v17 = vld [vmem:[%s4826_s7 + $0x120] sm:$0xff] }
 0x898   : > { %2507 = vmatpush.msrb.mxu0 %v2876_v0  ;;  %2527 = vmatpush.msrb.mxu1 %v2877_v54  ;;  %v2929_v52 = vld [vmem:[%s4826_s7 + $0x1a8] sm:$0xff]  ;;  %v2931_v60 = vld [vmem:[%s4826_s7 + $0x1a0] sm:$0xff]  ;;  %v2934_v0 = vld [vmem:[%s4826_s7 + $0x110] sm:$0xff] }
 0x899   : > { %2376 = vmatpush.xpose.msrb.mxu2 %v2219_v51  ;;  %2396 = vmatpush.xpose.msrb.mxu3 %v2239_v56  ;;  %v2932_v51 = vld [vmem:[%s4826_s7 + $0x118] sm:$0xff]  ;;  %v2935_v54 = vld [vmem:[%s4826_s7 + $0x190] sm:$0xff] }
 0x89a   : > { %2508 = vmatpush.msrb.mxu0 %v2878_v8  ;;  %2528 = vmatpush.msrb.mxu1 %v2879_v15  ;;  %v2933_v56 = vld [vmem:[%s4826_s7 + $0x198] sm:$0xff]  ;;  %v2938_v8 = vld [vmem:[%s4826_s7 + $0x100] sm:$0xff] }
 0x89b   : > { %v2939_v15 = vld [vmem:[%s4826_s7 + $0x180] sm:$0xff] }
 0x89c   : > { %2377 = vmatmul.f32.vlgmr.msrb.gmra.mxu2 %v2139_v2  ;;  %2397 = vmatmul.f32.vlgmr.msrb.gmra.mxu3 %v2159_v6  ;;  %v2936_v2 = vld [vmem:[%s4826_s7 + $0x108] sm:$0xff] }
 0x89d   : > { %2509 = vmatpush.msrb.mxu0 %v2880_v13  ;;  %2529 = vmatpush.msrb.mxu1 %v2881_v12  ;;  %v2298_v34 = vpop.f32.mrf.mxu2  ;;  %v2318_v53 = vpop.f32.mrf.mxu3  ;;  %v2937_v6 = vld [vmem:[%s4826_s7 + $0x188] sm:$0xff] }
 0x89e   : > { %v2299_v55 = vadd.f32 %v2298_v34, %v5145_v5  ;;  %v2319_v47 = vadd.f32 %v2318_v53, %v5146_v9  ;;  %v2910_v5 = vld [vmem:[%s4826_s7 + $0x170] sm:$0xff] }
 0x89f   : > { %2510 = vmatpush.msrb.mxu0 %v2882_v16  ;;  %2530 = vmatpush.msrb.mxu1 %v2883_v18  ;;  %v2911_v9 = vld [vmem:[%s4826_s7 + $0x1f0] sm:$0xff] }
 0x8a0   : > { %2784 = vmatpush.msk.msra.mxu2 %vm869_vm2, %v2299_v55  ;;  %2786 = vmatpush.msk.msra.mxu3 %vm869_vm2, %v2319_v47 }
 0x8a1   : > { %2511 = vmatpush.msrb.mxu0 %v2884_v19  ;;  %2531 = vmatpush.msrb.mxu1 %v2885_v10 }
 0x8a2   : > { %2547 = vmatpush.msrb.mxu2 %v2908_v24  ;;  %2567 = vmatpush.msrb.mxu3 %v2909_v35 }
 0x8a3   : > { %2512 = vmatpush.msrb.mxu0 %v2886_v1  ;;  %2532 = vmatpush.msrb.mxu1 %v2887_v57 }
 0x8a4   : > { %2548 = vmatpush.msrb.mxu2 %v2910_v5  ;;  %2568 = vmatpush.msrb.mxu3 %v2911_v9 }
 0x8a5   : > { %2513 = vmatpush.msrb.mxu0 %v2888_v61  ;;  %2533 = vmatpush.msrb.mxu1 %v2889_v49 }
 0x8a6   : > { %2549 = vmatpush.msrb.mxu2 %v2912_v36  ;;  %2569 = vmatpush.msrb.mxu3 %v2913_v37 }
 0x8a7   : > { %2514 = vmatpush.msrb.mxu0 %v2890_v45  ;;  %2534 = vmatpush.msrb.mxu1 %v2891_v46 }
 0x8a8   : > { %2550 = vmatpush.msrb.mxu2 %v2914_v38  ;;  %2570 = vmatpush.msrb.mxu3 %v2915_v39 }
 0x8a9   : > { %2515 = vmatpush.msrb.mxu0 %v2892_v50  ;;  %2535 = vmatpush.msrb.mxu1 %v2893_v58 }
 0x8aa   : > { %2551 = vmatpush.msrb.mxu2 %v2916_v40  ;;  %2571 = vmatpush.msrb.mxu3 %v2917_v41 }
 0x8ab   : > { %2516 = vmatpush.msrb.mxu0 %v2894_v48  ;;  %2536 = vmatpush.msrb.mxu1 %v2895_v22 }
 0x8ac   : > { %2552 = vmatpush.msrb.mxu2 %v2918_v42  ;;  %2572 = vmatpush.msrb.mxu3 %v2919_v63 }
 0x8ad   : > { %2517 = vmatpush.msrb.mxu0 %v2896_v23  ;;  %2537 = vmatpush.msrb.mxu1 %v2897_v26 }
 0x8ae   : > { %2553 = vmatpush.msrb.mxu2 %v2920_v3  ;;  %2573 = vmatpush.msrb.mxu3 %v2921_v20 }
 0x8af   : > { %2518 = vmatpush.msrb.mxu0 %v2898_v27  ;;  %2538 = vmatpush.msrb.mxu1 %v2899_v28 }
 0x8b0   : > { %2554 = vmatpush.msrb.mxu2 %v2922_v43  ;;  %2574 = vmatpush.msrb.mxu3 %v2923_v21 }
 0x8b1   : > { %2519 = vmatpush.msrb.mxu0 %v2900_v29  ;;  %2539 = vmatpush.msrb.mxu1 %v2901_v30  ;;  %v2940_v30 = vld [vmem:[%s4827_s8] ss:$0 sm:$0xff] }
 0x8b2   : > { %2555 = vmatpush.msrb.mxu2 %v2924_v25  ;;  %2575 = vmatpush.msrb.mxu3 %v2925_v4 }
 0x8b3   : > { %2520 = vmatpush.msrb.mxu0 %v2902_v31  ;;  %2540 = vmatpush.msrb.mxu1 %v2903_v32 }
 0x8b4   : > { %2556 = vmatpush.msrb.mxu2 %v2926_v11  ;;  %2576 = vmatpush.msrb.mxu3 %v2927_v14 }
 0x8b5   : > { %2521 = vmatpush.msrb.mxu0 %v2904_v59  ;;  %2541 = vmatpush.msrb.mxu1 %v2905_v33 }
 0x8b6   : > { %2557 = vmatpush.msrb.mxu2 %v2928_v7  ;;  %2577 = vmatpush.msrb.mxu3 %v2929_v52 }
 0x8b7   : > { %2522 = vmatpush.msrb.mxu0 %v2906_v62  ;;  %2542 = vmatpush.msrb.mxu1 %v2907_v44 }
 0x8b8   : > { %2558 = vmatpush.msrb.mxu2 %v2930_v17  ;;  %2578 = vmatpush.msrb.mxu3 %v2931_v60 }
 0x8ba   : > { %2559 = vmatpush.msrb.mxu2 %v2932_v51  ;;  %2579 = vmatpush.msrb.mxu3 %v2933_v56 }
 0x8bc   : > { %2560 = vmatpush.msrb.mxu2 %v2934_v0  ;;  %2580 = vmatpush.msrb.mxu3 %v2935_v54 }
 0x8be   : > { %2561 = vmatpush.msrb.mxu2 %v2936_v2  ;;  %2581 = vmatpush.msrb.mxu3 %v2937_v6 }
 0x8c0   : > { %2562 = vmatpush.msrb.mxu2 %v2938_v8  ;;  %2582 = vmatpush.msrb.mxu3 %v2939_v15 }
 0x90c   : > { %v2338_v13 = vpop.f32.mrf.mxu0  ;;  %v2358_v12 = vpop.f32.mrf.mxu1 }
 0x90d   : > { %v2359_v16 = vadd.f32 %v2358_v12, %v2338_v13 }
 0x91f   : > { %v2378_v18 = vpop.f32.mrf.mxu2  ;;  %v2398_v10 = vpop.f32.mrf.mxu3 }
 0x920   : > { %v2379_v19 = vadd.f32 %v2378_v18, %v2359_v16 }
 0x922   : > { %v2399_v1 = vadd.f32 %v2398_v10, %v2379_v19 }
 0x924   : > { %v2401_v57 = vsel %vm853_vm3, %v2399_v1, -inf }
 0x925   : > { %2402 = vmax.xlane.f32.xlu0 %v2401_v57 }
 0x998   : > { %v2403_v61 = vpop.xlane.xlu0 %2402 }
 0x999   : > { %v2404_v49 = vsub.f32 %v2399_v1, %v2403_v61 }
 0x99b   : > { %v2405_v45 = vmul.f32 1.442695, %v2404_v49 }
 0x99d   : > { %2812 = vpow2.f32 %v2405_v45 }
 0x9a3   : > { %v2813_v46 = vpop.eup %2812 }
 0x9a4   : > { %v2407_v50 = vsel %vm853_vm3, %v2813_v46, 0.0 }
 0x9a5   : > { %2408 = vadd.xlane.f32.xlu1 %v2407_v50 }
 0xa18   : > { %v2409_v58 = vpop.xlane.xlu1 %2408 }
 0xa19   : > { %2814 = vrcp.f32 %v2409_v58 }
 0xa1f   : > { %v2815_v48 = vpop.eup %2814 }
 0xa20   : > { %v2411_v22 = vmul.f32 %v2815_v48, %v2813_v46 }
 0xa22   : > { %2781 = vmatmul.msk.f32.vlgmr.msra.gmra.mxu0 %vm865_vm4, %v2411_v22  ;;  %2783 = vmatmul.msk.f32.vlgmr.msra.gmra.mxu1 %vm865_vm4, %v2411_v22 }
 0xa23   : > { %2785 = vmatmul.msk.f32.vlgmr.msra.gmra.mxu2 %vm865_vm4, %v2411_v22  ;;  %2787 = vmatmul.msk.f32.vlgmr.msra.gmra.mxu3 %vm865_vm4, %v2411_v22 }
 0xa9f   : > { %v2444_v23 = vpop.f32.mrf.mxu0  ;;  %v2464_v26 = vpop.f32.mrf.mxu1 }
 0xaa0   : > { %2523 = vmatmul.f32.vlgmr.msrb.gmra.mxu0 %v2444_v23  ;;  %2543 = vmatmul.f32.vlgmr.msrb.gmra.mxu1 %v2464_v26 }
 0xaa6   : > { %v2484_v27 = vpop.f32.mrf.mxu2  ;;  %v2504_v28 = vpop.f32.mrf.mxu3 }
 0xaa7   : > { %2563 = vmatmul.f32.vlgmr.msrb.gmra.mxu2 %v2484_v27  ;;  %2583 = vmatmul.f32.vlgmr.msrb.gmra.mxu3 %v2504_v28 }
 0xb1d   : > { %v2524_v29 = vpop.f32.mrf.mxu0  ;;  %v2544_v32 = vpop.f32.mrf.mxu1 }
 0xb1e   : > { %v2525_v31 = vadd.f32 %v2940_v30, %v2524_v29 }
 0xb20   : > { %v2545_v59 = vadd.f32 %v2544_v32, %v2525_v31 }
 0xb2a   : > { %v2564_v33 = vpop.f32.mrf.mxu2  ;;  %v2584_v44 = vpop.f32.mrf.mxu3 }
 0xb2b   : > { %v2565_v62 = vadd.f32 %v2564_v33, %v2545_v59 }
 0xb2d   : > { %v2585_v34 = vadd.f32 %v2584_v44, %v2565_v62 }
 0xb2f   : > { %v2587_v53 = vmax.f32 %v2585_v34, 0.0 }
 0xb31   : > { %2788 = vst.msk [vmem:[%s3955_s13 + $0xc] sm:$0xf] %vm1046_vm5, %v2587_v53 }
 0xb32 PF: > { %s19_s30 = sadd.s32 1, %s2947_s30  }
 0xb33   : > { %p16_p4 = scmp.ge.s32.totalorder %s19_s30, 4  }
 0xb35   :  { %18 = sbr.rel (!%p16_p4) target bundleno = 1 (0x1), region = 92 }

// kernel: point_transformer_cls.15
= control target key start
LH: loop header
LB: loop body
LE: loop exit
PB: predicated region body
PF: predicated region fallthrough
CT: control target
= control target key end

     0   :  { %s334_s12 = smov 0   ;;  %s369_s0 = inlined_call_operand.vmem [shape: f32[32,35], index: 0, kind: input, shape index: {}]   ;;  %s370_s1 = inlined_call_operand.vmem [shape: f32[35,64], index: 1, kind: input, shape index: {}]   ;;  %s371_s2 = inlined_call_operand.vmem [shape: f32[1,64], index: 2, kind: input, shape index: {}]   ;;  %s372_s3 = inlined_call_operand.vmem [shape: f32[32,64], index: 3, kind: output, shape index: {}]  }
   0x1 LB: > { %s278_s13 = sadd.s32 4294967295, %s312_s12   ;;  %p282_p0 = scmp.ge.s32.totalorder %s312_s12, 1  ;;  %s312_s12 = sphi %s334_s12, %s13_s12  }
   0x2   : > { %p138_p1 = scmp.lt.s32.totalorder %s312_s12, 3 }
   0x4   : > { %p139_p2 = pnand %p282_p0, %p138_p1 }
   0x5   : > { %s283_s18 = sshll.u32 (!%p139_p2), %s278_s13, 1 }
   0x6   : > { %142 = sbr.rel (%p139_p2) target bundleno = 151 (0x97), region = 32  ;;  %p163_p3 = scmp.lt.s32.totalorder (!%p139_p2), %s283_s18, 3 }
   0xb   : > { %v180_v0 = vld [vmem:[%s370_s1 + $0x20] sm:$0x7]  ;;  %vm192_vm0 = vcmask 1042432   ;;  %v179_v1 = vld [vmem:[%s370_s1 + $0x18] sm:$0xff]  ;;  %v178_v2 = vld [vmem:[%s370_s1 + $0x10] sm:$0xff]  ;;  %s374_s18 = smov (!%p163_p3, %s283_s18), 3 }
   0xc   : > { %287 = vmatpush.msk.msra.mxu0 %vm192_vm0, %v180_v0  ;;  %292 = vmatpush.msk.msra.mxu1 %vm192_vm0, %v180_v0  ;;  %v177_v3 = vld [vmem:[%s370_s1 + $0x8] sm:$0xff]  ;;  %s284_s23 = sshll.u32 %s374_s18, 3  ;;  %v176_v4 = vld [vmem:[%s370_s1] sm:$0xff]  ;;  %vm185_vm1 = vcmask 285696   ;;  %vm219_vm2 = vcmask 523264  }
   0xd   : > { %s166_s28 = scalar_lea.vmem %s369_s0, %s284_s23  ;;  %v305_v7 = vld [vmem:[%s371_s2] ss:$0 sm:$0xff]  ;;  %s172_s6 = scalar_lea.vmem %s372_s3, %s284_s23 }
   0xe   : > { %208 = vmatpush.msra.mxu0 %v179_v1  ;;  %293 = vmatpush.msra.mxu1 %v179_v1  ;;  %v174_v5 = vld [vmem:[%s166_s28] sm:$0xff]  ;;  %v175_v6 = vld [vmem:[%s166_s28 + $0x8] sm:$0xff] }
  0x10   : > { %209 = vmatpush.msra.mxu0 %v178_v2  ;;  %294 = vmatpush.msra.mxu1 %v178_v2 }
  0x12   : > { %210 = vmatpush.msra.mxu0 %v177_v3  ;;  %295 = vmatpush.msra.mxu1 %v177_v3 }
  0x14   : > { %211 = vmatpush.msra.mxu0 %v176_v4  ;;  %296 = vmatpush.msra.mxu1 %v176_v4 }
  0x15   : > { %288 = vmatmul.msk.f32.vlgmr.msra.gmra.mxu0 %vm185_vm1, %v174_v5  ;;  %289 = vmatmul.msk.f32.vlgmr.msra.gmra.mxu1 %vm185_vm1, %v175_v6 }
  0x92   : > { %v213_v8 = vpop.f32.mrf.mxu0  ;;  %v216_v9 = vpop.f32.mrf.mxu1 }
  0x93   : > { %v214_v10 = vadd.f32 %v305_v7, %v213_v8  ;;  %v217_v11 = vadd.f32 %v305_v7, %v216_v9 }
  0x95   : > { %220 = vst.msk [vmem:[%s172_s6] sm:$0xff] %vm219_vm2, %v214_v10 }
  0x96   : > { %221 = vst.msk [vmem:[%s172_s6 + $0x8] sm:$0xff] %vm219_vm2, %v217_v11 }
  0x97 PF: > { %s13_s12 = sadd.s32 1, %s312_s12  }
  0x98   : > { %p10_p4 = scmp.ge.s32.totalorder %s13_s12, 4  }
  0x9a   :  { %12 = sbr.rel (!%p10_p4) target bundleno = 1 (0x1), region = 62 }

// kernel: point_transformer_cls.16
= control target key start
LH: loop header
LB: loop body
LE: loop exit
PB: predicated region body
PF: predicated region fallthrough
CT: control target
= control target key end

     0   :  { %s334_s12 = smov 0   ;;  %s378_s0 = inlined_call_operand.vmem [shape: f32[32,64], index: 0, kind: input, shape index: {}]   ;;  %s379_s1 = inlined_call_operand.vmem [shape: f32[64,64], index: 1, kind: input, shape index: {}]   ;;  %s380_s2 = inlined_call_operand.vmem [shape: f32[1,64], index: 2, kind: input, shape index: {}]   ;;  %s381_s3 = inlined_call_operand.vmem [shape: f32[32,64], index: 3, kind: output, shape index: {}]  }
   0x1 LB: > { %s276_s13 = sadd.s32 4294967295, %s312_s12   ;;  %p280_p0 = scmp.ge.s32.totalorder %s312_s12, 1  ;;  %s312_s12 = sphi %s334_s12, %s13_s12  }
   0x2   : > { %p138_p1 = scmp.lt.s32.totalorder %s312_s12, 3 }
   0x4   : > { %p139_p2 = pnand %p280_p0, %p138_p1 }
   0x5   : > { %s281_s18 = sshll.u32 (!%p139_p2), %s276_s13, 1 }
   0x6   : > { %142 = sbr.rel (%p139_p2) target bundleno = 157 (0x9d), region = 32  ;;  %p163_p3 = scmp.lt.s32.totalorder (!%p139_p2), %s281_s18, 3 }
   0xb   : > { %v183_v0 = vld [vmem:[%s379_s1 + $0x38] sm:$0xff]  ;;  %v182_v1 = vld [vmem:[%s379_s1 + $0x30] sm:$0xff]  ;;  %v181_v2 = vld [vmem:[%s379_s1 + $0x28] sm:$0xff]  ;;  %s383_s18 = smov (!%p163_p3, %s281_s18), 3  ;;  %vm188_vm0 = vcmask 523264  }
   0xc   : > { %203 = vmatpush.msra.mxu0 %v183_v0  ;;  %289 = vmatpush.msra.mxu1 %v183_v0  ;;  %v180_v3 = vld [vmem:[%s379_s1 + $0x20] sm:$0xff]  ;;  %v179_v4 = vld [vmem:[%s379_s1 + $0x18] sm:$0xff]  ;;  %s282_s25 = sshll.u32 %s383_s18, 3  ;;  %v178_v5 = vld [vmem:[%s379_s1 + $0x10] sm:$0xff] }
   0xd   : > { %v177_v6 = vld [vmem:[%s379_s1 + $0x8] sm:$0xff]  ;;  %s166_s5 = scalar_lea.vmem %s378_s0, %s282_s25  ;;  %v176_v7 = vld [vmem:[%s379_s1] sm:$0xff]  ;;  %s172_s13 = scalar_lea.vmem %s381_s3, %s282_s25 }
   0xe   : > { %204 = vmatpush.msra.mxu0 %v182_v1  ;;  %290 = vmatpush.msra.mxu1 %v182_v1  ;;  %v174_v8 = vld [vmem:[%s166_s5] sm:$0xff]  ;;  %v175_v9 = vld [vmem:[%s166_s5 + $0x8] sm:$0xff] }
   0xf   : > { %v305_v10 = vld [vmem:[%s380_s2] ss:$0 sm:$0xff] }
  0x10   : > { %205 = vmatpush.msra.mxu0 %v181_v2  ;;  %291 = vmatpush.msra.mxu1 %v181_v2 }
  0x12   : > { %206 = vmatpush.msra.mxu0 %v180_v3  ;;  %292 = vmatpush.msra.mxu1 %v180_v3 }
  0x14   : > { %207 = vmatpush.msra.mxu0 %v179_v4  ;;  %293 = vmatpush.msra.mxu1 %v179_v4 }
  0x16   : > { %208 = vmatpush.msra.mxu0 %v178_v5  ;;  %294 = vmatpush.msra.mxu1 %v178_v5 }
  0x18   : > { %209 = vmatpush.msra.mxu0 %v177_v6  ;;  %295 = vmatpush.msra.mxu1 %v177_v6 }
  0x1a   : > { %210 = vmatpush.msra.mxu0 %v176_v7  ;;  %296 = vmatpush.msra.mxu1 %v176_v7 }
  0x1b   : > { %285 = vmatmul.msk.f32.vlgmr.msra.gmra.mxu0 %vm188_vm0, %v174_v8  ;;  %286 = vmatmul.msk.f32.vlgmr.msra.gmra.mxu1 %vm188_vm0, %v175_v9 }
  0x98   : > { %v212_v11 = vpop.f32.mrf.mxu0  ;;  %v215_v12 = vpop.f32.mrf.mxu1 }
  0x99   : > { %v213_v13 = vadd.f32 %v305_v10, %v212_v11  ;;  %v216_v14 = vadd.f32 %v305_v10, %v215_v12 }
  0x9b   : > { %218 = vst.msk [vmem:[%s172_s13] sm:$0xff] %vm188_vm0, %v213_v13 }
  0x9c   : > { %219 = vst.msk [vmem:[%s172_s13 + $0x8] sm:$0xff] %vm188_vm0, %v216_v14 }
  0x9d PF: > { %s13_s12 = sadd.s32 1, %s312_s12  }
  0x9e   : > { %p10_p4 = scmp.ge.s32.totalorder %s13_s12, 4  }
  0xa0   :  { %12 = sbr.rel (!%p10_p4) target bundleno = 1 (0x1), region = 62 }

// kernel: point_transformer_cls.17
= control target key start
LH: loop header
LB: loop body
LE: loop exit
PB: predicated region body
PF: predicated region fallthrough
CT: control target
= control target key end

     0   :  { %vm49_vm0 = vcmask 523264   ;;  %vm207_vm1 = vcmask 25600   ;;  %s444_s1 = inlined_call_operand.vmem [shape: f32[64,256], index: 1, kind: input, shape index: {}]   ;;  %s445_s3 = inlined_call_operand.vmem [shape: f32[256,64], index: 3, kind: input, shape index: {}]   ;;  %s446_s0 = inlined_call_operand.vmem [shape: f32[2,64], index: 0, kind: input, shape index: {}]   ;;  %s447_s4 = inlined_call_operand.vmem [shape: f32[1,64], index: 4, kind: input, shape index: {}]   ;;  %s448_s5 = inlined_call_operand.vmem [shape: f32[64,4], index: 5, kind: input, shape index: {}]   ;;  %s449_s2 = inlined_call_operand.vmem [shape: f32[1,256], index: 2, kind: input, shape index: {}]   ;;  %s450_s6 = inlined_call_operand.vmem [shape: f32[1,4], index: 6, kind: input, shape index: {}]   ;;  %s451_s7 = inlined_call_operand.vmem [shape: f32[2,4], index: 7, kind: output, shape index: {}]  }
   0x1   :  { %v41_v0 = vld [vmem:[%s444_s1 + $0x70] sm:$0xff]  ;;  %v39_v1 = vld [vmem:[%s444_s1 + $0x60] sm:$0xff]  ;;  %v42_v2 = vld [vmem:[%s444_s1 + $0x78] sm:$0xff] }
   0x2   :  { %61 = vmatpush.msra.mxu0 %v41_v0  ;;  %81 = vmatpush.msra.mxu1 %v42_v2  ;;  %v40_v3 = vld [vmem:[%s444_s1 + $0x68] sm:$0xff]  ;;  %v37_v4 = vld [vmem:[%s444_s1 + $0x50] sm:$0xff]  ;;  %v38_v5 = vld [vmem:[%s444_s1 + $0x58] sm:$0xff] }
   0x3   :  { %v35_v6 = vld [vmem:[%s444_s1 + $0x40] sm:$0xff]  ;;  %v36_v7 = vld [vmem:[%s444_s1 + $0x48] sm:$0xff]  ;;  %v33_v8 = vld [vmem:[%s444_s1 + $0x30] sm:$0xff] }
   0x4   :  { %62 = vmatpush.msra.mxu0 %v39_v1  ;;  %82 = vmatpush.msra.mxu1 %v40_v3  ;;  %v110_v9 = vld [vmem:[%s445_s3 + $0x78] sm:$0xff]  ;;  %v109_v11 = vld [vmem:[%s445_s3 + $0x70] sm:$0xff]  ;;  %v108_v13 = vld [vmem:[%s445_s3 + $0x68] sm:$0xff] }
   0x5   :  { %v34_v10 = vld [vmem:[%s444_s1 + $0x38] sm:$0xff]  ;;  %131 = vmatpush.msra.mxu2 %v110_v9  ;;  %v125_v14 = vld [vmem:[%s445_s3 + $0xf0] sm:$0xff]  ;;  %v31_v15 = vld [vmem:[%s444_s1 + $0x20] sm:$0xff] }
   0x6   :  { %63 = vmatpush.msra.mxu0 %v37_v4  ;;  %83 = vmatpush.msra.mxu1 %v38_v5  ;;  %v126_v12 = vld [vmem:[%s445_s3 + $0xf8] sm:$0xff]  ;;  %v32_v16 = vld [vmem:[%s444_s1 + $0x28] sm:$0xff]  ;;  %v107_v17 = vld [vmem:[%s445_s3 + $0x60] sm:$0xff] }
   0x7   :  { %132 = vmatpush.msra.mxu2 %v109_v11  ;;  %151 = vmatpush.msra.mxu3 %v126_v12  ;;  %v124_v18 = vld [vmem:[%s445_s3 + $0xe8] sm:$0xff]  ;;  %v29_v19 = vld [vmem:[%s444_s1 + $0x10] sm:$0xff]  ;;  %v30_v20 = vld [vmem:[%s444_s1 + $0x18] sm:$0xff] }
   0x8   :  { %64 = vmatpush.msra.mxu0 %v35_v6  ;;  %84 = vmatpush.msra.mxu1 %v36_v7  ;;  %v106_v21 = vld [vmem:[%s445_s3 + $0x58] sm:$0xff]  ;;  %v123_v22 = vld [vmem:[%s445_s3 + $0xe0] sm:$0xff]  ;;  %v28_v24 = vld [vmem:[%s444_s1 + $0x8] sm:$0xff] }
   0x9   :  { %133 = vmatpush.msra.mxu2 %v108_v13  ;;  %152 = vmatpush.msra.mxu3 %v125_v14  ;;  %v27_v23 = vld [vmem:[%s444_s1] sm:$0xff]  ;;  %v105_v26 = vld [vmem:[%s445_s3 + $0x50] sm:$0xff]  ;;  %v122_v27 = vld [vmem:[%s445_s3 + $0xd8] sm:$0xff] }
   0xa   :  { %65 = vmatpush.msra.mxu0 %v33_v8  ;;  %85 = vmatpush.msra.mxu1 %v34_v10  ;;  %v26_v25 = vld [vmem:[%s446_s0] sm:$0x3]  ;;  %v104_v28 = vld [vmem:[%s445_s3 + $0x48] sm:$0xff]  ;;  %v121_v29 = vld [vmem:[%s445_s3 + $0xd0] sm:$0xff] }
   0xb   :  { %134 = vmatpush.msra.mxu2 %v107_v17  ;;  %153 = vmatpush.msra.mxu3 %v124_v18  ;;  %v103_v30 = vld [vmem:[%s445_s3 + $0x40] sm:$0xff]  ;;  %v120_v31 = vld [vmem:[%s445_s3 + $0xc8] sm:$0xff]  ;;  %v102_v32 = vld [vmem:[%s445_s3 + $0x38] sm:$0xff] }
   0xc   :  { %66 = vmatpush.msra.mxu0 %v31_v15  ;;  %86 = vmatpush.msra.mxu1 %v32_v16  ;;  %v119_v33 = vld [vmem:[%s445_s3 + $0xc0] sm:$0xff]  ;;  %v101_v34 = vld [vmem:[%s445_s3 + $0x30] sm:$0xff]  ;;  %v118_v35 = vld [vmem:[%s445_s3 + $0xb8] sm:$0xff] }
   0xd   :  { %135 = vmatpush.msra.mxu2 %v106_v21  ;;  %154 = vmatpush.msra.mxu3 %v123_v22  ;;  %v100_v36 = vld [vmem:[%s445_s3 + $0x28] sm:$0xff]  ;;  %v117_v37 = vld [vmem:[%s445_s3 + $0xb0] sm:$0xff]  ;;  %v99_v38 = vld [vmem:[%s445_s3 + $0x20] sm:$0xff] }
   0xe   :  { %67 = vmatpush.msra.mxu0 %v29_v19  ;;  %87 = vmatpush.msra.mxu1 %v30_v20  ;;  %v116_v39 = vld [vmem:[%s445_s3 + $0xa8] sm:$0xff]  ;;  %v98_v40 = vld [vmem:[%s445_s3 + $0x18] sm:$0xff]  ;;  %v115_v41 = vld [vmem:[%s445_s3 + $0xa0] sm:$0xff] }
   0xf   :  { %136 = vmatpush.msra.mxu2 %v105_v26  ;;  %155 = vmatpush.msra.mxu3 %v122_v27  ;;  %v97_v42 = vld [vmem:[%s445_s3 + $0x10] sm:$0xff]  ;;  %v114_v43 = vld [vmem:[%s445_s3 + $0x98] sm:$0xff]  ;;  %v96_v44 = vld [vmem:[%s445_s3 + $0x8] sm:$0xff] }
  0x10   :  { %68 = vmatpush.msra.mxu0 %v27_v23  ;;  %88 = vmatpush.msra.mxu1 %v28_v24  ;;  %v113_v45 = vld [vmem:[%s445_s3 + $0x90] sm:$0xff]  ;;  %v95_v46 = vld [vmem:[%s445_s3] sm:$0xff]  ;;  %v112_v47 = vld [vmem:[%s445_s3 + $0x88] sm:$0xff] }
  0x11   :  { %213 = vmatmul.msk.f32.vlgmr.msra.gmra.mxu0 %vm49_vm0, %v26_v25  ;;  %214 = vmatmul.msk.f32.vlgmr.msra.gmra.mxu1 %vm49_vm0, %v26_v25  ;;  %v111_v48 = vld [vmem:[%s445_s3 + $0x80] sm:$0xff]  ;;  %v179_v49 = vld [vmem:[%s448_s5 + $0x38] sm:$0xff]  ;;  %v178_v50 = vld [vmem:[%s448_s5 + $0x30] sm:$0xff] }
  0x12   :  { %137 = vmatpush.msra.mxu2 %v104_v28  ;;  %156 = vmatpush.msra.mxu3 %v121_v29  ;;  %v177_v51 = vld [vmem:[%s448_s5 + $0x28] sm:$0xff]  ;;  %v176_v52 = vld [vmem:[%s448_s5 + $0x20] sm:$0xff]  ;;  %v175_v62 = vld [vmem:[%s448_s5 + $0x18] sm:$0xff] }
  0x13   :  { %195 = vmatpush.msrb.mxu0 %v179_v49  ;;  %v43_v53 = vld [vmem:[%s449_s2] sm:$0x3]  ;;  %v174_v63 = vld [vmem:[%s448_s5 + $0x10] sm:$0xff]  ;;  %v173_v0 = vld [vmem:[%s448_s5 + $0x8] sm:$0xff] }
  0x14   :  { %138 = vmatpush.msra.mxu2 %v103_v30  ;;  %157 = vmatpush.msra.mxu3 %v120_v31  ;;  %v45_v54 = vperm.slane %v43_v53, 0  ;;  %v46_v55 = vperm.slane %v43_v53, 1  ;;  %v172_v1 = vld [vmem:[%s448_s5] sm:$0xff] }
  0x15   :  { %196 = vmatpush.msrb.mxu0 %v178_v50  ;;  %v216_v2 = vld [vmem:[%s447_s4] ss:$0 sm:$0xff] }
  0x16   :  { %139 = vmatpush.msra.mxu2 %v102_v32  ;;  %158 = vmatpush.msra.mxu3 %v119_v33  ;;  %v217_v8 = vld [vmem:[%s450_s6] ss:$0 sm:$0xff] }
  0x17   :  { %197 = vmatpush.msrb.mxu0 %v177_v51 }
  0x18   :  { %140 = vmatpush.msra.mxu2 %v101_v34  ;;  %159 = vmatpush.msra.mxu3 %v118_v35 }
  0x19   :  { %198 = vmatpush.msrb.mxu0 %v176_v52 }
  0x1a   :  { %141 = vmatpush.msra.mxu2 %v100_v36  ;;  %160 = vmatpush.msra.mxu3 %v117_v37 }
  0x1b   :  { %199 = vmatpush.msrb.mxu0 %v175_v62 }
  0x1c   :  { %142 = vmatpush.msra.mxu2 %v99_v38  ;;  %161 = vmatpush.msra.mxu3 %v116_v39 }
  0x1d   :  { %200 = vmatpush.msrb.mxu0 %v174_v63 }
  0x1e   :  { %143 = vmatpush.msra.mxu2 %v98_v40  ;;  %162 = vmatpush.msra.mxu3 %v115_v41 }
  0x1f   :  { %201 = vmatpush.msrb.mxu0 %v173_v0 }
  0x20   :  { %144 = vmatpush.msra.mxu2 %v97_v42  ;;  %163 = vmatpush.msra.mxu3 %v114_v43 }
  0x21   :  { %202 = vmatpush.msrb.mxu0 %v172_v1 }
  0x22   :  { %145 = vmatpush.msra.mxu2 %v96_v44  ;;  %164 = vmatpush.msra.mxu3 %v113_v45 }
  0x24   :  { %146 = vmatpush.msra.mxu2 %v95_v46  ;;  %165 = vmatpush.msra.mxu3 %v112_v47 }
  0x26   :  { %166 = vmatpush.msra.mxu3 %v111_v48 }
  0x8e   :  { %v70_v56 = vpop.f32.mrf.mxu0  ;;  %v90_v57 = vpop.f32.mrf.mxu1 }
  0x8f   :  { %v71_v58 = vadd.f32 %v70_v56, %v45_v54  ;;  %v91_v59 = vadd.f32 %v90_v57, %v46_v55 }
  0x91   :  { %v93_v60 = vmax.f32 %v71_v58, 0.0  ;;  %v94_v61 = vmax.f32 %v91_v59, 0.0 }
  0x93   :  { %147 = vmatmul.f32.vlgmr.msra.gmra.mxu2 %v93_v60  ;;  %167 = vmatmul.f32.vlgmr.msra.gmra.mxu3 %v94_v61 }
 0x116   :  { %v148_v3 = vpop.f32.mrf.mxu2  ;;  %v168_v4 = vpop.f32.mrf.mxu3 }
 0x117   :  { %v149_v5 = vadd.f32 %v216_v2, %v148_v3 }
 0x119   :  { %v169_v6 = vadd.f32 %v168_v4, %v149_v5 }
 0x11b   :  { %v171_v7 = vmax.f32 %v169_v6, 0.0 }
 0x11d   :  { %215 = vmatmul.msk.f32.vlgmr.msrb.gmra.mxu0 %vm49_vm0, %v171_v7 }
 0x19a   :  { %v204_v9 = vpop.f32.mrf.mxu0 }
 0x19b   :  { %v205_v10 = vadd.f32 %v217_v8, %v204_v9 }
 0x19d   :  { %208 = vst.msk [vmem:[%s451_s7] sm:$0x3] %vm207_vm1, %v205_v10 }

</bundles_post_ra>
